<compile_context>
chip_gen: v7x
topology: tpu7x:2x2x1
jax: 0.10.0
libtpu: 0.0.40
codegen_flags: <defaults>
</compile_context>

<pallas_src>
import functools

import jax
import jax.numpy as jnp
from jax.experimental import pallas as pl
from jax.experimental.pallas import tpu as pltpu

EPS = 1e-4       # channel-inflation epsilon from the torch module
BN_EPS = 1e-5    # PyTorch BatchNorm default eps
KT = 9           # temporal kernel size of unit_tkcn
TPAD = KT // 2   # logical temporal padding (4)
ALIGN = 8        # physical left pad of the temporal scratch (sublane aligned)


# ---------------------------------------------------------------------------
# Fused kernel for a consecutive group of STGKN blocks.
# Per grid step: b sequences go through every block of the group in VMEM:
#   GCN (Kronecker-folded sum_j A_j (x) W_j, BN folded) -> ReLU ->
#   9-tap temporal conv with COMPACT per-tap (cout, cout) weights
#   (stride-2 blocks compute only the even output frames) ->
#   residual (identity / compact 1x1 conv) -> ReLU.
# ---------------------------------------------------------------------------
def make_group_kernel(cfgs, b, t0, v):
    nparams = [6 if c['residual'] == 'conv' else 4 for c in cfgs]

    def kernel(*refs):
        x_ref = refs[0]
        pos = 1
        prefs = []
        for n_ in nparams:
            prefs.append(refs[pos:pos + n_])
            pos += n_
        o_ref = refs[pos]
        srefs = refs[pos + 1:]

        t = t0
        a2 = x_ref[...].reshape(b * t, v * cfgs[0]['cin'])   # lanes = (joint, ch)
        si = 0
        for cfg, pr in zip(cfgs, prefs):
            cin, cout = cfg['cin'], cfg['cout']
            stride, resm = cfg['stride'], cfg['residual']
            if resm == 'conv':
                gw_r, gb_r, tw_r, tb_r, rw_r, rb_r = pr
            else:
                gw_r, gb_r, tw_r, tb_r = pr

            # ---- spatial GCN (+folded BN) + ReLU: one MXU matmul ----------
            h = jnp.dot(a2.astype(jnp.bfloat16), gw_r[...],
                        preferred_element_type=jnp.float32)
            h = jnp.maximum(h + gb_r[...], 0.0)              # (b*t, v*cout)
            h3 = h.reshape(b, t, v * cout)

            t_out = t // stride
            rows = b * v * t_out
            tw = tw_r[...]                                   # (KT, cout, cout) bf16

            # ---- stage into temporal scratch, layout (b, v, time, cout) ---
            def fill(buf, val3, t_int):
                zpad = jnp.zeros((b, v, ALIGN, cout), jnp.float32)
                buf[:, :, 0:ALIGN, :] = zpad
                buf[:, :, ALIGN + t_int:ALIGN + t_int + ALIGN, :] = zpad
                for j in range(v):
                    buf[:, j:j + 1, ALIGN:ALIGN + t_int, :] = (
                        val3[:, :, j * cout:(j + 1) * cout]
                        .reshape(b, 1, t_int, cout))

            acc = jnp.zeros((rows, cout), jnp.float32)
            if stride == 1:
                pbuf = srefs[si]; si += 1
                fill(pbuf, h3, t)
                base = ALIGN - TPAD
                for k in range(KT):
                    win = pbuf[:, :, base + k:base + k + t_out, :]
                    win = win.reshape(rows, cout).astype(jnp.bfloat16)
                    acc = acc + jnp.dot(win, tw[k],
                                        preferred_element_type=jnp.float32)
            else:  # stride == 2: even/odd staging -> only even output frames
                ebuf = srefs[si]; obuf = srefs[si + 1]; si += 2
                h5 = h.reshape(b, t_out, 2, v * cout)
                fill(ebuf, h5[:, :, 0, :], t_out)            # even input frames
                fill(obuf, h5[:, :, 1, :], t_out)            # odd input frames
                base = ALIGN - TPAD // 2
                for m in range(5):                           # taps 0,2,4,6,8
                    win = ebuf[:, :, base + m:base + m + t_out, :]
                    win = win.reshape(rows, cout).astype(jnp.bfloat16)
                    acc = acc + jnp.dot(win, tw[2 * m],
                                        preferred_element_type=jnp.float32)
                for m in range(4):                           # taps 1,3,5,7
                    win = obuf[:, :, base + m:base + m + t_out, :]
                    win = win.reshape(rows, cout).astype(jnp.bfloat16)
                    acc = acc + jnp.dot(win, tw[2 * m + 1],
                                        preferred_element_type=jnp.float32)

            y = acc + tb_r[...]                              # rows = (b, v, t_out)

            # ---- back to the lane-dense (b*t_out, v*cout) slab ------------
            y4 = y.reshape(b, v, t_out, cout)
            y_l = jnp.concatenate(
                [y4[:, j].reshape(b * t_out, cout) for j in range(v)], axis=-1)

            # ---- residual --------------------------------------------------
            if resm == 'identity':
                y_l = y_l + a2
            elif resm == 'conv':
                if stride == 2:
                    a_s = a2.reshape(b, t_out, 2, v * cin)[:, :, 0, :]
                    a_s = a_s.reshape(b * t_out, v * cin)
                else:
                    a_s = a2
                rw = rw_r[...]                               # (cin, cout) bf16
                rb = rb_r[...]                               # (1, cout)
                rparts = []
                for j in range(v):
                    xv = a_s[:, j * cin:(j + 1) * cin].astype(jnp.bfloat16)
                    rparts.append(
                        jnp.dot(xv, rw, preferred_element_type=jnp.float32) + rb)
                y_l = y_l + jnp.concatenate(rparts, axis=-1)

            a2 = jnp.maximum(y_l, 0.0)
            t = t_out

        o_ref[...] = a2.reshape(b, t, a2.shape[-1]).astype(o_ref.dtype)

    return kernel


# ---------------------------------------------------------------------------
# pallas_call wrappers
# ---------------------------------------------------------------------------
def _const_spec(arr):
    shape = tuple(arr.shape)
    return pl.BlockSpec(shape, lambda i: (0,) * len(shape))


def _pick_batch(nm, t0, v):
    # Keep >= min(4, nm) grid steps (pipelining + megacore split) while
    # bounding the per-step matmul row count.
    target_grid = min(4, nm)
    best = 1
    for d in range(1, nm + 1):
        if nm % d == 0 and nm // d >= target_grid and d * t0 * v <= 1024:
            best = d
    return best


def plan_groups(cfgs, v, t0, budget_bytes=24 * 1024 * 1024):
    """Greedily fuse consecutive blocks while weights + scratch fit VMEM."""
    lengths, cur, cur_bytes, t = [], 0, 0, t0
    for cfg in cfgs:
        cin, cout, stride = cfg['cin'], cfg['cout'], cfg['stride']
        t_out = t // stride
        w_bytes = 2 * (v * cin * v * cout + KT * cout * cout
                       + (cin * cout if cfg['residual'] == 'conv' else 0))
        b_bytes = 4 * (v * cout + 2 * cout)
        lanes = -(-cout // 128) * 128
        t_int = t if stride == 1 else t_out
        nbuf = 1 if stride == 1 else 2
        scr = nbuf * v * (t_int + 2 * ALIGN) * lanes * 4
        blk = 2 * w_bytes + b_bytes + scr
        if cur and cur_bytes + blk > budget_bytes:
            lengths.append(cur)
            cur, cur_bytes = 0, 0
        cur += 1
        cur_bytes += blk
        t = t_out
    lengths.append(cur)
    return lengths


def group_call(x3, gparams, gcfgs, *, nm, t_in, v, final):
    b = _pick_batch(nm, t_in, v)
    kernel = make_group_kernel(gcfgs, b, t_in, v)

    w_in0 = v * gcfgs[0]['cin']
    in_specs = [pl.BlockSpec((b, t_in, w_in0), lambda i: (i, 0, 0))]
    args = [x3]
    scratch_defs = []
    t = t_in
    for p, cfg in zip(gparams, gcfgs):
        names = ['gcn_w', 'gcn_b', 'tcn_w', 'tcn_b']
        if cfg['residual'] == 'conv':
            names += ['res_w', 'res_b']
        for name in names:
            arr = p[name]
            # TODO(synk): grid-invariant weights could be single-buffered via
            #             pipeline_mode=pl.Buffered(1); left at the default.
            in_specs.append(_const_spec(arr))
            args.append(arr)
        stride, cout = cfg['stride'], cfg['cout']
        assert t % stride == 0
        t_out = t // stride
        t_int = t if stride == 1 else t_out
        for _ in range(1 if stride == 1 else 2):
            scratch_defs.append((b, v, t_int + 2 * ALIGN, cout))
        t = t_out

    cout_last = gcfgs[-1]['cout']
    w_out = v * cout_last
    out_dtype = jnp.float32 if final else jnp.bfloat16  # bf16 inter-group carry

    # explicit VMEM budget (v5e's default scoped limit is small)
    byt = sum(2 * a.size * a.dtype.itemsize for a in args)
    byt += 2 * b * t * w_out * jnp.dtype(out_dtype).itemsize
    for s in scratch_defs:
        byt += s[0] * s[1] * (-(-s[2] // 8) * 8) * (-(-s[3] // 128) * 128) * 4
    vmem_limit = int(min(64 * 1024 * 1024,
                         max(32 * 1024 * 1024, 2 * byt + (4 << 20))))

    out = pl.pallas_call(
        kernel,
        out_shape=jax.ShapeDtypeStruct((nm, t, w_out), out_dtype),
        grid=(nm // b,),
        in_specs=in_specs,
        out_specs=pl.BlockSpec((b, t, w_out), lambda i: (i, 0, 0)),
        scratch_shapes=[pltpu.VMEM(s, jnp.float32) for s in scratch_defs],
        compiler_params=pltpu.CompilerParams(
            dimension_semantics=("parallel",),
            vmem_limit_bytes=vmem_limit),
    )(*args)
    return out, t


def stgkn_forward(x, params, *, cfgs, groups):
    # x: (N, M, T, V, C) -- same axis convention as the PyTorch module.
    n, m, t, v, c = x.shape
    h = x.reshape(n * m, t, v * c)        # rows = (n*m, t), lanes = (v, c)
    t_cur = t
    pos = 0
    for glen in groups:
        gcfgs = cfgs[pos:pos + glen]
        gparams = params[pos:pos + glen]
        pos += glen
        h, t_cur = group_call(h, gparams, gcfgs, nm=n * m, t_in=t_cur, v=v,
                              final=(pos == len(cfgs)))
    cout = cfgs[-1]['cout']
    out = h.reshape(n, m, t_cur, v, cout)
    # TODO(synk): final transpose stays in XLA (folding it into the out_spec
    #             would make the kernel output lane-sparse, V=8 lanes).
    return jnp.transpose(out, (0, 1, 4, 2, 3))   # (N, M, C_out, T_out, V)


# ---------------------------------------------------------------------------
# Model construction (mirrors STGKN.__init__) and parameter prep with BN fold
# ---------------------------------------------------------------------------
def build_stage_cfgs(in_channels, base_channels, num_stages, inflate_stages,
                     down_stages, ch_ratio):
    cfgs = []
    if in_channels != base_channels:
        cfgs.append(dict(cin=in_channels, cout=base_channels, stride=1,
                         residual='none', n_convs=1))
    inflate_times = 0
    bc = base_channels
    for i in range(2, num_stages + 1):
        stride = 1 + (i in down_stages)
        cin = bc
        n_convs = 3
        if i in inflate_stages:
            n_convs = 6
            inflate_times += 1
        cout = int(base_channels * ch_ratio ** inflate_times + EPS)
        bc = cout
        residual = 'identity' if (cin == cout and stride == 1) else 'conv'
        cfgs.append(dict(cin=cin, cout=cout, stride=stride,
                         residual=residual, n_convs=n_convs))
    return cfgs


def build_graph(V):
    # TODO(synk): Graph(**graph_cfg) source not provided; deterministic
    #             3-subset (identity / inward / outward) chain graph instead.
    eye = jnp.eye(V, dtype=jnp.float32)
    adj = jnp.zeros((V, V), jnp.float32).at[
        jnp.arange(V - 1), jnp.arange(1, V)].set(1.0)

    def col_norm(a):
        d = a.sum(axis=0)
        return a * jnp.where(d > 0, 1.0 / d, 0.0)[None, :]

    return jnp.stack([eye, col_norm(adj), col_norm(adj.T)], axis=0)  # (3,V,V)


def make_bn_params(key, c):
    k1, k2, k3, k4 = jax.random.split(key, 4)
    gamma = 1.0 + 0.1 * jax.random.normal(k1, (c,), jnp.float32)
    beta = 0.1 * jax.random.normal(k2, (c,), jnp.float32)
    mean = 0.1 * jax.random.normal(k3, (c,), jnp.float32)
    var = 0.5 + jnp.abs(jax.random.normal(k4, (c,), jnp.float32))
    return gamma, beta, mean, var


def init_block_params(key, cfg, A_base, v, data_bn=None):
    cin, cout, K = cfg['cin'], cfg['cout'], cfg['n_convs']
    ks = jax.random.split(key, 8)
    reps = -(-K // A_base.shape[0])
    A = jnp.concatenate([A_base] * reps, axis=0)[:K]          # (K, V, V)

    gcn_w = 0.1 * jax.random.normal(ks[0], (K, cin, cout), jnp.float32)
    g_gamma, g_beta, g_mean, g_var = make_bn_params(ks[1], cout)
    tcn_w = 0.05 * jax.random.normal(ks[2], (KT, cout, cout), jnp.float32)
    tcn_b = 0.01 * jax.random.normal(ks[3], (cout,), jnp.float32)
    t_gamma, t_beta, t_mean, t_var = make_bn_params(ks[4], cout)

    # --- GCN: fold adjacency subsets + BN into one (V*cin, V*cout) weight ---
    g_scale = g_gamma * jax.lax.rsqrt(g_var + BN_EPS)
    G = jnp.einsum('jwv,jio->wivo', A, gcn_w) * g_scale[None, None, None, :]
    G = G.reshape(v * cin, v * cout)
    gb = jnp.tile(g_beta - g_mean * g_scale, v)[None, :]
    if data_bn is not None:               # fold eval-mode data_bn ('VC') in
        d_gamma, d_beta, d_mean, d_var = data_bn
        d_scale = d_gamma * jax.lax.rsqrt(d_var + BN_EPS)
        d_shift = d_beta - d_mean * d_scale
        gb = gb + d_shift[None, :] @ G
        G = d_scale[:, None] * G

    # --- TCN: COMPACT per-tap weights, BN folded (no I_V expansion) ---------
    t_scale = t_gamma * jax.lax.rsqrt(t_var + BN_EPS)
    p = {
        'gcn_w': G.astype(jnp.bfloat16),
        'gcn_b': gb,
        'tcn_w': (tcn_w * t_scale[None, None, :]).astype(jnp.bfloat16),
        'tcn_b': ((tcn_b - t_mean) * t_scale + t_beta)[None, :],
    }

    if cfg['residual'] == 'conv':
        res_w = 0.1 * jax.random.normal(ks[5], (cin, cout), jnp.float32)
        res_b = 0.01 * jax.random.normal(ks[6], (cout,), jnp.float32)
        r_gamma, r_beta, r_mean, r_var = make_bn_params(ks[7], cout)
        r_scale = r_gamma * jax.lax.rsqrt(r_var + BN_EPS)
        p['res_w'] = (res_w * r_scale[None, :]).astype(jnp.bfloat16)   # compact
        p['res_b'] = ((res_b - r_mean) * r_scale + r_beta)[None, :]
    return p


def prepare_params(key, cfgs, A_base, v, data_bn):
    keys = jax.random.split(key, len(cfgs))
    return [init_block_params(k, cfg, A_base, v, data_bn if i == 0 else None)
            for i, (k, cfg) in enumerate(zip(keys, cfgs))]


# ---------------------------------------------------------------------------
# Pure-JAX reference (same folded params) for a numeric sanity check.
# ---------------------------------------------------------------------------
def reference_forward(x, params, cfgs):
    n, m, t, v, c = x.shape
    nm = n * m
    h = x.reshape(nm, t, v * c).astype(jnp.float32)
    for p, cfg in zip(params, cfgs):
        cin, cout = cfg['cin'], cfg['cout']
        stride, resm = cfg['stride'], cfg['residual']
        gw = p['gcn_w'].astype(jnp.float32)
        g = jnp.maximum(jnp.einsum('ntw,wo->nto', h, gw) + p['gcn_b'][0], 0.0)
        t_out = t // stride
        g4 = g.reshape(nm, t, v, cout)
        gp = jnp.pad(g4, ((0, 0), (TPAD, TPAD), (0, 0), (0, 0)))
        tw = p['tcn_w'].astype(jnp.float32)
        y = jnp.zeros((nm, t_out, v, cout), jnp.float32)
        for k in range(KT):
            win = gp[:, k:k + stride * (t_out - 1) + 1:stride]
            y = y + jnp.einsum('ntvc,cd->ntvd', win, tw[k])
        y = y + p['tcn_b'][0]
        if resm == 'identity':
            r = h.reshape(nm, t, v, cin)
        elif resm == 'conv':
            xs = h.reshape(nm, t, v, cin)[:, ::stride]
            r = jnp.einsum('ntvc,cd->ntvd', xs,
                           p['res_w'].astype(jnp.float32)) + p['res_b'][0]
        else:
            r = 0.0
        h = jnp.maximum(y + r, 0.0).reshape(nm, t_out, v * cout)
        t = t_out
    out = h.reshape(n, m, t, v, cfgs[-1]['cout'])
    return jnp.transpose(out, (0, 1, 4, 2, 3))


if __name__ == "__main__":
    # Small deterministic config: N=2 sequences, M=2 persons, T=8 frames,
    # V=8 joints, C=3 input channels, base_channels=8, 4 stages.
    N, M, T, V, C = 2, 2, 8, 8, 3
    base_channels, num_stages = 8, 4
    inflate_stages, down_stages, ch_ratio = [3], [3], 2

    key = jax.random.PRNGKey(0)
    kx, kbn, kblocks = jax.random.split(key, 3)

    A_base = build_graph(V)
    cfgs = build_stage_cfgs(C, base_channels, num_stages, inflate_stages,
                            down_stages, ch_ratio)
    data_bn = make_bn_params(kbn, V * C)           # data_bn_type='VC'
    params = prepare_params(kblocks, cfgs, A_base, V, data_bn)
    groups = plan_groups(cfgs, V, T)               # demo -> single fused call

    x = jax.random.normal(kx, (N, M, T, V, C), jnp.float32)

    fwd = jax.jit(functools.partial(stgkn_forward, cfgs=cfgs, groups=groups))
    out = jax.block_until_ready(fwd(x, params))

    assert out.shape == (N, M, 16, 4, V), out.shape   # (N, M, C_out, T_out, V)
    assert bool(jnp.all(jnp.isfinite(out)))

    # numeric sanity check vs the pure-JAX reference (bf16 activation rounding
    # in the kernel => generous tolerance)
    ref = reference_forward(x, params, cfgs)
    err = float(jnp.max(jnp.abs(out - ref)))
    tol = 0.02 + 0.05 * float(jnp.max(jnp.abs(ref)))
    assert err < tol, (err, tol)

    print("KERNEL_OK")
</pallas_src>

<mosaic_0001>
module attributes {stable_mosaic.version = 11 : i64} {
  func.func @kernel(%arg0: i32, %arg1: memref<1x8x24xf32, #tpu.memory_space<vmem>>, %arg2: memref<24x64xbf16, #tpu.memory_space<vmem>>, %arg3: memref<1x64xf32, #tpu.memory_space<vmem>>, %arg4: memref<9x8x8xbf16, #tpu.memory_space<vmem>>, %arg5: memref<1x8xf32, #tpu.memory_space<vmem>>, %arg6: memref<64x64xbf16, #tpu.memory_space<vmem>>, %arg7: memref<1x64xf32, #tpu.memory_space<vmem>>, %arg8: memref<9x8x8xbf16, #tpu.memory_space<vmem>>, %arg9: memref<1x8xf32, #tpu.memory_space<vmem>>, %arg10: memref<64x128xbf16, #tpu.memory_space<vmem>>, %arg11: memref<1x128xf32, #tpu.memory_space<vmem>>, %arg12: memref<9x16x16xbf16, #tpu.memory_space<vmem>>, %arg13: memref<1x16xf32, #tpu.memory_space<vmem>>, %arg14: memref<8x16xbf16, #tpu.memory_space<vmem>>, %arg15: memref<1x16xf32, #tpu.memory_space<vmem>>, %arg16: memref<128x128xbf16, #tpu.memory_space<vmem>>, %arg17: memref<1x128xf32, #tpu.memory_space<vmem>>, %arg18: memref<9x16x16xbf16, #tpu.memory_space<vmem>>, %arg19: memref<1x16xf32, #tpu.memory_space<vmem>>, %arg20: memref<1x4x128xf32, #tpu.memory_space<vmem>>, %arg21: memref<1x8x24x8xf32, #tpu.memory_space<vmem>>, %arg22: memref<1x8x24x8xf32, #tpu.memory_space<vmem>>, %arg23: memref<1x8x20x16xf32, #tpu.memory_space<vmem>>, %arg24: memref<1x8x20x16xf32, #tpu.memory_space<vmem>>, %arg25: memref<1x8x20x16xf32, #tpu.memory_space<vmem>>) attributes {dimension_semantics = [#tpu.dimension_semantics<parallel>], iteration_bounds = array<i64: 4>, scalar_prefetch = 0 : i64, scratch_operands = 5 : i64, tpu.core_type = #tpu.core_type<tc>, window_params = [{transform_indices = @transform_0, window_bounds = array<i64: 1, 8, 24>}, {pipeline_mode = #tpu.pipeline_mode<synchronous>, transform_indices = @transform_1, window_bounds = array<i64: 24, 64>}, {pipeline_mode = #tpu.pipeline_mode<synchronous>, transform_indices = @transform_2, window_bounds = array<i64: 1, 64>}, {pipeline_mode = #tpu.pipeline_mode<synchronous>, transform_indices = @transform_3, window_bounds = array<i64: 9, 8, 8>}, {pipeline_mode = #tpu.pipeline_mode<synchronous>, transform_indices = @transform_4, window_bounds = array<i64: 1, 8>}, {pipeline_mode = #tpu.pipeline_mode<synchronous>, transform_indices = @transform_5, window_bounds = array<i64: 64, 64>}, {pipeline_mode = #tpu.pipeline_mode<synchronous>, transform_indices = @transform_6, window_bounds = array<i64: 1, 64>}, {pipeline_mode = #tpu.pipeline_mode<synchronous>, transform_indices = @transform_7, window_bounds = array<i64: 9, 8, 8>}, {pipeline_mode = #tpu.pipeline_mode<synchronous>, transform_indices = @transform_8, window_bounds = array<i64: 1, 8>}, {pipeline_mode = #tpu.pipeline_mode<synchronous>, transform_indices = @transform_9, window_bounds = array<i64: 64, 128>}, {pipeline_mode = #tpu.pipeline_mode<synchronous>, transform_indices = @transform_10, window_bounds = array<i64: 1, 128>}, {pipeline_mode = #tpu.pipeline_mode<synchronous>, transform_indices = @transform_11, window_bounds = array<i64: 9, 16, 16>}, {pipeline_mode = #tpu.pipeline_mode<synchronous>, transform_indices = @transform_12, window_bounds = array<i64: 1, 16>}, {pipeline_mode = #tpu.pipeline_mode<synchronous>, transform_indices = @transform_13, window_bounds = array<i64: 8, 16>}, {pipeline_mode = #tpu.pipeline_mode<synchronous>, transform_indices = @transform_14, window_bounds = array<i64: 1, 16>}, {pipeline_mode = #tpu.pipeline_mode<synchronous>, transform_indices = @transform_15, window_bounds = array<i64: 128, 128>}, {pipeline_mode = #tpu.pipeline_mode<synchronous>, transform_indices = @transform_16, window_bounds = array<i64: 1, 128>}, {pipeline_mode = #tpu.pipeline_mode<synchronous>, transform_indices = @transform_17, window_bounds = array<i64: 9, 16, 16>}, {pipeline_mode = #tpu.pipeline_mode<synchronous>, transform_indices = @transform_18, window_bounds = array<i64: 1, 16>}, {transform_indices = @transform_19, window_bounds = array<i64: 1, 4, 128>}]} {
    %c0 = arith.constant 0 : index
    %c0_0 = arith.constant 0 : index
    %c0_1 = arith.constant 0 : index
    %0 = vector.load %arg1[%c0, %c0_0, %c0_1] : memref<1x8x24xf32, #tpu.memory_space<vmem>>, vector<1x8x24xf32>
    %1 = vector.shape_cast %0 : vector<1x8x24xf32> to vector<8x24xf32>
    %2 = arith.truncf %1 : vector<8x24xf32> to vector<8x24xbf16>
    %c0_2 = arith.constant 0 : index
    %c0_3 = arith.constant 0 : index
    %3 = vector.load %arg2[%c0_2, %c0_3] : memref<24x64xbf16, #tpu.memory_space<vmem>>, vector<24x64xbf16>
    %cst = arith.constant dense<0.000000e+00> : vector<8x64xf32>
    %4 = tpu.matmul %2, %3, %cst {dimension_numbers = #tpu.dot_dimension_numbers<[1], [0], [0], [1], [0, 0, 1, 1], [], []>} : vector<8x24xbf16>, vector<24x64xbf16>, vector<8x64xf32> -> vector<8x64xf32>
    %c0_4 = arith.constant 0 : index
    %c0_5 = arith.constant 0 : index
    %5 = vector.load %arg3[%c0_4, %c0_5] : memref<1x64xf32, #tpu.memory_space<vmem>>, vector<1x64xf32>
    %6 = vector.broadcast %5 : vector<1x64xf32> to vector<8x64xf32>
    %7 = arith.addf %4, %6 : vector<8x64xf32>
    %cst_6 = arith.constant 0.000000e+00 : f32
    %8 = vector.broadcast %cst_6 : f32 to vector<8x64xf32>
    %9 = arith.maximumf %7, %8 : vector<8x64xf32>
    %10 = vector.shape_cast %9 : vector<8x64xf32> to vector<1x8x64xf32>
    %c0_7 = arith.constant 0 : index
    %c0_8 = arith.constant 0 : index
    %c0_9 = arith.constant 0 : index
    %11 = vector.load %arg4[%c0_7, %c0_8, %c0_9] : memref<9x8x8xbf16, #tpu.memory_space<vmem>>, vector<9x8x8xbf16>
    %cst_10 = arith.constant 0.000000e+00 : f32
    %12 = vector.broadcast %cst_10 : f32 to vector<64x8xf32>
    %cst_11 = arith.constant 0.000000e+00 : f32
    %13 = vector.broadcast %cst_11 : f32 to vector<1x8x8x8xf32>
    %c0_12 = arith.constant 0 : index
    %c0_13 = arith.constant 0 : index
    %c0_14 = arith.constant 0 : index
    %c0_15 = arith.constant 0 : index
    %14 = vector.load %arg21[%c0_12, %c0_13, %c0_14, %c0_15] : memref<1x8x24x8xf32, #tpu.memory_space<vmem>>, vector<1x8x8x8xf32>
    tpu.vector_store %arg21[%c0_12, %c0_13, %c0_14, %c0_15], %13 {strides = array<i32>} : memref<1x8x24x8xf32, #tpu.memory_space<vmem>>, vector<1x8x8x8xf32>,
    %c0_16 = arith.constant 0 : index
    %c0_17 = arith.constant 0 : index
    %c16 = arith.constant 16 : index
    %c0_18 = arith.constant 0 : index
    %15 = vector.load %arg21[%c0_16, %c0_17, %c16, %c0_18] : memref<1x8x24x8xf32, #tpu.memory_space<vmem>>, vector<1x8x8x8xf32>
    tpu.vector_store %arg21[%c0_16, %c0_17, %c16, %c0_18], %13 {strides = array<i32>} : memref<1x8x24x8xf32, #tpu.memory_space<vmem>>, vector<1x8x8x8xf32>,
    %16 = vector.extract_strided_slice %10 {offsets = [0, 0, 0], sizes = [1, 8, 8], strides = [1, 1, 1]} : vector<1x8x64xf32> to vector<1x8x8xf32>
    %17 = vector.shape_cast %16 : vector<1x8x8xf32> to vector<1x1x8x8xf32>
    %c0_19 = arith.constant 0 : index
    %c0_20 = arith.constant 0 : index
    %c8 = arith.constant 8 : index
    %c0_21 = arith.constant 0 : index
    %18 = vector.load %arg21[%c0_19, %c0_20, %c8, %c0_21] : memref<1x8x24x8xf32, #tpu.memory_space<vmem>>, vector<1x1x8x8xf32>
    tpu.vector_store %arg21[%c0_19, %c0_20, %c8, %c0_21], %17 {strides = array<i32>} : memref<1x8x24x8xf32, #tpu.memory_space<vmem>>, vector<1x1x8x8xf32>,
    %19 = vector.extract_strided_slice %10 {offsets = [0, 0, 8], sizes = [1, 8, 8], strides = [1, 1, 1]} : vector<1x8x64xf32> to vector<1x8x8xf32>
    %20 = vector.shape_cast %19 : vector<1x8x8xf32> to vector<1x1x8x8xf32>
    %c0_22 = arith.constant 0 : index
    %c1 = arith.constant 1 : index
    %c8_23 = arith.constant 8 : index
    %c0_24 = arith.constant 0 : index
    %21 = vector.load %arg21[%c0_22, %c1, %c8_23, %c0_24] : memref<1x8x24x8xf32, #tpu.memory_space<vmem>>, vector<1x1x8x8xf32>
    tpu.vector_store %arg21[%c0_22, %c1, %c8_23, %c0_24], %20 {strides = array<i32>} : memref<1x8x24x8xf32, #tpu.memory_space<vmem>>, vector<1x1x8x8xf32>,
    %22 = vector.extract_strided_slice %10 {offsets = [0, 0, 16], sizes = [1, 8, 8], strides = [1, 1, 1]} : vector<1x8x64xf32> to vector<1x8x8xf32>
    %23 = vector.shape_cast %22 : vector<1x8x8xf32> to vector<1x1x8x8xf32>
    %c0_25 = arith.constant 0 : index
    %c2 = arith.constant 2 : index
    %c8_26 = arith.constant 8 : index
    %c0_27 = arith.constant 0 : index
    %24 = vector.load %arg21[%c0_25, %c2, %c8_26, %c0_27] : memref<1x8x24x8xf32, #tpu.memory_space<vmem>>, vector<1x1x8x8xf32>
    tpu.vector_store %arg21[%c0_25, %c2, %c8_26, %c0_27], %23 {strides = array<i32>} : memref<1x8x24x8xf32, #tpu.memory_space<vmem>>, vector<1x1x8x8xf32>,
    %25 = vector.extract_strided_slice %10 {offsets = [0, 0, 24], sizes = [1, 8, 8], strides = [1, 1, 1]} : vector<1x8x64xf32> to vector<1x8x8xf32>
    %26 = vector.shape_cast %25 : vector<1x8x8xf32> to vector<1x1x8x8xf32>
    %c0_28 = arith.constant 0 : index
    %c3 = arith.constant 3 : index
    %c8_29 = arith.constant 8 : index
    %c0_30 = arith.constant 0 : index
    %27 = vector.load %arg21[%c0_28, %c3, %c8_29, %c0_30] : memref<1x8x24x8xf32, #tpu.memory_space<vmem>>, vector<1x1x8x8xf32>
    tpu.vector_store %arg21[%c0_28, %c3, %c8_29, %c0_30], %26 {strides = array<i32>} : memref<1x8x24x8xf32, #tpu.memory_space<vmem>>, vector<1x1x8x8xf32>,
    %28 = vector.extract_strided_slice %10 {offsets = [0, 0, 32], sizes = [1, 8, 8], strides = [1, 1, 1]} : vector<1x8x64xf32> to vector<1x8x8xf32>
    %29 = vector.shape_cast %28 : vector<1x8x8xf32> to vector<1x1x8x8xf32>
    %c0_31 = arith.constant 0 : index
    %c4 = arith.constant 4 : index
    %c8_32 = arith.constant 8 : index
    %c0_33 = arith.constant 0 : index
    %30 = vector.load %arg21[%c0_31, %c4, %c8_32, %c0_33] : memref<1x8x24x8xf32, #tpu.memory_space<vmem>>, vector<1x1x8x8xf32>
    tpu.vector_store %arg21[%c0_31, %c4, %c8_32, %c0_33], %29 {strides = array<i32>} : memref<1x8x24x8xf32, #tpu.memory_space<vmem>>, vector<1x1x8x8xf32>,
    %31 = vector.extract_strided_slice %10 {offsets = [0, 0, 40], sizes = [1, 8, 8], strides = [1, 1, 1]} : vector<1x8x64xf32> to vector<1x8x8xf32>
    %32 = vector.shape_cast %31 : vector<1x8x8xf32> to vector<1x1x8x8xf32>
    %c0_34 = arith.constant 0 : index
    %c5 = arith.constant 5 : index
    %c8_35 = arith.constant 8 : index
    %c0_36 = arith.constant 0 : index
    %33 = vector.load %arg21[%c0_34, %c5, %c8_35, %c0_36] : memref<1x8x24x8xf32, #tpu.memory_space<vmem>>, vector<1x1x8x8xf32>
    tpu.vector_store %arg21[%c0_34, %c5, %c8_35, %c0_36], %32 {strides = array<i32>} : memref<1x8x24x8xf32, #tpu.memory_space<vmem>>, vector<1x1x8x8xf32>,
    %34 = vector.extract_strided_slice %10 {offsets = [0, 0, 48], sizes = [1, 8, 8], strides = [1, 1, 1]} : vector<1x8x64xf32> to vector<1x8x8xf32>
    %35 = vector.shape_cast %34 : vector<1x8x8xf32> to vector<1x1x8x8xf32>
    %c0_37 = arith.constant 0 : index
    %c6 = arith.constant 6 : index
    %c8_38 = arith.constant 8 : index
    %c0_39 = arith.constant 0 : index
    %36 = vector.load %arg21[%c0_37, %c6, %c8_38, %c0_39] : memref<1x8x24x8xf32, #tpu.memory_space<vmem>>, vector<1x1x8x8xf32>
    tpu.vector_store %arg21[%c0_37, %c6, %c8_38, %c0_39], %35 {strides = array<i32>} : memref<1x8x24x8xf32, #tpu.memory_space<vmem>>, vector<1x1x8x8xf32>,
    %37 = vector.extract_strided_slice %10 {offsets = [0, 0, 56], sizes = [1, 8, 8], strides = [1, 1, 1]} : vector<1x8x64xf32> to vector<1x8x8xf32>
    %38 = vector.shape_cast %37 : vector<1x8x8xf32> to vector<1x1x8x8xf32>
    %c0_40 = arith.constant 0 : index
    %c7 = arith.constant 7 : index
    %c8_41 = arith.constant 8 : index
    %c0_42 = arith.constant 0 : index
    %39 = vector.load %arg21[%c0_40, %c7, %c8_41, %c0_42] : memref<1x8x24x8xf32, #tpu.memory_space<vmem>>, vector<1x1x8x8xf32>
    tpu.vector_store %arg21[%c0_40, %c7, %c8_41, %c0_42], %38 {strides = array<i32>} : memref<1x8x24x8xf32, #tpu.memory_space<vmem>>, vector<1x1x8x8xf32>,
    %c0_43 = arith.constant 0 : index
    %c0_44 = arith.constant 0 : index
    %c4_45 = arith.constant 4 : index
    %c0_46 = arith.constant 0 : index
    %40 = vector.load %arg21[%c0_43, %c0_44, %c4_45, %c0_46] : memref<1x8x24x8xf32, #tpu.memory_space<vmem>>, vector<1x8x8x8xf32>
    %41 = vector.shape_cast %40 : vector<1x8x8x8xf32> to vector<64x8xf32>
    %42 = arith.truncf %41 : vector<64x8xf32> to vector<64x8xbf16>
    %43 = vector.extract_strided_slice %11 {offsets = [0, 0, 0], sizes = [1, 8, 8], strides = [1, 1, 1]} : vector<9x8x8xbf16> to vector<1x8x8xbf16>
    %44 = vector.shape_cast %43 : vector<1x8x8xbf16> to vector<8x8xbf16>
    %cst_47 = arith.constant dense<0.000000e+00> : vector<64x8xf32>
    %45 = tpu.matmul %42, %44, %cst_47 {dimension_numbers = #tpu.dot_dimension_numbers<[1], [0], [0], [1], [0, 0, 1, 1], [], []>} : vector<64x8xbf16>, vector<8x8xbf16>, vector<64x8xf32> -> vector<64x8xf32>
    %46 = arith.addf %12, %45 : vector<64x8xf32>
    %c0_48 = arith.constant 0 : index
    %c0_49 = arith.constant 0 : index
    %c5_50 = arith.constant 5 : index
    %c0_51 = arith.constant 0 : index
    %47 = vector.load %arg21[%c0_48, %c0_49, %c5_50, %c0_51] : memref<1x8x24x8xf32, #tpu.memory_space<vmem>>, vector<1x8x8x8xf32>
    %48 = vector.shape_cast %47 : vector<1x8x8x8xf32> to vector<64x8xf32>
    %49 = arith.truncf %48 : vector<64x8xf32> to vector<64x8xbf16>
    %50 = vector.extract_strided_slice %11 {offsets = [1, 0, 0], sizes = [1, 8, 8], strides = [1, 1, 1]} : vector<9x8x8xbf16> to vector<1x8x8xbf16>
    %51 = vector.shape_cast %50 : vector<1x8x8xbf16> to vector<8x8xbf16>
    %cst_52 = arith.constant dense<0.000000e+00> : vector<64x8xf32>
    %52 = tpu.matmul %49, %51, %cst_52 {dimension_numbers = #tpu.dot_dimension_numbers<[1], [0], [0], [1], [0, 0, 1, 1], [], []>} : vector<64x8xbf16>, vector<8x8xbf16>, vector<64x8xf32> -> vector<64x8xf32>
    %53 = arith.addf %46, %52 : vector<64x8xf32>
    %c0_53 = arith.constant 0 : index
    %c0_54 = arith.constant 0 : index
    %c6_55 = arith.constant 6 : index
    %c0_56 = arith.constant 0 : index
    %54 = vector.load %arg21[%c0_53, %c0_54, %c6_55, %c0_56] : memref<1x8x24x8xf32, #tpu.memory_space<vmem>>, vector<1x8x8x8xf32>
    %55 = vector.shape_cast %54 : vector<1x8x8x8xf32> to vector<64x8xf32>
    %56 = arith.truncf %55 : vector<64x8xf32> to vector<64x8xbf16>
    %57 = vector.extract_strided_slice %11 {offsets = [2, 0, 0], sizes = [1, 8, 8], strides = [1, 1, 1]} : vector<9x8x8xbf16> to vector<1x8x8xbf16>
    %58 = vector.shape_cast %57 : vector<1x8x8xbf16> to vector<8x8xbf16>
    %cst_57 = arith.constant dense<0.000000e+00> : vector<64x8xf32>
    %59 = tpu.matmul %56, %58, %cst_57 {dimension_numbers = #tpu.dot_dimension_numbers<[1], [0], [0], [1], [0, 0, 1, 1], [], []>} : vector<64x8xbf16>, vector<8x8xbf16>, vector<64x8xf32> -> vector<64x8xf32>
    %60 = arith.addf %53, %59 : vector<64x8xf32>
    %c0_58 = arith.constant 0 : index
    %c0_59 = arith.constant 0 : index
    %c7_60 = arith.constant 7 : index
    %c0_61 = arith.constant 0 : index
    %61 = vector.load %arg21[%c0_58, %c0_59, %c7_60, %c0_61] : memref<1x8x24x8xf32, #tpu.memory_space<vmem>>, vector<1x8x8x8xf32>
    %62 = vector.shape_cast %61 : vector<1x8x8x8xf32> to vector<64x8xf32>
    %63 = arith.truncf %62 : vector<64x8xf32> to vector<64x8xbf16>
    %64 = vector.extract_strided_slice %11 {offsets = [3, 0, 0], sizes = [1, 8, 8], strides = [1, 1, 1]} : vector<9x8x8xbf16> to vector<1x8x8xbf16>
    %65 = vector.shape_cast %64 : vector<1x8x8xbf16> to vector<8x8xbf16>
    %cst_62 = arith.constant dense<0.000000e+00> : vector<64x8xf32>
    %66 = tpu.matmul %63, %65, %cst_62 {dimension_numbers = #tpu.dot_dimension_numbers<[1], [0], [0], [1], [0, 0, 1, 1], [], []>} : vector<64x8xbf16>, vector<8x8xbf16>, vector<64x8xf32> -> vector<64x8xf32>
    %67 = arith.addf %60, %66 : vector<64x8xf32>
    %c0_63 = arith.constant 0 : index
    %c0_64 = arith.constant 0 : index
    %c8_65 = arith.constant 8 : index
    %c0_66 = arith.constant 0 : index
    %68 = vector.load %arg21[%c0_63, %c0_64, %c8_65, %c0_66] : memref<1x8x24x8xf32, #tpu.memory_space<vmem>>, vector<1x8x8x8xf32>
    %69 = vector.shape_cast %68 : vector<1x8x8x8xf32> to vector<64x8xf32>
    %70 = arith.truncf %69 : vector<64x8xf32> to vector<64x8xbf16>
    %71 = vector.extract_strided_slice %11 {offsets = [4, 0, 0], sizes = [1, 8, 8], strides = [1, 1, 1]} : vector<9x8x8xbf16> to vector<1x8x8xbf16>
    %72 = vector.shape_cast %71 : vector<1x8x8xbf16> to vector<8x8xbf16>
    %cst_67 = arith.constant dense<0.000000e+00> : vector<64x8xf32>
    %73 = tpu.matmul %70, %72, %cst_67 {dimension_numbers = #tpu.dot_dimension_numbers<[1], [0], [0], [1], [0, 0, 1, 1], [], []>} : vector<64x8xbf16>, vector<8x8xbf16>, vector<64x8xf32> -> vector<64x8xf32>
    %74 = arith.addf %67, %73 : vector<64x8xf32>
    %c0_68 = arith.constant 0 : index
    %c0_69 = arith.constant 0 : index
    %c9 = arith.constant 9 : index
    %c0_70 = arith.constant 0 : index
    %75 = vector.load %arg21[%c0_68, %c0_69, %c9, %c0_70] : memref<1x8x24x8xf32, #tpu.memory_space<vmem>>, vector<1x8x8x8xf32>
    %76 = vector.shape_cast %75 : vector<1x8x8x8xf32> to vector<64x8xf32>
    %77 = arith.truncf %76 : vector<64x8xf32> to vector<64x8xbf16>
    %78 = vector.extract_strided_slice %11 {offsets = [5, 0, 0], sizes = [1, 8, 8], strides = [1, 1, 1]} : vector<9x8x8xbf16> to vector<1x8x8xbf16>
    %79 = vector.shape_cast %78 : vector<1x8x8xbf16> to vector<8x8xbf16>
    %cst_71 = arith.constant dense<0.000000e+00> : vector<64x8xf32>
    %80 = tpu.matmul %77, %79, %cst_71 {dimension_numbers = #tpu.dot_dimension_numbers<[1], [0], [0], [1], [0, 0, 1, 1], [], []>} : vector<64x8xbf16>, vector<8x8xbf16>, vector<64x8xf32> -> vector<64x8xf32>
    %81 = arith.addf %74, %80 : vector<64x8xf32>
    %c0_72 = arith.constant 0 : index
    %c0_73 = arith.constant 0 : index
    %c10 = arith.constant 10 : index
    %c0_74 = arith.constant 0 : index
    %82 = vector.load %arg21[%c0_72, %c0_73, %c10, %c0_74] : memref<1x8x24x8xf32, #tpu.memory_space<vmem>>, vector<1x8x8x8xf32>
    %83 = vector.shape_cast %82 : vector<1x8x8x8xf32> to vector<64x8xf32>
    %84 = arith.truncf %83 : vector<64x8xf32> to vector<64x8xbf16>
    %85 = vector.extract_strided_slice %11 {offsets = [6, 0, 0], sizes = [1, 8, 8], strides = [1, 1, 1]} : vector<9x8x8xbf16> to vector<1x8x8xbf16>
    %86 = vector.shape_cast %85 : vector<1x8x8xbf16> to vector<8x8xbf16>
    %cst_75 = arith.constant dense<0.000000e+00> : vector<64x8xf32>
    %87 = tpu.matmul %84, %86, %cst_75 {dimension_numbers = #tpu.dot_dimension_numbers<[1], [0], [0], [1], [0, 0, 1, 1], [], []>} : vector<64x8xbf16>, vector<8x8xbf16>, vector<64x8xf32> -> vector<64x8xf32>
    %88 = arith.addf %81, %87 : vector<64x8xf32>
    %c0_76 = arith.constant 0 : index
    %c0_77 = arith.constant 0 : index
    %c11 = arith.constant 11 : index
    %c0_78 = arith.constant 0 : index
    %89 = vector.load %arg21[%c0_76, %c0_77, %c11, %c0_78] : memref<1x8x24x8xf32, #tpu.memory_space<vmem>>, vector<1x8x8x8xf32>
    %90 = vector.shape_cast %89 : vector<1x8x8x8xf32> to vector<64x8xf32>
    %91 = arith.truncf %90 : vector<64x8xf32> to vector<64x8xbf16>
    %92 = vector.extract_strided_slice %11 {offsets = [7, 0, 0], sizes = [1, 8, 8], strides = [1, 1, 1]} : vector<9x8x8xbf16> to vector<1x8x8xbf16>
    %93 = vector.shape_cast %92 : vector<1x8x8xbf16> to vector<8x8xbf16>
    %cst_79 = arith.constant dense<0.000000e+00> : vector<64x8xf32>
    %94 = tpu.matmul %91, %93, %cst_79 {dimension_numbers = #tpu.dot_dimension_numbers<[1], [0], [0], [1], [0, 0, 1, 1], [], []>} : vector<64x8xbf16>, vector<8x8xbf16>, vector<64x8xf32> -> vector<64x8xf32>
    %95 = arith.addf %88, %94 : vector<64x8xf32>
    %c0_80 = arith.constant 0 : index
    %c0_81 = arith.constant 0 : index
    %c12 = arith.constant 12 : index
    %c0_82 = arith.constant 0 : index
    %96 = vector.load %arg21[%c0_80, %c0_81, %c12, %c0_82] : memref<1x8x24x8xf32, #tpu.memory_space<vmem>>, vector<1x8x8x8xf32>
    %97 = vector.shape_cast %96 : vector<1x8x8x8xf32> to vector<64x8xf32>
    %98 = arith.truncf %97 : vector<64x8xf32> to vector<64x8xbf16>
    %99 = vector.extract_strided_slice %11 {offsets = [8, 0, 0], sizes = [1, 8, 8], strides = [1, 1, 1]} : vector<9x8x8xbf16> to vector<1x8x8xbf16>
    %100 = vector.shape_cast %99 : vector<1x8x8xbf16> to vector<8x8xbf16>
    %cst_83 = arith.constant dense<0.000000e+00> : vector<64x8xf32>
    %101 = tpu.matmul %98, %100, %cst_83 {dimension_numbers = #tpu.dot_dimension_numbers<[1], [0], [0], [1], [0, 0, 1, 1], [], []>} : vector<64x8xbf16>, vector<8x8xbf16>, vector<64x8xf32> -> vector<64x8xf32>
    %102 = arith.addf %95, %101 : vector<64x8xf32>
    %c0_84 = arith.constant 0 : index
    %c0_85 = arith.constant 0 : index
    %103 = vector.load %arg5[%c0_84, %c0_85] : memref<1x8xf32, #tpu.memory_space<vmem>>, vector<1x8xf32>
    %104 = vector.broadcast %103 : vector<1x8xf32> to vector<64x8xf32>
    %105 = arith.addf %102, %104 : vector<64x8xf32>
    %106 = vector.shape_cast %105 : vector<64x8xf32> to vector<1x8x8x8xf32>
    %107 = vector.extract_strided_slice %106 {offsets = [0, 0, 0, 0], sizes = [1, 1, 8, 8], strides = [1, 1, 1, 1]} : vector<1x8x8x8xf32> to vector<1x1x8x8xf32>
    %108 = vector.shape_cast %107 : vector<1x1x8x8xf32> to vector<1x8x8xf32>
    %109 = vector.shape_cast %108 : vector<1x8x8xf32> to vector<8x8xf32>
    %110 = vector.extract_strided_slice %106 {offsets = [0, 1, 0, 0], sizes = [1, 1, 8, 8], strides = [1, 1, 1, 1]} : vector<1x8x8x8xf32> to vector<1x1x8x8xf32>
    %111 = vector.shape_cast %110 : vector<1x1x8x8xf32> to vector<1x8x8xf32>
    %112 = vector.shape_cast %111 : vector<1x8x8xf32> to vector<8x8xf32>
    %113 = vector.extract_strided_slice %106 {offsets = [0, 2, 0, 0], sizes = [1, 1, 8, 8], strides = [1, 1, 1, 1]} : vector<1x8x8x8xf32> to vector<1x1x8x8xf32>
    %114 = vector.shape_cast %113 : vector<1x1x8x8xf32> to vector<1x8x8xf32>
    %115 = vector.shape_cast %114 : vector<1x8x8xf32> to vector<8x8xf32>
    %116 = vector.extract_strided_slice %106 {offsets = [0, 3, 0, 0], sizes = [1, 1, 8, 8], strides = [1, 1, 1, 1]} : vector<1x8x8x8xf32> to vector<1x1x8x8xf32>
    %117 = vector.shape_cast %116 : vector<1x1x8x8xf32> to vector<1x8x8xf32>
    %118 = vector.shape_cast %117 : vector<1x8x8xf32> to vector<8x8xf32>
    %119 = vector.extract_strided_slice %106 {offsets = [0, 4, 0, 0], sizes = [1, 1, 8, 8], strides = [1, 1, 1, 1]} : vector<1x8x8x8xf32> to vector<1x1x8x8xf32>
    %120 = vector.shape_cast %119 : vector<1x1x8x8xf32> to vector<1x8x8xf32>
    %121 = vector.shape_cast %120 : vector<1x8x8xf32> to vector<8x8xf32>
    %122 = vector.extract_strided_slice %106 {offsets = [0, 5, 0, 0], sizes = [1, 1, 8, 8], strides = [1, 1, 1, 1]} : vector<1x8x8x8xf32> to vector<1x1x8x8xf32>
    %123 = vector.shape_cast %122 : vector<1x1x8x8xf32> to vector<1x8x8xf32>
    %124 = vector.shape_cast %123 : vector<1x8x8xf32> to vector<8x8xf32>
    %125 = vector.extract_strided_slice %106 {offsets = [0, 6, 0, 0], sizes = [1, 1, 8, 8], strides = [1, 1, 1, 1]} : vector<1x8x8x8xf32> to vector<1x1x8x8xf32>
    %126 = vector.shape_cast %125 : vector<1x1x8x8xf32> to vector<1x8x8xf32>
    %127 = vector.shape_cast %126 : vector<1x8x8xf32> to vector<8x8xf32>
    %128 = vector.extract_strided_slice %106 {offsets = [0, 7, 0, 0], sizes = [1, 1, 8, 8], strides = [1, 1, 1, 1]} : vector<1x8x8x8xf32> to vector<1x1x8x8xf32>
    %129 = vector.shape_cast %128 : vector<1x1x8x8xf32> to vector<1x8x8xf32>
    %130 = vector.shape_cast %129 : vector<1x8x8xf32> to vector<8x8xf32>
    %131 = tpu.concatenate %109, %112, %115, %118, %121, %124, %127, %130 in 1 : vector<8x8xf32>, vector<8x8xf32>, vector<8x8xf32>, vector<8x8xf32>, vector<8x8xf32>, vector<8x8xf32>, vector<8x8xf32>, vector<8x8xf32> -> vector<8x64xf32>
    %cst_86 = arith.constant 0.000000e+00 : f32
    %132 = vector.broadcast %cst_86 : f32 to vector<8x64xf32>
    %133 = arith.maximumf %131, %132 : vector<8x64xf32>
    %134 = arith.truncf %133 : vector<8x64xf32> to vector<8x64xbf16>
    %c0_87 = arith.constant 0 : index
    %c0_88 = arith.constant 0 : index
    %135 = vector.load %arg6[%c0_87, %c0_88] : memref<64x64xbf16, #tpu.memory_space<vmem>>, vector<64x64xbf16>
    %cst_89 = arith.constant dense<0.000000e+00> : vector<8x64xf32>
    %136 = tpu.matmul %134, %135, %cst_89 {dimension_numbers = #tpu.dot_dimension_numbers<[1], [0], [0], [1], [0, 0, 1, 1], [], []>} : vector<8x64xbf16>, vector<64x64xbf16>, vector<8x64xf32> -> vector<8x64xf32>
    %c0_90 = arith.constant 0 : index
    %c0_91 = arith.constant 0 : index
    %137 = vector.load %arg7[%c0_90, %c0_91] : memref<1x64xf32, #tpu.memory_space<vmem>>, vector<1x64xf32>
    %138 = vector.broadcast %137 : vector<1x64xf32> to vector<8x64xf32>
    %139 = arith.addf %136, %138 : vector<8x64xf32>
    %cst_92 = arith.constant 0.000000e+00 : f32
    %140 = vector.broadcast %cst_92 : f32 to vector<8x64xf32>
    %141 = arith.maximumf %139, %140 : vector<8x64xf32>
    %142 = vector.shape_cast %141 : vector<8x64xf32> to vector<1x8x64xf32>
    %c0_93 = arith.constant 0 : index
    %c0_94 = arith.constant 0 : index
    %c0_95 = arith.constant 0 : index
    %143 = vector.load %arg8[%c0_93, %c0_94, %c0_95] : memref<9x8x8xbf16, #tpu.memory_space<vmem>>, vector<9x8x8xbf16>
    %cst_96 = arith.constant 0.000000e+00 : f32
    %144 = vector.broadcast %cst_96 : f32 to vector<64x8xf32>
    %cst_97 = arith.constant 0.000000e+00 : f32
    %145 = vector.broadcast %cst_97 : f32 to vector<1x8x8x8xf32>
    %c0_98 = arith.constant 0 : index
    %c0_99 = arith.constant 0 : index
    %c0_100 = arith.constant 0 : index
    %c0_101 = arith.constant 0 : index
    %146 = vector.load %arg22[%c0_98, %c0_99, %c0_100, %c0_101] : memref<1x8x24x8xf32, #tpu.memory_space<vmem>>, vector<1x8x8x8xf32>
    tpu.vector_store %arg22[%c0_98, %c0_99, %c0_100, %c0_101], %145 {strides = array<i32>} : memref<1x8x24x8xf32, #tpu.memory_space<vmem>>, vector<1x8x8x8xf32>,
    %c0_102 = arith.constant 0 : index
    %c0_103 = arith.constant 0 : index
    %c16_104 = arith.constant 16 : index
    %c0_105 = arith.constant 0 : index
    %147 = vector.load %arg22[%c0_102, %c0_103, %c16_104, %c0_105] : memref<1x8x24x8xf32, #tpu.memory_space<vmem>>, vector<1x8x8x8xf32>
    tpu.vector_store %arg22[%c0_102, %c0_103, %c16_104, %c0_105], %145 {strides = array<i32>} : memref<1x8x24x8xf32, #tpu.memory_space<vmem>>, vector<1x8x8x8xf32>,
    %148 = vector.extract_strided_slice %142 {offsets = [0, 0, 0], sizes = [1, 8, 8], strides = [1, 1, 1]} : vector<1x8x64xf32> to vector<1x8x8xf32>
    %149 = vector.shape_cast %148 : vector<1x8x8xf32> to vector<1x1x8x8xf32>
    %c0_106 = arith.constant 0 : index
    %c0_107 = arith.constant 0 : index
    %c8_108 = arith.constant 8 : index
    %c0_109 = arith.constant 0 : index
    %150 = vector.load %arg22[%c0_106, %c0_107, %c8_108, %c0_109] : memref<1x8x24x8xf32, #tpu.memory_space<vmem>>, vector<1x1x8x8xf32>
    tpu.vector_store %arg22[%c0_106, %c0_107, %c8_108, %c0_109], %149 {strides = array<i32>} : memref<1x8x24x8xf32, #tpu.memory_space<vmem>>, vector<1x1x8x8xf32>,
    %151 = vector.extract_strided_slice %142 {offsets = [0, 0, 8], sizes = [1, 8, 8], strides = [1, 1, 1]} : vector<1x8x64xf32> to vector<1x8x8xf32>
    %152 = vector.shape_cast %151 : vector<1x8x8xf32> to vector<1x1x8x8xf32>
    %c0_110 = arith.constant 0 : index
    %c1_111 = arith.constant 1 : index
    %c8_112 = arith.constant 8 : index
    %c0_113 = arith.constant 0 : index
    %153 = vector.load %arg22[%c0_110, %c1_111, %c8_112, %c0_113] : memref<1x8x24x8xf32, #tpu.memory_space<vmem>>, vector<1x1x8x8xf32>
    tpu.vector_store %arg22[%c0_110, %c1_111, %c8_112, %c0_113], %152 {strides = array<i32>} : memref<1x8x24x8xf32, #tpu.memory_space<vmem>>, vector<1x1x8x8xf32>,
    %154 = vector.extract_strided_slice %142 {offsets = [0, 0, 16], sizes = [1, 8, 8], strides = [1, 1, 1]} : vector<1x8x64xf32> to vector<1x8x8xf32>
    %155 = vector.shape_cast %154 : vector<1x8x8xf32> to vector<1x1x8x8xf32>
    %c0_114 = arith.constant 0 : index
    %c2_115 = arith.constant 2 : index
    %c8_116 = arith.constant 8 : index
    %c0_117 = arith.constant 0 : index
    %156 = vector.load %arg22[%c0_114, %c2_115, %c8_116, %c0_117] : memref<1x8x24x8xf32, #tpu.memory_space<vmem>>, vector<1x1x8x8xf32>
    tpu.vector_store %arg22[%c0_114, %c2_115, %c8_116, %c0_117], %155 {strides = array<i32>} : memref<1x8x24x8xf32, #tpu.memory_space<vmem>>, vector<1x1x8x8xf32>,
    %157 = vector.extract_strided_slice %142 {offsets = [0, 0, 24], sizes = [1, 8, 8], strides = [1, 1, 1]} : vector<1x8x64xf32> to vector<1x8x8xf32>
    %158 = vector.shape_cast %157 : vector<1x8x8xf32> to vector<1x1x8x8xf32>
    %c0_118 = arith.constant 0 : index
    %c3_119 = arith.constant 3 : index
    %c8_120 = arith.constant 8 : index
    %c0_121 = arith.constant 0 : index
    %159 = vector.load %arg22[%c0_118, %c3_119, %c8_120, %c0_121] : memref<1x8x24x8xf32, #tpu.memory_space<vmem>>, vector<1x1x8x8xf32>
    tpu.vector_store %arg22[%c0_118, %c3_119, %c8_120, %c0_121], %158 {strides = array<i32>} : memref<1x8x24x8xf32, #tpu.memory_space<vmem>>, vector<1x1x8x8xf32>,
    %160 = vector.extract_strided_slice %142 {offsets = [0, 0, 32], sizes = [1, 8, 8], strides = [1, 1, 1]} : vector<1x8x64xf32> to vector<1x8x8xf32>
    %161 = vector.shape_cast %160 : vector<1x8x8xf32> to vector<1x1x8x8xf32>
    %c0_122 = arith.constant 0 : index
    %c4_123 = arith.constant 4 : index
    %c8_124 = arith.constant 8 : index
    %c0_125 = arith.constant 0 : index
    %162 = vector.load %arg22[%c0_122, %c4_123, %c8_124, %c0_125] : memref<1x8x24x8xf32, #tpu.memory_space<vmem>>, vector<1x1x8x8xf32>
    tpu.vector_store %arg22[%c0_122, %c4_123, %c8_124, %c0_125], %161 {strides = array<i32>} : memref<1x8x24x8xf32, #tpu.memory_space<vmem>>, vector<1x1x8x8xf32>,
    %163 = vector.extract_strided_slice %142 {offsets = [0, 0, 40], sizes = [1, 8, 8], strides = [1, 1, 1]} : vector<1x8x64xf32> to vector<1x8x8xf32>
    %164 = vector.shape_cast %163 : vector<1x8x8xf32> to vector<1x1x8x8xf32>
    %c0_126 = arith.constant 0 : index
    %c5_127 = arith.constant 5 : index
    %c8_128 = arith.constant 8 : index
    %c0_129 = arith.constant 0 : index
    %165 = vector.load %arg22[%c0_126, %c5_127, %c8_128, %c0_129] : memref<1x8x24x8xf32, #tpu.memory_space<vmem>>, vector<1x1x8x8xf32>
    tpu.vector_store %arg22[%c0_126, %c5_127, %c8_128, %c0_129], %164 {strides = array<i32>} : memref<1x8x24x8xf32, #tpu.memory_space<vmem>>, vector<1x1x8x8xf32>,
    %166 = vector.extract_strided_slice %142 {offsets = [0, 0, 48], sizes = [1, 8, 8], strides = [1, 1, 1]} : vector<1x8x64xf32> to vector<1x8x8xf32>
    %167 = vector.shape_cast %166 : vector<1x8x8xf32> to vector<1x1x8x8xf32>
    %c0_130 = arith.constant 0 : index
    %c6_131 = arith.constant 6 : index
    %c8_132 = arith.constant 8 : index
    %c0_133 = arith.constant 0 : index
    %168 = vector.load %arg22[%c0_130, %c6_131, %c8_132, %c0_133] : memref<1x8x24x8xf32, #tpu.memory_space<vmem>>, vector<1x1x8x8xf32>
    tpu.vector_store %arg22[%c0_130, %c6_131, %c8_132, %c0_133], %167 {strides = array<i32>} : memref<1x8x24x8xf32, #tpu.memory_space<vmem>>, vector<1x1x8x8xf32>,
    %169 = vector.extract_strided_slice %142 {offsets = [0, 0, 56], sizes = [1, 8, 8], strides = [1, 1, 1]} : vector<1x8x64xf32> to vector<1x8x8xf32>
    %170 = vector.shape_cast %169 : vector<1x8x8xf32> to vector<1x1x8x8xf32>
    %c0_134 = arith.constant 0 : index
    %c7_135 = arith.constant 7 : index
    %c8_136 = arith.constant 8 : index
    %c0_137 = arith.constant 0 : index
    %171 = vector.load %arg22[%c0_134, %c7_135, %c8_136, %c0_137] : memref<1x8x24x8xf32, #tpu.memory_space<vmem>>, vector<1x1x8x8xf32>
    tpu.vector_store %arg22[%c0_134, %c7_135, %c8_136, %c0_137], %170 {strides = array<i32>} : memref<1x8x24x8xf32, #tpu.memory_space<vmem>>, vector<1x1x8x8xf32>,
    %c0_138 = arith.constant 0 : index
    %c0_139 = arith.constant 0 : index
    %c4_140 = arith.constant 4 : index
    %c0_141 = arith.constant 0 : index
    %172 = vector.load %arg22[%c0_138, %c0_139, %c4_140, %c0_141] : memref<1x8x24x8xf32, #tpu.memory_space<vmem>>, vector<1x8x8x8xf32>
    %173 = vector.shape_cast %172 : vector<1x8x8x8xf32> to vector<64x8xf32>
    %174 = arith.truncf %173 : vector<64x8xf32> to vector<64x8xbf16>
    %175 = vector.extract_strided_slice %143 {offsets = [0, 0, 0], sizes = [1, 8, 8], strides = [1, 1, 1]} : vector<9x8x8xbf16> to vector<1x8x8xbf16>
    %176 = vector.shape_cast %175 : vector<1x8x8xbf16> to vector<8x8xbf16>
    %cst_142 = arith.constant dense<0.000000e+00> : vector<64x8xf32>
    %177 = tpu.matmul %174, %176, %cst_142 {dimension_numbers = #tpu.dot_dimension_numbers<[1], [0], [0], [1], [0, 0, 1, 1], [], []>} : vector<64x8xbf16>, vector<8x8xbf16>, vector<64x8xf32> -> vector<64x8xf32>
    %178 = arith.addf %144, %177 : vector<64x8xf32>
    %c0_143 = arith.constant 0 : index
    %c0_144 = arith.constant 0 : index
    %c5_145 = arith.constant 5 : index
    %c0_146 = arith.constant 0 : index
    %179 = vector.load %arg22[%c0_143, %c0_144, %c5_145, %c0_146] : memref<1x8x24x8xf32, #tpu.memory_space<vmem>>, vector<1x8x8x8xf32>
    %180 = vector.shape_cast %179 : vector<1x8x8x8xf32> to vector<64x8xf32>
    %181 = arith.truncf %180 : vector<64x8xf32> to vector<64x8xbf16>
    %182 = vector.extract_strided_slice %143 {offsets = [1, 0, 0], sizes = [1, 8, 8], strides = [1, 1, 1]} : vector<9x8x8xbf16> to vector<1x8x8xbf16>
    %183 = vector.shape_cast %182 : vector<1x8x8xbf16> to vector<8x8xbf16>
    %cst_147 = arith.constant dense<0.000000e+00> : vector<64x8xf32>
    %184 = tpu.matmul %181, %183, %cst_147 {dimension_numbers = #tpu.dot_dimension_numbers<[1], [0], [0], [1], [0, 0, 1, 1], [], []>} : vector<64x8xbf16>, vector<8x8xbf16>, vector<64x8xf32> -> vector<64x8xf32>
    %185 = arith.addf %178, %184 : vector<64x8xf32>
    %c0_148 = arith.constant 0 : index
    %c0_149 = arith.constant 0 : index
    %c6_150 = arith.constant 6 : index
    %c0_151 = arith.constant 0 : index
    %186 = vector.load %arg22[%c0_148, %c0_149, %c6_150, %c0_151] : memref<1x8x24x8xf32, #tpu.memory_space<vmem>>, vector<1x8x8x8xf32>
    %187 = vector.shape_cast %186 : vector<1x8x8x8xf32> to vector<64x8xf32>
    %188 = arith.truncf %187 : vector<64x8xf32> to vector<64x8xbf16>
    %189 = vector.extract_strided_slice %143 {offsets = [2, 0, 0], sizes = [1, 8, 8], strides = [1, 1, 1]} : vector<9x8x8xbf16> to vector<1x8x8xbf16>
    %190 = vector.shape_cast %189 : vector<1x8x8xbf16> to vector<8x8xbf16>
    %cst_152 = arith.constant dense<0.000000e+00> : vector<64x8xf32>
    %191 = tpu.matmul %188, %190, %cst_152 {dimension_numbers = #tpu.dot_dimension_numbers<[1], [0], [0], [1], [0, 0, 1, 1], [], []>} : vector<64x8xbf16>, vector<8x8xbf16>, vector<64x8xf32> -> vector<64x8xf32>
    %192 = arith.addf %185, %191 : vector<64x8xf32>
    %c0_153 = arith.constant 0 : index
    %c0_154 = arith.constant 0 : index
    %c7_155 = arith.constant 7 : index
    %c0_156 = arith.constant 0 : index
    %193 = vector.load %arg22[%c0_153, %c0_154, %c7_155, %c0_156] : memref<1x8x24x8xf32, #tpu.memory_space<vmem>>, vector<1x8x8x8xf32>
    %194 = vector.shape_cast %193 : vector<1x8x8x8xf32> to vector<64x8xf32>
    %195 = arith.truncf %194 : vector<64x8xf32> to vector<64x8xbf16>
    %196 = vector.extract_strided_slice %143 {offsets = [3, 0, 0], sizes = [1, 8, 8], strides = [1, 1, 1]} : vector<9x8x8xbf16> to vector<1x8x8xbf16>
    %197 = vector.shape_cast %196 : vector<1x8x8xbf16> to vector<8x8xbf16>
    %cst_157 = arith.constant dense<0.000000e+00> : vector<64x8xf32>
    %198 = tpu.matmul %195, %197, %cst_157 {dimension_numbers = #tpu.dot_dimension_numbers<[1], [0], [0], [1], [0, 0, 1, 1], [], []>} : vector<64x8xbf16>, vector<8x8xbf16>, vector<64x8xf32> -> vector<64x8xf32>
    %199 = arith.addf %192, %198 : vector<64x8xf32>
    %c0_158 = arith.constant 0 : index
    %c0_159 = arith.constant 0 : index
    %c8_160 = arith.constant 8 : index
    %c0_161 = arith.constant 0 : index
    %200 = vector.load %arg22[%c0_158, %c0_159, %c8_160, %c0_161] : memref<1x8x24x8xf32, #tpu.memory_space<vmem>>, vector<1x8x8x8xf32>
    %201 = vector.shape_cast %200 : vector<1x8x8x8xf32> to vector<64x8xf32>
    %202 = arith.truncf %201 : vector<64x8xf32> to vector<64x8xbf16>
    %203 = vector.extract_strided_slice %143 {offsets = [4, 0, 0], sizes = [1, 8, 8], strides = [1, 1, 1]} : vector<9x8x8xbf16> to vector<1x8x8xbf16>
    %204 = vector.shape_cast %203 : vector<1x8x8xbf16> to vector<8x8xbf16>
    %cst_162 = arith.constant dense<0.000000e+00> : vector<64x8xf32>
    %205 = tpu.matmul %202, %204, %cst_162 {dimension_numbers = #tpu.dot_dimension_numbers<[1], [0], [0], [1], [0, 0, 1, 1], [], []>} : vector<64x8xbf16>, vector<8x8xbf16>, vector<64x8xf32> -> vector<64x8xf32>
    %206 = arith.addf %199, %205 : vector<64x8xf32>
    %c0_163 = arith.constant 0 : index
    %c0_164 = arith.constant 0 : index
    %c9_165 = arith.constant 9 : index
    %c0_166 = arith.constant 0 : index
    %207 = vector.load %arg22[%c0_163, %c0_164, %c9_165, %c0_166] : memref<1x8x24x8xf32, #tpu.memory_space<vmem>>, vector<1x8x8x8xf32>
    %208 = vector.shape_cast %207 : vector<1x8x8x8xf32> to vector<64x8xf32>
    %209 = arith.truncf %208 : vector<64x8xf32> to vector<64x8xbf16>
    %210 = vector.extract_strided_slice %143 {offsets = [5, 0, 0], sizes = [1, 8, 8], strides = [1, 1, 1]} : vector<9x8x8xbf16> to vector<1x8x8xbf16>
    %211 = vector.shape_cast %210 : vector<1x8x8xbf16> to vector<8x8xbf16>
    %cst_167 = arith.constant dense<0.000000e+00> : vector<64x8xf32>
    %212 = tpu.matmul %209, %211, %cst_167 {dimension_numbers = #tpu.dot_dimension_numbers<[1], [0], [0], [1], [0, 0, 1, 1], [], []>} : vector<64x8xbf16>, vector<8x8xbf16>, vector<64x8xf32> -> vector<64x8xf32>
    %213 = arith.addf %206, %212 : vector<64x8xf32>
    %c0_168 = arith.constant 0 : index
    %c0_169 = arith.constant 0 : index
    %c10_170 = arith.constant 10 : index
    %c0_171 = arith.constant 0 : index
    %214 = vector.load %arg22[%c0_168, %c0_169, %c10_170, %c0_171] : memref<1x8x24x8xf32, #tpu.memory_space<vmem>>, vector<1x8x8x8xf32>
    %215 = vector.shape_cast %214 : vector<1x8x8x8xf32> to vector<64x8xf32>
    %216 = arith.truncf %215 : vector<64x8xf32> to vector<64x8xbf16>
    %217 = vector.extract_strided_slice %143 {offsets = [6, 0, 0], sizes = [1, 8, 8], strides = [1, 1, 1]} : vector<9x8x8xbf16> to vector<1x8x8xbf16>
    %218 = vector.shape_cast %217 : vector<1x8x8xbf16> to vector<8x8xbf16>
    %cst_172 = arith.constant dense<0.000000e+00> : vector<64x8xf32>
    %219 = tpu.matmul %216, %218, %cst_172 {dimension_numbers = #tpu.dot_dimension_numbers<[1], [0], [0], [1], [0, 0, 1, 1], [], []>} : vector<64x8xbf16>, vector<8x8xbf16>, vector<64x8xf32> -> vector<64x8xf32>
    %220 = arith.addf %213, %219 : vector<64x8xf32>
    %c0_173 = arith.constant 0 : index
    %c0_174 = arith.constant 0 : index
    %c11_175 = arith.constant 11 : index
    %c0_176 = arith.constant 0 : index
    %221 = vector.load %arg22[%c0_173, %c0_174, %c11_175, %c0_176] : memref<1x8x24x8xf32, #tpu.memory_space<vmem>>, vector<1x8x8x8xf32>
    %222 = vector.shape_cast %221 : vector<1x8x8x8xf32> to vector<64x8xf32>
    %223 = arith.truncf %222 : vector<64x8xf32> to vector<64x8xbf16>
    %224 = vector.extract_strided_slice %143 {offsets = [7, 0, 0], sizes = [1, 8, 8], strides = [1, 1, 1]} : vector<9x8x8xbf16> to vector<1x8x8xbf16>
    %225 = vector.shape_cast %224 : vector<1x8x8xbf16> to vector<8x8xbf16>
    %cst_177 = arith.constant dense<0.000000e+00> : vector<64x8xf32>
    %226 = tpu.matmul %223, %225, %cst_177 {dimension_numbers = #tpu.dot_dimension_numbers<[1], [0], [0], [1], [0, 0, 1, 1], [], []>} : vector<64x8xbf16>, vector<8x8xbf16>, vector<64x8xf32> -> vector<64x8xf32>
    %227 = arith.addf %220, %226 : vector<64x8xf32>
    %c0_178 = arith.constant 0 : index
    %c0_179 = arith.constant 0 : index
    %c12_180 = arith.constant 12 : index
    %c0_181 = arith.constant 0 : index
    %228 = vector.load %arg22[%c0_178, %c0_179, %c12_180, %c0_181] : memref<1x8x24x8xf32, #tpu.memory_space<vmem>>, vector<1x8x8x8xf32>
    %229 = vector.shape_cast %228 : vector<1x8x8x8xf32> to vector<64x8xf32>
    %230 = arith.truncf %229 : vector<64x8xf32> to vector<64x8xbf16>
    %231 = vector.extract_strided_slice %143 {offsets = [8, 0, 0], sizes = [1, 8, 8], strides = [1, 1, 1]} : vector<9x8x8xbf16> to vector<1x8x8xbf16>
    %232 = vector.shape_cast %231 : vector<1x8x8xbf16> to vector<8x8xbf16>
    %cst_182 = arith.constant dense<0.000000e+00> : vector<64x8xf32>
    %233 = tpu.matmul %230, %232, %cst_182 {dimension_numbers = #tpu.dot_dimension_numbers<[1], [0], [0], [1], [0, 0, 1, 1], [], []>} : vector<64x8xbf16>, vector<8x8xbf16>, vector<64x8xf32> -> vector<64x8xf32>
    %234 = arith.addf %227, %233 : vector<64x8xf32>
    %c0_183 = arith.constant 0 : index
    %c0_184 = arith.constant 0 : index
    %235 = vector.load %arg9[%c0_183, %c0_184] : memref<1x8xf32, #tpu.memory_space<vmem>>, vector<1x8xf32>
    %236 = vector.broadcast %235 : vector<1x8xf32> to vector<64x8xf32>
    %237 = arith.addf %234, %236 : vector<64x8xf32>
    %238 = vector.shape_cast %237 : vector<64x8xf32> to vector<1x8x8x8xf32>
    %239 = vector.extract_strided_slice %238 {offsets = [0, 0, 0, 0], sizes = [1, 1, 8, 8], strides = [1, 1, 1, 1]} : vector<1x8x8x8xf32> to vector<1x1x8x8xf32>
    %240 = vector.shape_cast %239 : vector<1x1x8x8xf32> to vector<1x8x8xf32>
    %241 = vector.shape_cast %240 : vector<1x8x8xf32> to vector<8x8xf32>
    %242 = vector.extract_strided_slice %238 {offsets = [0, 1, 0, 0], sizes = [1, 1, 8, 8], strides = [1, 1, 1, 1]} : vector<1x8x8x8xf32> to vector<1x1x8x8xf32>
    %243 = vector.shape_cast %242 : vector<1x1x8x8xf32> to vector<1x8x8xf32>
    %244 = vector.shape_cast %243 : vector<1x8x8xf32> to vector<8x8xf32>
    %245 = vector.extract_strided_slice %238 {offsets = [0, 2, 0, 0], sizes = [1, 1, 8, 8], strides = [1, 1, 1, 1]} : vector<1x8x8x8xf32> to vector<1x1x8x8xf32>
    %246 = vector.shape_cast %245 : vector<1x1x8x8xf32> to vector<1x8x8xf32>
    %247 = vector.shape_cast %246 : vector<1x8x8xf32> to vector<8x8xf32>
    %248 = vector.extract_strided_slice %238 {offsets = [0, 3, 0, 0], sizes = [1, 1, 8, 8], strides = [1, 1, 1, 1]} : vector<1x8x8x8xf32> to vector<1x1x8x8xf32>
    %249 = vector.shape_cast %248 : vector<1x1x8x8xf32> to vector<1x8x8xf32>
    %250 = vector.shape_cast %249 : vector<1x8x8xf32> to vector<8x8xf32>
    %251 = vector.extract_strided_slice %238 {offsets = [0, 4, 0, 0], sizes = [1, 1, 8, 8], strides = [1, 1, 1, 1]} : vector<1x8x8x8xf32> to vector<1x1x8x8xf32>
    %252 = vector.shape_cast %251 : vector<1x1x8x8xf32> to vector<1x8x8xf32>
    %253 = vector.shape_cast %252 : vector<1x8x8xf32> to vector<8x8xf32>
    %254 = vector.extract_strided_slice %238 {offsets = [0, 5, 0, 0], sizes = [1, 1, 8, 8], strides = [1, 1, 1, 1]} : vector<1x8x8x8xf32> to vector<1x1x8x8xf32>
    %255 = vector.shape_cast %254 : vector<1x1x8x8xf32> to vector<1x8x8xf32>
    %256 = vector.shape_cast %255 : vector<1x8x8xf32> to vector<8x8xf32>
    %257 = vector.extract_strided_slice %238 {offsets = [0, 6, 0, 0], sizes = [1, 1, 8, 8], strides = [1, 1, 1, 1]} : vector<1x8x8x8xf32> to vector<1x1x8x8xf32>
    %258 = vector.shape_cast %257 : vector<1x1x8x8xf32> to vector<1x8x8xf32>
    %259 = vector.shape_cast %258 : vector<1x8x8xf32> to vector<8x8xf32>
    %260 = vector.extract_strided_slice %238 {offsets = [0, 7, 0, 0], sizes = [1, 1, 8, 8], strides = [1, 1, 1, 1]} : vector<1x8x8x8xf32> to vector<1x1x8x8xf32>
    %261 = vector.shape_cast %260 : vector<1x1x8x8xf32> to vector<1x8x8xf32>
    %262 = vector.shape_cast %261 : vector<1x8x8xf32> to vector<8x8xf32>
    %263 = tpu.concatenate %241, %244, %247, %250, %253, %256, %259, %262 in 1 : vector<8x8xf32>, vector<8x8xf32>, vector<8x8xf32>, vector<8x8xf32>, vector<8x8xf32>, vector<8x8xf32>, vector<8x8xf32>, vector<8x8xf32> -> vector<8x64xf32>
    %264 = arith.addf %263, %133 : vector<8x64xf32>
    %cst_185 = arith.constant 0.000000e+00 : f32
    %265 = vector.broadcast %cst_185 : f32 to vector<8x64xf32>
    %266 = arith.maximumf %264, %265 : vector<8x64xf32>
    %267 = arith.truncf %266 : vector<8x64xf32> to vector<8x64xbf16>
    %c0_186 = arith.constant 0 : index
    %c0_187 = arith.constant 0 : index
    %268 = vector.load %arg10[%c0_186, %c0_187] : memref<64x128xbf16, #tpu.memory_space<vmem>>, vector<64x128xbf16>
    %cst_188 = arith.constant dense<0.000000e+00> : vector<8x128xf32>
    %269 = tpu.matmul %267, %268, %cst_188 {dimension_numbers = #tpu.dot_dimension_numbers<[1], [0], [0], [1], [0, 0, 1, 1], [], []>} : vector<8x64xbf16>, vector<64x128xbf16>, vector<8x128xf32> -> vector<8x128xf32>
    %c0_189 = arith.constant 0 : index
    %c0_190 = arith.constant 0 : index
    %270 = vector.load %arg11[%c0_189, %c0_190] : memref<1x128xf32, #tpu.memory_space<vmem>>, vector<1x128xf32>
    %271 = vector.broadcast %270 : vector<1x128xf32> to vector<8x128xf32>
    %272 = arith.addf %269, %271 : vector<8x128xf32>
    %cst_191 = arith.constant 0.000000e+00 : f32
    %273 = vector.broadcast %cst_191 : f32 to vector<8x128xf32>
    %274 = arith.maximumf %272, %273 : vector<8x128xf32>
    %c0_192 = arith.constant 0 : index
    %c0_193 = arith.constant 0 : index
    %c0_194 = arith.constant 0 : index
    %275 = vector.load %arg12[%c0_192, %c0_193, %c0_194] : memref<9x16x16xbf16, #tpu.memory_space<vmem>>, vector<9x16x16xbf16>
    %cst_195 = arith.constant 0.000000e+00 : f32
    %276 = vector.broadcast %cst_195 : f32 to vector<32x16xf32>
    %277 = vector.shape_cast %274 : vector<8x128xf32> to vector<1x4x2x128xf32>
    %278 = vector.extract_strided_slice %277 {offsets = [0, 0, 0, 0], sizes = [1, 4, 1, 128], strides = [1, 1, 1, 1]} : vector<1x4x2x128xf32> to vector<1x4x1x128xf32>
    %279 = vector.shape_cast %278 : vector<1x4x1x128xf32> to vector<1x4x128xf32>
    %cst_196 = arith.constant 0.000000e+00 : f32
    %280 = vector.broadcast %cst_196 : f32 to vector<1x8x8x16xf32>
    %c0_197 = arith.constant 0 : index
    %c0_198 = arith.constant 0 : index
    %c0_199 = arith.constant 0 : index
    %c0_200 = arith.constant 0 : index
    %281 = vector.load %arg23[%c0_197, %c0_198, %c0_199, %c0_200] : memref<1x8x20x16xf32, #tpu.memory_space<vmem>>, vector<1x8x8x16xf32>
    tpu.vector_store %arg23[%c0_197, %c0_198, %c0_199, %c0_200], %280 {strides = array<i32>} : memref<1x8x20x16xf32, #tpu.memory_space<vmem>>, vector<1x8x8x16xf32>,
    %c0_201 = arith.constant 0 : index
    %c0_202 = arith.constant 0 : index
    %c12_203 = arith.constant 12 : index
    %c0_204 = arith.constant 0 : index
    %282 = vector.load %arg23[%c0_201, %c0_202, %c12_203, %c0_204] : memref<1x8x20x16xf32, #tpu.memory_space<vmem>>, vector<1x8x8x16xf32>
    tpu.vector_store %arg23[%c0_201, %c0_202, %c12_203, %c0_204], %280 {strides = array<i32>} : memref<1x8x20x16xf32, #tpu.memory_space<vmem>>, vector<1x8x8x16xf32>,
    %283 = vector.extract_strided_slice %279 {offsets = [0, 0, 0], sizes = [1, 4, 16], strides = [1, 1, 1]} : vector<1x4x128xf32> to vector<1x4x16xf32>
    %284 = vector.shape_cast %283 : vector<1x4x16xf32> to vector<1x1x4x16xf32>
    %c0_205 = arith.constant 0 : index
    %c0_206 = arith.constant 0 : index
    %c8_207 = arith.constant 8 : index
    %c0_208 = arith.constant 0 : index
    %285 = vector.load %arg23[%c0_205, %c0_206, %c8_207, %c0_208] : memref<1x8x20x16xf32, #tpu.memory_space<vmem>>, vector<1x1x4x16xf32>
    tpu.vector_store %arg23[%c0_205, %c0_206, %c8_207, %c0_208], %284 {strides = array<i32>} : memref<1x8x20x16xf32, #tpu.memory_space<vmem>>, vector<1x1x4x16xf32>,
    %286 = vector.extract_strided_slice %279 {offsets = [0, 0, 16], sizes = [1, 4, 16], strides = [1, 1, 1]} : vector<1x4x128xf32> to vector<1x4x16xf32>
    %287 = vector.shape_cast %286 : vector<1x4x16xf32> to vector<1x1x4x16xf32>
    %c0_209 = arith.constant 0 : index
    %c1_210 = arith.constant 1 : index
    %c8_211 = arith.constant 8 : index
    %c0_212 = arith.constant 0 : index
    %288 = vector.load %arg23[%c0_209, %c1_210, %c8_211, %c0_212] : memref<1x8x20x16xf32, #tpu.memory_space<vmem>>, vector<1x1x4x16xf32>
    tpu.vector_store %arg23[%c0_209, %c1_210, %c8_211, %c0_212], %287 {strides = array<i32>} : memref<1x8x20x16xf32, #tpu.memory_space<vmem>>, vector<1x1x4x16xf32>,
    %289 = vector.extract_strided_slice %279 {offsets = [0, 0, 32], sizes = [1, 4, 16], strides = [1, 1, 1]} : vector<1x4x128xf32> to vector<1x4x16xf32>
    %290 = vector.shape_cast %289 : vector<1x4x16xf32> to vector<1x1x4x16xf32>
    %c0_213 = arith.constant 0 : index
    %c2_214 = arith.constant 2 : index
    %c8_215 = arith.constant 8 : index
    %c0_216 = arith.constant 0 : index
    %291 = vector.load %arg23[%c0_213, %c2_214, %c8_215, %c0_216] : memref<1x8x20x16xf32, #tpu.memory_space<vmem>>, vector<1x1x4x16xf32>
    tpu.vector_store %arg23[%c0_213, %c2_214, %c8_215, %c0_216], %290 {strides = array<i32>} : memref<1x8x20x16xf32, #tpu.memory_space<vmem>>, vector<1x1x4x16xf32>,
    %292 = vector.extract_strided_slice %279 {offsets = [0, 0, 48], sizes = [1, 4, 16], strides = [1, 1, 1]} : vector<1x4x128xf32> to vector<1x4x16xf32>
    %293 = vector.shape_cast %292 : vector<1x4x16xf32> to vector<1x1x4x16xf32>
    %c0_217 = arith.constant 0 : index
    %c3_218 = arith.constant 3 : index
    %c8_219 = arith.constant 8 : index
    %c0_220 = arith.constant 0 : index
    %294 = vector.load %arg23[%c0_217, %c3_218, %c8_219, %c0_220] : memref<1x8x20x16xf32, #tpu.memory_space<vmem>>, vector<1x1x4x16xf32>
    tpu.vector_store %arg23[%c0_217, %c3_218, %c8_219, %c0_220], %293 {strides = array<i32>} : memref<1x8x20x16xf32, #tpu.memory_space<vmem>>, vector<1x1x4x16xf32>,
    %295 = vector.extract_strided_slice %279 {offsets = [0, 0, 64], sizes = [1, 4, 16], strides = [1, 1, 1]} : vector<1x4x128xf32> to vector<1x4x16xf32>
    %296 = vector.shape_cast %295 : vector<1x4x16xf32> to vector<1x1x4x16xf32>
    %c0_221 = arith.constant 0 : index
    %c4_222 = arith.constant 4 : index
    %c8_223 = arith.constant 8 : index
    %c0_224 = arith.constant 0 : index
    %297 = vector.load %arg23[%c0_221, %c4_222, %c8_223, %c0_224] : memref<1x8x20x16xf32, #tpu.memory_space<vmem>>, vector<1x1x4x16xf32>
    tpu.vector_store %arg23[%c0_221, %c4_222, %c8_223, %c0_224], %296 {strides = array<i32>} : memref<1x8x20x16xf32, #tpu.memory_space<vmem>>, vector<1x1x4x16xf32>,
    %298 = vector.extract_strided_slice %279 {offsets = [0, 0, 80], sizes = [1, 4, 16], strides = [1, 1, 1]} : vector<1x4x128xf32> to vector<1x4x16xf32>
    %299 = vector.shape_cast %298 : vector<1x4x16xf32> to vector<1x1x4x16xf32>
    %c0_225 = arith.constant 0 : index
    %c5_226 = arith.constant 5 : index
    %c8_227 = arith.constant 8 : index
    %c0_228 = arith.constant 0 : index
    %300 = vector.load %arg23[%c0_225, %c5_226, %c8_227, %c0_228] : memref<1x8x20x16xf32, #tpu.memory_space<vmem>>, vector<1x1x4x16xf32>
    tpu.vector_store %arg23[%c0_225, %c5_226, %c8_227, %c0_228], %299 {strides = array<i32>} : memref<1x8x20x16xf32, #tpu.memory_space<vmem>>, vector<1x1x4x16xf32>,
    %301 = vector.extract_strided_slice %279 {offsets = [0, 0, 96], sizes = [1, 4, 16], strides = [1, 1, 1]} : vector<1x4x128xf32> to vector<1x4x16xf32>
    %302 = vector.shape_cast %301 : vector<1x4x16xf32> to vector<1x1x4x16xf32>
    %c0_229 = arith.constant 0 : index
    %c6_230 = arith.constant 6 : index
    %c8_231 = arith.constant 8 : index
    %c0_232 = arith.constant 0 : index
    %303 = vector.load %arg23[%c0_229, %c6_230, %c8_231, %c0_232] : memref<1x8x20x16xf32, #tpu.memory_space<vmem>>, vector<1x1x4x16xf32>
    tpu.vector_store %arg23[%c0_229, %c6_230, %c8_231, %c0_232], %302 {strides = array<i32>} : memref<1x8x20x16xf32, #tpu.memory_space<vmem>>, vector<1x1x4x16xf32>,
    %304 = vector.extract_strided_slice %279 {offsets = [0, 0, 112], sizes = [1, 4, 16], strides = [1, 1, 1]} : vector<1x4x128xf32> to vector<1x4x16xf32>
    %305 = vector.shape_cast %304 : vector<1x4x16xf32> to vector<1x1x4x16xf32>
    %c0_233 = arith.constant 0 : index
    %c7_234 = arith.constant 7 : index
    %c8_235 = arith.constant 8 : index
    %c0_236 = arith.constant 0 : index
    %306 = vector.load %arg23[%c0_233, %c7_234, %c8_235, %c0_236] : memref<1x8x20x16xf32, #tpu.memory_space<vmem>>, vector<1x1x4x16xf32>
    tpu.vector_store %arg23[%c0_233, %c7_234, %c8_235, %c0_236], %305 {strides = array<i32>} : memref<1x8x20x16xf32, #tpu.memory_space<vmem>>, vector<1x1x4x16xf32>,
    %307 = vector.extract_strided_slice %277 {offsets = [0, 0, 1, 0], sizes = [1, 4, 1, 128], strides = [1, 1, 1, 1]} : vector<1x4x2x128xf32> to vector<1x4x1x128xf32>
    %308 = vector.shape_cast %307 : vector<1x4x1x128xf32> to vector<1x4x128xf32>
    %cst_237 = arith.constant 0.000000e+00 : f32
    %309 = vector.broadcast %cst_237 : f32 to vector<1x8x8x16xf32>
    %c0_238 = arith.constant 0 : index
    %c0_239 = arith.constant 0 : index
    %c0_240 = arith.constant 0 : index
    %c0_241 = arith.constant 0 : index
    %310 = vector.load %arg24[%c0_238, %c0_239, %c0_240, %c0_241] : memref<1x8x20x16xf32, #tpu.memory_space<vmem>>, vector<1x8x8x16xf32>
    tpu.vector_store %arg24[%c0_238, %c0_239, %c0_240, %c0_241], %309 {strides = array<i32>} : memref<1x8x20x16xf32, #tpu.memory_space<vmem>>, vector<1x8x8x16xf32>,
    %c0_242 = arith.constant 0 : index
    %c0_243 = arith.constant 0 : index
    %c12_244 = arith.constant 12 : index
    %c0_245 = arith.constant 0 : index
    %311 = vector.load %arg24[%c0_242, %c0_243, %c12_244, %c0_245] : memref<1x8x20x16xf32, #tpu.memory_space<vmem>>, vector<1x8x8x16xf32>
    tpu.vector_store %arg24[%c0_242, %c0_243, %c12_244, %c0_245], %309 {strides = array<i32>} : memref<1x8x20x16xf32, #tpu.memory_space<vmem>>, vector<1x8x8x16xf32>,
    %312 = vector.extract_strided_slice %308 {offsets = [0, 0, 0], sizes = [1, 4, 16], strides = [1, 1, 1]} : vector<1x4x128xf32> to vector<1x4x16xf32>
    %313 = vector.shape_cast %312 : vector<1x4x16xf32> to vector<1x1x4x16xf32>
    %c0_246 = arith.constant 0 : index
    %c0_247 = arith.constant 0 : index
    %c8_248 = arith.constant 8 : index
    %c0_249 = arith.constant 0 : index
    %314 = vector.load %arg24[%c0_246, %c0_247, %c8_248, %c0_249] : memref<1x8x20x16xf32, #tpu.memory_space<vmem>>, vector<1x1x4x16xf32>
    tpu.vector_store %arg24[%c0_246, %c0_247, %c8_248, %c0_249], %313 {strides = array<i32>} : memref<1x8x20x16xf32, #tpu.memory_space<vmem>>, vector<1x1x4x16xf32>,
    %315 = vector.extract_strided_slice %308 {offsets = [0, 0, 16], sizes = [1, 4, 16], strides = [1, 1, 1]} : vector<1x4x128xf32> to vector<1x4x16xf32>
    %316 = vector.shape_cast %315 : vector<1x4x16xf32> to vector<1x1x4x16xf32>
    %c0_250 = arith.constant 0 : index
    %c1_251 = arith.constant 1 : index
    %c8_252 = arith.constant 8 : index
    %c0_253 = arith.constant 0 : index
    %317 = vector.load %arg24[%c0_250, %c1_251, %c8_252, %c0_253] : memref<1x8x20x16xf32, #tpu.memory_space<vmem>>, vector<1x1x4x16xf32>
    tpu.vector_store %arg24[%c0_250, %c1_251, %c8_252, %c0_253], %316 {strides = array<i32>} : memref<1x8x20x16xf32, #tpu.memory_space<vmem>>, vector<1x1x4x16xf32>,
    %318 = vector.extract_strided_slice %308 {offsets = [0, 0, 32], sizes = [1, 4, 16], strides = [1, 1, 1]} : vector<1x4x128xf32> to vector<1x4x16xf32>
    %319 = vector.shape_cast %318 : vector<1x4x16xf32> to vector<1x1x4x16xf32>
    %c0_254 = arith.constant 0 : index
    %c2_255 = arith.constant 2 : index
    %c8_256 = arith.constant 8 : index
    %c0_257 = arith.constant 0 : index
    %320 = vector.load %arg24[%c0_254, %c2_255, %c8_256, %c0_257] : memref<1x8x20x16xf32, #tpu.memory_space<vmem>>, vector<1x1x4x16xf32>
    tpu.vector_store %arg24[%c0_254, %c2_255, %c8_256, %c0_257], %319 {strides = array<i32>} : memref<1x8x20x16xf32, #tpu.memory_space<vmem>>, vector<1x1x4x16xf32>,
    %321 = vector.extract_strided_slice %308 {offsets = [0, 0, 48], sizes = [1, 4, 16], strides = [1, 1, 1]} : vector<1x4x128xf32> to vector<1x4x16xf32>
    %322 = vector.shape_cast %321 : vector<1x4x16xf32> to vector<1x1x4x16xf32>
    %c0_258 = arith.constant 0 : index
    %c3_259 = arith.constant 3 : index
    %c8_260 = arith.constant 8 : index
    %c0_261 = arith.constant 0 : index
    %323 = vector.load %arg24[%c0_258, %c3_259, %c8_260, %c0_261] : memref<1x8x20x16xf32, #tpu.memory_space<vmem>>, vector<1x1x4x16xf32>
    tpu.vector_store %arg24[%c0_258, %c3_259, %c8_260, %c0_261], %322 {strides = array<i32>} : memref<1x8x20x16xf32, #tpu.memory_space<vmem>>, vector<1x1x4x16xf32>,
    %324 = vector.extract_strided_slice %308 {offsets = [0, 0, 64], sizes = [1, 4, 16], strides = [1, 1, 1]} : vector<1x4x128xf32> to vector<1x4x16xf32>
    %325 = vector.shape_cast %324 : vector<1x4x16xf32> to vector<1x1x4x16xf32>
    %c0_262 = arith.constant 0 : index
    %c4_263 = arith.constant 4 : index
    %c8_264 = arith.constant 8 : index
    %c0_265 = arith.constant 0 : index
    %326 = vector.load %arg24[%c0_262, %c4_263, %c8_264, %c0_265] : memref<1x8x20x16xf32, #tpu.memory_space<vmem>>, vector<1x1x4x16xf32>
    tpu.vector_store %arg24[%c0_262, %c4_263, %c8_264, %c0_265], %325 {strides = array<i32>} : memref<1x8x20x16xf32, #tpu.memory_space<vmem>>, vector<1x1x4x16xf32>,
    %327 = vector.extract_strided_slice %308 {offsets = [0, 0, 80], sizes = [1, 4, 16], strides = [1, 1, 1]} : vector<1x4x128xf32> to vector<1x4x16xf32>
    %328 = vector.shape_cast %327 : vector<1x4x16xf32> to vector<1x1x4x16xf32>
    %c0_266 = arith.constant 0 : index
    %c5_267 = arith.constant 5 : index
    %c8_268 = arith.constant 8 : index
    %c0_269 = arith.constant 0 : index
    %329 = vector.load %arg24[%c0_266, %c5_267, %c8_268, %c0_269] : memref<1x8x20x16xf32, #tpu.memory_space<vmem>>, vector<1x1x4x16xf32>
    tpu.vector_store %arg24[%c0_266, %c5_267, %c8_268, %c0_269], %328 {strides = array<i32>} : memref<1x8x20x16xf32, #tpu.memory_space<vmem>>, vector<1x1x4x16xf32>,
    %330 = vector.extract_strided_slice %308 {offsets = [0, 0, 96], sizes = [1, 4, 16], strides = [1, 1, 1]} : vector<1x4x128xf32> to vector<1x4x16xf32>
    %331 = vector.shape_cast %330 : vector<1x4x16xf32> to vector<1x1x4x16xf32>
    %c0_270 = arith.constant 0 : index
    %c6_271 = arith.constant 6 : index
    %c8_272 = arith.constant 8 : index
    %c0_273 = arith.constant 0 : index
    %332 = vector.load %arg24[%c0_270, %c6_271, %c8_272, %c0_273] : memref<1x8x20x16xf32, #tpu.memory_space<vmem>>, vector<1x1x4x16xf32>
    tpu.vector_store %arg24[%c0_270, %c6_271, %c8_272, %c0_273], %331 {strides = array<i32>} : memref<1x8x20x16xf32, #tpu.memory_space<vmem>>, vector<1x1x4x16xf32>,
    %333 = vector.extract_strided_slice %308 {offsets = [0, 0, 112], sizes = [1, 4, 16], strides = [1, 1, 1]} : vector<1x4x128xf32> to vector<1x4x16xf32>
    %334 = vector.shape_cast %333 : vector<1x4x16xf32> to vector<1x1x4x16xf32>
    %c0_274 = arith.constant 0 : index
    %c7_275 = arith.constant 7 : index
    %c8_276 = arith.constant 8 : index
    %c0_277 = arith.constant 0 : index
    %335 = vector.load %arg24[%c0_274, %c7_275, %c8_276, %c0_277] : memref<1x8x20x16xf32, #tpu.memory_space<vmem>>, vector<1x1x4x16xf32>
    tpu.vector_store %arg24[%c0_274, %c7_275, %c8_276, %c0_277], %334 {strides = array<i32>} : memref<1x8x20x16xf32, #tpu.memory_space<vmem>>, vector<1x1x4x16xf32>,
    %c0_278 = arith.constant 0 : index
    %c0_279 = arith.constant 0 : index
    %c6_280 = arith.constant 6 : index
    %c0_281 = arith.constant 0 : index
    %336 = vector.load %arg23[%c0_278, %c0_279, %c6_280, %c0_281] : memref<1x8x20x16xf32, #tpu.memory_space<vmem>>, vector<1x8x4x16xf32>
    %337 = vector.shape_cast %336 : vector<1x8x4x16xf32> to vector<32x16xf32>
    %338 = arith.truncf %337 : vector<32x16xf32> to vector<32x16xbf16>
    %339 = vector.extract_strided_slice %275 {offsets = [0, 0, 0], sizes = [1, 16, 16], strides = [1, 1, 1]} : vector<9x16x16xbf16> to vector<1x16x16xbf16>
    %340 = vector.shape_cast %339 : vector<1x16x16xbf16> to vector<16x16xbf16>
    %cst_282 = arith.constant dense<0.000000e+00> : vector<32x16xf32>
    %341 = tpu.matmul %338, %340, %cst_282 {dimension_numbers = #tpu.dot_dimension_numbers<[1], [0], [0], [1], [0, 0, 1, 1], [], []>} : vector<32x16xbf16>, vector<16x16xbf16>, vector<32x16xf32> -> vector<32x16xf32>
    %342 = arith.addf %276, %341 : vector<32x16xf32>
    %c0_283 = arith.constant 0 : index
    %c0_284 = arith.constant 0 : index
    %c7_285 = arith.constant 7 : index
    %c0_286 = arith.constant 0 : index
    %343 = vector.load %arg23[%c0_283, %c0_284, %c7_285, %c0_286] : memref<1x8x20x16xf32, #tpu.memory_space<vmem>>, vector<1x8x4x16xf32>
    %344 = vector.shape_cast %343 : vector<1x8x4x16xf32> to vector<32x16xf32>
    %345 = arith.truncf %344 : vector<32x16xf32> to vector<32x16xbf16>
    %346 = vector.extract_strided_slice %275 {offsets = [2, 0, 0], sizes = [1, 16, 16], strides = [1, 1, 1]} : vector<9x16x16xbf16> to vector<1x16x16xbf16>
    %347 = vector.shape_cast %346 : vector<1x16x16xbf16> to vector<16x16xbf16>
    %cst_287 = arith.constant dense<0.000000e+00> : vector<32x16xf32>
    %348 = tpu.matmul %345, %347, %cst_287 {dimension_numbers = #tpu.dot_dimension_numbers<[1], [0], [0], [1], [0, 0, 1, 1], [], []>} : vector<32x16xbf16>, vector<16x16xbf16>, vector<32x16xf32> -> vector<32x16xf32>
    %349 = arith.addf %342, %348 : vector<32x16xf32>
    %c0_288 = arith.constant 0 : index
    %c0_289 = arith.constant 0 : index
    %c8_290 = arith.constant 8 : index
    %c0_291 = arith.constant 0 : index
    %350 = vector.load %arg23[%c0_288, %c0_289, %c8_290, %c0_291] : memref<1x8x20x16xf32, #tpu.memory_space<vmem>>, vector<1x8x4x16xf32>
    %351 = vector.shape_cast %350 : vector<1x8x4x16xf32> to vector<32x16xf32>
    %352 = arith.truncf %351 : vector<32x16xf32> to vector<32x16xbf16>
    %353 = vector.extract_strided_slice %275 {offsets = [4, 0, 0], sizes = [1, 16, 16], strides = [1, 1, 1]} : vector<9x16x16xbf16> to vector<1x16x16xbf16>
    %354 = vector.shape_cast %353 : vector<1x16x16xbf16> to vector<16x16xbf16>
    %cst_292 = arith.constant dense<0.000000e+00> : vector<32x16xf32>
    %355 = tpu.matmul %352, %354, %cst_292 {dimension_numbers = #tpu.dot_dimension_numbers<[1], [0], [0], [1], [0, 0, 1, 1], [], []>} : vector<32x16xbf16>, vector<16x16xbf16>, vector<32x16xf32> -> vector<32x16xf32>
    %356 = arith.addf %349, %355 : vector<32x16xf32>
    %c0_293 = arith.constant 0 : index
    %c0_294 = arith.constant 0 : index
    %c9_295 = arith.constant 9 : index
    %c0_296 = arith.constant 0 : index
    %357 = vector.load %arg23[%c0_293, %c0_294, %c9_295, %c0_296] : memref<1x8x20x16xf32, #tpu.memory_space<vmem>>, vector<1x8x4x16xf32>
    %358 = vector.shape_cast %357 : vector<1x8x4x16xf32> to vector<32x16xf32>
    %359 = arith.truncf %358 : vector<32x16xf32> to vector<32x16xbf16>
    %360 = vector.extract_strided_slice %275 {offsets = [6, 0, 0], sizes = [1, 16, 16], strides = [1, 1, 1]} : vector<9x16x16xbf16> to vector<1x16x16xbf16>
    %361 = vector.shape_cast %360 : vector<1x16x16xbf16> to vector<16x16xbf16>
    %cst_297 = arith.constant dense<0.000000e+00> : vector<32x16xf32>
    %362 = tpu.matmul %359, %361, %cst_297 {dimension_numbers = #tpu.dot_dimension_numbers<[1], [0], [0], [1], [0, 0, 1, 1], [], []>} : vector<32x16xbf16>, vector<16x16xbf16>, vector<32x16xf32> -> vector<32x16xf32>
    %363 = arith.addf %356, %362 : vector<32x16xf32>
    %c0_298 = arith.constant 0 : index
    %c0_299 = arith.constant 0 : index
    %c10_300 = arith.constant 10 : index
    %c0_301 = arith.constant 0 : index
    %364 = vector.load %arg23[%c0_298, %c0_299, %c10_300, %c0_301] : memref<1x8x20x16xf32, #tpu.memory_space<vmem>>, vector<1x8x4x16xf32>
    %365 = vector.shape_cast %364 : vector<1x8x4x16xf32> to vector<32x16xf32>
    %366 = arith.truncf %365 : vector<32x16xf32> to vector<32x16xbf16>
    %367 = vector.extract_strided_slice %275 {offsets = [8, 0, 0], sizes = [1, 16, 16], strides = [1, 1, 1]} : vector<9x16x16xbf16> to vector<1x16x16xbf16>
    %368 = vector.shape_cast %367 : vector<1x16x16xbf16> to vector<16x16xbf16>
    %cst_302 = arith.constant dense<0.000000e+00> : vector<32x16xf32>
    %369 = tpu.matmul %366, %368, %cst_302 {dimension_numbers = #tpu.dot_dimension_numbers<[1], [0], [0], [1], [0, 0, 1, 1], [], []>} : vector<32x16xbf16>, vector<16x16xbf16>, vector<32x16xf32> -> vector<32x16xf32>
    %370 = arith.addf %363, %369 : vector<32x16xf32>
    %c0_303 = arith.constant 0 : index
    %c0_304 = arith.constant 0 : index
    %c6_305 = arith.constant 6 : index
    %c0_306 = arith.constant 0 : index
    %371 = vector.load %arg24[%c0_303, %c0_304, %c6_305, %c0_306] : memref<1x8x20x16xf32, #tpu.memory_space<vmem>>, vector<1x8x4x16xf32>
    %372 = vector.shape_cast %371 : vector<1x8x4x16xf32> to vector<32x16xf32>
    %373 = arith.truncf %372 : vector<32x16xf32> to vector<32x16xbf16>
    %374 = vector.extract_strided_slice %275 {offsets = [1, 0, 0], sizes = [1, 16, 16], strides = [1, 1, 1]} : vector<9x16x16xbf16> to vector<1x16x16xbf16>
    %375 = vector.shape_cast %374 : vector<1x16x16xbf16> to vector<16x16xbf16>
    %cst_307 = arith.constant dense<0.000000e+00> : vector<32x16xf32>
    %376 = tpu.matmul %373, %375, %cst_307 {dimension_numbers = #tpu.dot_dimension_numbers<[1], [0], [0], [1], [0, 0, 1, 1], [], []>} : vector<32x16xbf16>, vector<16x16xbf16>, vector<32x16xf32> -> vector<32x16xf32>
    %377 = arith.addf %370, %376 : vector<32x16xf32>
    %c0_308 = arith.constant 0 : index
    %c0_309 = arith.constant 0 : index
    %c7_310 = arith.constant 7 : index
    %c0_311 = arith.constant 0 : index
    %378 = vector.load %arg24[%c0_308, %c0_309, %c7_310, %c0_311] : memref<1x8x20x16xf32, #tpu.memory_space<vmem>>, vector<1x8x4x16xf32>
    %379 = vector.shape_cast %378 : vector<1x8x4x16xf32> to vector<32x16xf32>
    %380 = arith.truncf %379 : vector<32x16xf32> to vector<32x16xbf16>
    %381 = vector.extract_strided_slice %275 {offsets = [3, 0, 0], sizes = [1, 16, 16], strides = [1, 1, 1]} : vector<9x16x16xbf16> to vector<1x16x16xbf16>
    %382 = vector.shape_cast %381 : vector<1x16x16xbf16> to vector<16x16xbf16>
    %cst_312 = arith.constant dense<0.000000e+00> : vector<32x16xf32>
    %383 = tpu.matmul %380, %382, %cst_312 {dimension_numbers = #tpu.dot_dimension_numbers<[1], [0], [0], [1], [0, 0, 1, 1], [], []>} : vector<32x16xbf16>, vector<16x16xbf16>, vector<32x16xf32> -> vector<32x16xf32>
    %384 = arith.addf %377, %383 : vector<32x16xf32>
    %c0_313 = arith.constant 0 : index
    %c0_314 = arith.constant 0 : index
    %c8_315 = arith.constant 8 : index
    %c0_316 = arith.constant 0 : index
    %385 = vector.load %arg24[%c0_313, %c0_314, %c8_315, %c0_316] : memref<1x8x20x16xf32, #tpu.memory_space<vmem>>, vector<1x8x4x16xf32>
    %386 = vector.shape_cast %385 : vector<1x8x4x16xf32> to vector<32x16xf32>
    %387 = arith.truncf %386 : vector<32x16xf32> to vector<32x16xbf16>
    %388 = vector.extract_strided_slice %275 {offsets = [5, 0, 0], sizes = [1, 16, 16], strides = [1, 1, 1]} : vector<9x16x16xbf16> to vector<1x16x16xbf16>
    %389 = vector.shape_cast %388 : vector<1x16x16xbf16> to vector<16x16xbf16>
    %cst_317 = arith.constant dense<0.000000e+00> : vector<32x16xf32>
    %390 = tpu.matmul %387, %389, %cst_317 {dimension_numbers = #tpu.dot_dimension_numbers<[1], [0], [0], [1], [0, 0, 1, 1], [], []>} : vector<32x16xbf16>, vector<16x16xbf16>, vector<32x16xf32> -> vector<32x16xf32>
    %391 = arith.addf %384, %390 : vector<32x16xf32>
    %c0_318 = arith.constant 0 : index
    %c0_319 = arith.constant 0 : index
    %c9_320 = arith.constant 9 : index
    %c0_321 = arith.constant 0 : index
    %392 = vector.load %arg24[%c0_318, %c0_319, %c9_320, %c0_321] : memref<1x8x20x16xf32, #tpu.memory_space<vmem>>, vector<1x8x4x16xf32>
    %393 = vector.shape_cast %392 : vector<1x8x4x16xf32> to vector<32x16xf32>
    %394 = arith.truncf %393 : vector<32x16xf32> to vector<32x16xbf16>
    %395 = vector.extract_strided_slice %275 {offsets = [7, 0, 0], sizes = [1, 16, 16], strides = [1, 1, 1]} : vector<9x16x16xbf16> to vector<1x16x16xbf16>
    %396 = vector.shape_cast %395 : vector<1x16x16xbf16> to vector<16x16xbf16>
    %cst_322 = arith.constant dense<0.000000e+00> : vector<32x16xf32>
    %397 = tpu.matmul %394, %396, %cst_322 {dimension_numbers = #tpu.dot_dimension_numbers<[1], [0], [0], [1], [0, 0, 1, 1], [], []>} : vector<32x16xbf16>, vector<16x16xbf16>, vector<32x16xf32> -> vector<32x16xf32>
    %398 = arith.addf %391, %397 : vector<32x16xf32>
    %c0_323 = arith.constant 0 : index
    %c0_324 = arith.constant 0 : index
    %399 = vector.load %arg13[%c0_323, %c0_324] : memref<1x16xf32, #tpu.memory_space<vmem>>, vector<1x16xf32>
    %400 = vector.broadcast %399 : vector<1x16xf32> to vector<32x16xf32>
    %401 = arith.addf %398, %400 : vector<32x16xf32>
    %402 = vector.shape_cast %401 : vector<32x16xf32> to vector<1x8x4x16xf32>
    %403 = vector.extract_strided_slice %402 {offsets = [0, 0, 0, 0], sizes = [1, 1, 4, 16], strides = [1, 1, 1, 1]} : vector<1x8x4x16xf32> to vector<1x1x4x16xf32>
    %404 = vector.shape_cast %403 : vector<1x1x4x16xf32> to vector<1x4x16xf32>
    %405 = vector.shape_cast %404 : vector<1x4x16xf32> to vector<4x16xf32>
    %406 = vector.extract_strided_slice %402 {offsets = [0, 1, 0, 0], sizes = [1, 1, 4, 16], strides = [1, 1, 1, 1]} : vector<1x8x4x16xf32> to vector<1x1x4x16xf32>
    %407 = vector.shape_cast %406 : vector<1x1x4x16xf32> to vector<1x4x16xf32>
    %408 = vector.shape_cast %407 : vector<1x4x16xf32> to vector<4x16xf32>
    %409 = vector.extract_strided_slice %402 {offsets = [0, 2, 0, 0], sizes = [1, 1, 4, 16], strides = [1, 1, 1, 1]} : vector<1x8x4x16xf32> to vector<1x1x4x16xf32>
    %410 = vector.shape_cast %409 : vector<1x1x4x16xf32> to vector<1x4x16xf32>
    %411 = vector.shape_cast %410 : vector<1x4x16xf32> to vector<4x16xf32>
    %412 = vector.extract_strided_slice %402 {offsets = [0, 3, 0, 0], sizes = [1, 1, 4, 16], strides = [1, 1, 1, 1]} : vector<1x8x4x16xf32> to vector<1x1x4x16xf32>
    %413 = vector.shape_cast %412 : vector<1x1x4x16xf32> to vector<1x4x16xf32>
    %414 = vector.shape_cast %413 : vector<1x4x16xf32> to vector<4x16xf32>
    %415 = vector.extract_strided_slice %402 {offsets = [0, 4, 0, 0], sizes = [1, 1, 4, 16], strides = [1, 1, 1, 1]} : vector<1x8x4x16xf32> to vector<1x1x4x16xf32>
    %416 = vector.shape_cast %415 : vector<1x1x4x16xf32> to vector<1x4x16xf32>
    %417 = vector.shape_cast %416 : vector<1x4x16xf32> to vector<4x16xf32>
    %418 = vector.extract_strided_slice %402 {offsets = [0, 5, 0, 0], sizes = [1, 1, 4, 16], strides = [1, 1, 1, 1]} : vector<1x8x4x16xf32> to vector<1x1x4x16xf32>
    %419 = vector.shape_cast %418 : vector<1x1x4x16xf32> to vector<1x4x16xf32>
    %420 = vector.shape_cast %419 : vector<1x4x16xf32> to vector<4x16xf32>
    %421 = vector.extract_strided_slice %402 {offsets = [0, 6, 0, 0], sizes = [1, 1, 4, 16], strides = [1, 1, 1, 1]} : vector<1x8x4x16xf32> to vector<1x1x4x16xf32>
    %422 = vector.shape_cast %421 : vector<1x1x4x16xf32> to vector<1x4x16xf32>
    %423 = vector.shape_cast %422 : vector<1x4x16xf32> to vector<4x16xf32>
    %424 = vector.extract_strided_slice %402 {offsets = [0, 7, 0, 0], sizes = [1, 1, 4, 16], strides = [1, 1, 1, 1]} : vector<1x8x4x16xf32> to vector<1x1x4x16xf32>
    %425 = vector.shape_cast %424 : vector<1x1x4x16xf32> to vector<1x4x16xf32>
    %426 = vector.shape_cast %425 : vector<1x4x16xf32> to vector<4x16xf32>
    %427 = tpu.concatenate %405, %408, %411, %414, %417, %420, %423, %426 in 1 : vector<4x16xf32>, vector<4x16xf32>, vector<4x16xf32>, vector<4x16xf32>, vector<4x16xf32>, vector<4x16xf32>, vector<4x16xf32>, vector<4x16xf32> -> vector<4x128xf32>
    %428 = vector.shape_cast %266 : vector<8x64xf32> to vector<1x4x2x64xf32>
    %429 = vector.extract_strided_slice %428 {offsets = [0, 0, 0, 0], sizes = [1, 4, 1, 64], strides = [1, 1, 1, 1]} : vector<1x4x2x64xf32> to vector<1x4x1x64xf32>
    %430 = vector.shape_cast %429 : vector<1x4x1x64xf32> to vector<1x4x64xf32>
    %431 = vector.shape_cast %430 : vector<1x4x64xf32> to vector<4x64xf32>
    %c0_325 = arith.constant 0 : index
    %c0_326 = arith.constant 0 : index
    %432 = vector.load %arg14[%c0_325, %c0_326] : memref<8x16xbf16, #tpu.memory_space<vmem>>, vector<8x16xbf16>
    %c0_327 = arith.constant 0 : index
    %c0_328 = arith.constant 0 : index
    %433 = vector.load %arg15[%c0_327, %c0_328] : memref<1x16xf32, #tpu.memory_space<vmem>>, vector<1x16xf32>
    %434 = vector.extract_strided_slice %431 {offsets = [0, 0], sizes = [4, 8], strides = [1, 1]} : vector<4x64xf32> to vector<4x8xf32>
    %435 = arith.truncf %434 : vector<4x8xf32> to vector<4x8xbf16>
    %cst_329 = arith.constant dense<0.000000e+00> : vector<4x16xf32>
    %436 = tpu.matmul %435, %432, %cst_329 {dimension_numbers = #tpu.dot_dimension_numbers<[1], [0], [0], [1], [0, 0, 1, 1], [], []>} : vector<4x8xbf16>, vector<8x16xbf16>, vector<4x16xf32> -> vector<4x16xf32>
    %437 = vector.broadcast %433 : vector<1x16xf32> to vector<4x16xf32>
    %438 = arith.addf %436, %437 : vector<4x16xf32>
    %439 = vector.extract_strided_slice %431 {offsets = [0, 8], sizes = [4, 8], strides = [1, 1]} : vector<4x64xf32> to vector<4x8xf32>
    %440 = arith.truncf %439 : vector<4x8xf32> to vector<4x8xbf16>
    %cst_330 = arith.constant dense<0.000000e+00> : vector<4x16xf32>
    %441 = tpu.matmul %440, %432, %cst_330 {dimension_numbers = #tpu.dot_dimension_numbers<[1], [0], [0], [1], [0, 0, 1, 1], [], []>} : vector<4x8xbf16>, vector<8x16xbf16>, vector<4x16xf32> -> vector<4x16xf32>
    %442 = vector.broadcast %433 : vector<1x16xf32> to vector<4x16xf32>
    %443 = arith.addf %441, %442 : vector<4x16xf32>
    %444 = vector.extract_strided_slice %431 {offsets = [0, 16], sizes = [4, 8], strides = [1, 1]} : vector<4x64xf32> to vector<4x8xf32>
    %445 = arith.truncf %444 : vector<4x8xf32> to vector<4x8xbf16>
    %cst_331 = arith.constant dense<0.000000e+00> : vector<4x16xf32>
    %446 = tpu.matmul %445, %432, %cst_331 {dimension_numbers = #tpu.dot_dimension_numbers<[1], [0], [0], [1], [0, 0, 1, 1], [], []>} : vector<4x8xbf16>, vector<8x16xbf16>, vector<4x16xf32> -> vector<4x16xf32>
    %447 = vector.broadcast %433 : vector<1x16xf32> to vector<4x16xf32>
    %448 = arith.addf %446, %447 : vector<4x16xf32>
    %449 = vector.extract_strided_slice %431 {offsets = [0, 24], sizes = [4, 8], strides = [1, 1]} : vector<4x64xf32> to vector<4x8xf32>
    %450 = arith.truncf %449 : vector<4x8xf32> to vector<4x8xbf16>
    %cst_332 = arith.constant dense<0.000000e+00> : vector<4x16xf32>
    %451 = tpu.matmul %450, %432, %cst_332 {dimension_numbers = #tpu.dot_dimension_numbers<[1], [0], [0], [1], [0, 0, 1, 1], [], []>} : vector<4x8xbf16>, vector<8x16xbf16>, vector<4x16xf32> -> vector<4x16xf32>
    %452 = vector.broadcast %433 : vector<1x16xf32> to vector<4x16xf32>
    %453 = arith.addf %451, %452 : vector<4x16xf32>
    %454 = vector.extract_strided_slice %431 {offsets = [0, 32], sizes = [4, 8], strides = [1, 1]} : vector<4x64xf32> to vector<4x8xf32>
    %455 = arith.truncf %454 : vector<4x8xf32> to vector<4x8xbf16>
    %cst_333 = arith.constant dense<0.000000e+00> : vector<4x16xf32>
    %456 = tpu.matmul %455, %432, %cst_333 {dimension_numbers = #tpu.dot_dimension_numbers<[1], [0], [0], [1], [0, 0, 1, 1], [], []>} : vector<4x8xbf16>, vector<8x16xbf16>, vector<4x16xf32> -> vector<4x16xf32>
    %457 = vector.broadcast %433 : vector<1x16xf32> to vector<4x16xf32>
    %458 = arith.addf %456, %457 : vector<4x16xf32>
    %459 = vector.extract_strided_slice %431 {offsets = [0, 40], sizes = [4, 8], strides = [1, 1]} : vector<4x64xf32> to vector<4x8xf32>
    %460 = arith.truncf %459 : vector<4x8xf32> to vector<4x8xbf16>
    %cst_334 = arith.constant dense<0.000000e+00> : vector<4x16xf32>
    %461 = tpu.matmul %460, %432, %cst_334 {dimension_numbers = #tpu.dot_dimension_numbers<[1], [0], [0], [1], [0, 0, 1, 1], [], []>} : vector<4x8xbf16>, vector<8x16xbf16>, vector<4x16xf32> -> vector<4x16xf32>
    %462 = vector.broadcast %433 : vector<1x16xf32> to vector<4x16xf32>
    %463 = arith.addf %461, %462 : vector<4x16xf32>
    %464 = vector.extract_strided_slice %431 {offsets = [0, 48], sizes = [4, 8], strides = [1, 1]} : vector<4x64xf32> to vector<4x8xf32>
    %465 = arith.truncf %464 : vector<4x8xf32> to vector<4x8xbf16>
    %cst_335 = arith.constant dense<0.000000e+00> : vector<4x16xf32>
    %466 = tpu.matmul %465, %432, %cst_335 {dimension_numbers = #tpu.dot_dimension_numbers<[1], [0], [0], [1], [0, 0, 1, 1], [], []>} : vector<4x8xbf16>, vector<8x16xbf16>, vector<4x16xf32> -> vector<4x16xf32>
    %467 = vector.broadcast %433 : vector<1x16xf32> to vector<4x16xf32>
    %468 = arith.addf %466, %467 : vector<4x16xf32>
    %469 = vector.extract_strided_slice %431 {offsets = [0, 56], sizes = [4, 8], strides = [1, 1]} : vector<4x64xf32> to vector<4x8xf32>
    %470 = arith.truncf %469 : vector<4x8xf32> to vector<4x8xbf16>
    %cst_336 = arith.constant dense<0.000000e+00> : vector<4x16xf32>
    %471 = tpu.matmul %470, %432, %cst_336 {dimension_numbers = #tpu.dot_dimension_numbers<[1], [0], [0], [1], [0, 0, 1, 1], [], []>} : vector<4x8xbf16>, vector<8x16xbf16>, vector<4x16xf32> -> vector<4x16xf32>
    %472 = vector.broadcast %433 : vector<1x16xf32> to vector<4x16xf32>
    %473 = arith.addf %471, %472 : vector<4x16xf32>
    %474 = tpu.concatenate %438, %443, %448, %453, %458, %463, %468, %473 in 1 : vector<4x16xf32>, vector<4x16xf32>, vector<4x16xf32>, vector<4x16xf32>, vector<4x16xf32>, vector<4x16xf32>, vector<4x16xf32>, vector<4x16xf32> -> vector<4x128xf32>
    %475 = arith.addf %427, %474 : vector<4x128xf32>
    %cst_337 = arith.constant 0.000000e+00 : f32
    %476 = vector.broadcast %cst_337 : f32 to vector<4x128xf32>
    %477 = arith.maximumf %475, %476 : vector<4x128xf32>
    %478 = arith.truncf %477 : vector<4x128xf32> to vector<4x128xbf16>
    %c0_338 = arith.constant 0 : index
    %c0_339 = arith.constant 0 : index
    %479 = vector.load %arg16[%c0_338, %c0_339] : memref<128x128xbf16, #tpu.memory_space<vmem>>, vector<128x128xbf16>
    %cst_340 = arith.constant dense<0.000000e+00> : vector<4x128xf32>
    %480 = tpu.matmul %478, %479, %cst_340 {dimension_numbers = #tpu.dot_dimension_numbers<[1], [0], [0], [1], [0, 0, 1, 1], [], []>} : vector<4x128xbf16>, vector<128x128xbf16>, vector<4x128xf32> -> vector<4x128xf32>
    %c0_341 = arith.constant 0 : index
    %c0_342 = arith.constant 0 : index
    %481 = vector.load %arg17[%c0_341, %c0_342] : memref<1x128xf32, #tpu.memory_space<vmem>>, vector<1x128xf32>
    %482 = vector.broadcast %481 : vector<1x128xf32> to vector<4x128xf32>
    %483 = arith.addf %480, %482 : vector<4x128xf32>
    %cst_343 = arith.constant 0.000000e+00 : f32
    %484 = vector.broadcast %cst_343 : f32 to vector<4x128xf32>
    %485 = arith.maximumf %483, %484 : vector<4x128xf32>
    %486 = vector.shape_cast %485 : vector<4x128xf32> to vector<1x4x128xf32>
    %c0_344 = arith.constant 0 : index
    %c0_345 = arith.constant 0 : index
    %c0_346 = arith.constant 0 : index
    %487 = vector.load %arg18[%c0_344, %c0_345, %c0_346] : memref<9x16x16xbf16, #tpu.memory_space<vmem>>, vector<9x16x16xbf16>
    %cst_347 = arith.constant 0.000000e+00 : f32
    %488 = vector.broadcast %cst_347 : f32 to vector<32x16xf32>
    %cst_348 = arith.constant 0.000000e+00 : f32
    %489 = vector.broadcast %cst_348 : f32 to vector<1x8x8x16xf32>
    %c0_349 = arith.constant 0 : index
    %c0_350 = arith.constant 0 : index
    %c0_351 = arith.constant 0 : index
    %c0_352 = arith.constant 0 : index
    %490 = vector.load %arg25[%c0_349, %c0_350, %c0_351, %c0_352] : memref<1x8x20x16xf32, #tpu.memory_space<vmem>>, vector<1x8x8x16xf32>
    tpu.vector_store %arg25[%c0_349, %c0_350, %c0_351, %c0_352], %489 {strides = array<i32>} : memref<1x8x20x16xf32, #tpu.memory_space<vmem>>, vector<1x8x8x16xf32>,
    %c0_353 = arith.constant 0 : index
    %c0_354 = arith.constant 0 : index
    %c12_355 = arith.constant 12 : index
    %c0_356 = arith.constant 0 : index
    %491 = vector.load %arg25[%c0_353, %c0_354, %c12_355, %c0_356] : memref<1x8x20x16xf32, #tpu.memory_space<vmem>>, vector<1x8x8x16xf32>
    tpu.vector_store %arg25[%c0_353, %c0_354, %c12_355, %c0_356], %489 {strides = array<i32>} : memref<1x8x20x16xf32, #tpu.memory_space<vmem>>, vector<1x8x8x16xf32>,
    %492 = vector.extract_strided_slice %486 {offsets = [0, 0, 0], sizes = [1, 4, 16], strides = [1, 1, 1]} : vector<1x4x128xf32> to vector<1x4x16xf32>
    %493 = vector.shape_cast %492 : vector<1x4x16xf32> to vector<1x1x4x16xf32>
    %c0_357 = arith.constant 0 : index
    %c0_358 = arith.constant 0 : index
    %c8_359 = arith.constant 8 : index
    %c0_360 = arith.constant 0 : index
    %494 = vector.load %arg25[%c0_357, %c0_358, %c8_359, %c0_360] : memref<1x8x20x16xf32, #tpu.memory_space<vmem>>, vector<1x1x4x16xf32>
    tpu.vector_store %arg25[%c0_357, %c0_358, %c8_359, %c0_360], %493 {strides = array<i32>} : memref<1x8x20x16xf32, #tpu.memory_space<vmem>>, vector<1x1x4x16xf32>,
    %495 = vector.extract_strided_slice %486 {offsets = [0, 0, 16], sizes = [1, 4, 16], strides = [1, 1, 1]} : vector<1x4x128xf32> to vector<1x4x16xf32>
    %496 = vector.shape_cast %495 : vector<1x4x16xf32> to vector<1x1x4x16xf32>
    %c0_361 = arith.constant 0 : index
    %c1_362 = arith.constant 1 : index
    %c8_363 = arith.constant 8 : index
    %c0_364 = arith.constant 0 : index
    %497 = vector.load %arg25[%c0_361, %c1_362, %c8_363, %c0_364] : memref<1x8x20x16xf32, #tpu.memory_space<vmem>>, vector<1x1x4x16xf32>
    tpu.vector_store %arg25[%c0_361, %c1_362, %c8_363, %c0_364], %496 {strides = array<i32>} : memref<1x8x20x16xf32, #tpu.memory_space<vmem>>, vector<1x1x4x16xf32>,
    %498 = vector.extract_strided_slice %486 {offsets = [0, 0, 32], sizes = [1, 4, 16], strides = [1, 1, 1]} : vector<1x4x128xf32> to vector<1x4x16xf32>
    %499 = vector.shape_cast %498 : vector<1x4x16xf32> to vector<1x1x4x16xf32>
    %c0_365 = arith.constant 0 : index
    %c2_366 = arith.constant 2 : index
    %c8_367 = arith.constant 8 : index
    %c0_368 = arith.constant 0 : index
    %500 = vector.load %arg25[%c0_365, %c2_366, %c8_367, %c0_368] : memref<1x8x20x16xf32, #tpu.memory_space<vmem>>, vector<1x1x4x16xf32>
    tpu.vector_store %arg25[%c0_365, %c2_366, %c8_367, %c0_368], %499 {strides = array<i32>} : memref<1x8x20x16xf32, #tpu.memory_space<vmem>>, vector<1x1x4x16xf32>,
    %501 = vector.extract_strided_slice %486 {offsets = [0, 0, 48], sizes = [1, 4, 16], strides = [1, 1, 1]} : vector<1x4x128xf32> to vector<1x4x16xf32>
    %502 = vector.shape_cast %501 : vector<1x4x16xf32> to vector<1x1x4x16xf32>
    %c0_369 = arith.constant 0 : index
    %c3_370 = arith.constant 3 : index
    %c8_371 = arith.constant 8 : index
    %c0_372 = arith.constant 0 : index
    %503 = vector.load %arg25[%c0_369, %c3_370, %c8_371, %c0_372] : memref<1x8x20x16xf32, #tpu.memory_space<vmem>>, vector<1x1x4x16xf32>
    tpu.vector_store %arg25[%c0_369, %c3_370, %c8_371, %c0_372], %502 {strides = array<i32>} : memref<1x8x20x16xf32, #tpu.memory_space<vmem>>, vector<1x1x4x16xf32>,
    %504 = vector.extract_strided_slice %486 {offsets = [0, 0, 64], sizes = [1, 4, 16], strides = [1, 1, 1]} : vector<1x4x128xf32> to vector<1x4x16xf32>
    %505 = vector.shape_cast %504 : vector<1x4x16xf32> to vector<1x1x4x16xf32>
    %c0_373 = arith.constant 0 : index
    %c4_374 = arith.constant 4 : index
    %c8_375 = arith.constant 8 : index
    %c0_376 = arith.constant 0 : index
    %506 = vector.load %arg25[%c0_373, %c4_374, %c8_375, %c0_376] : memref<1x8x20x16xf32, #tpu.memory_space<vmem>>, vector<1x1x4x16xf32>
    tpu.vector_store %arg25[%c0_373, %c4_374, %c8_375, %c0_376], %505 {strides = array<i32>} : memref<1x8x20x16xf32, #tpu.memory_space<vmem>>, vector<1x1x4x16xf32>,
    %507 = vector.extract_strided_slice %486 {offsets = [0, 0, 80], sizes = [1, 4, 16], strides = [1, 1, 1]} : vector<1x4x128xf32> to vector<1x4x16xf32>
    %508 = vector.shape_cast %507 : vector<1x4x16xf32> to vector<1x1x4x16xf32>
    %c0_377 = arith.constant 0 : index
    %c5_378 = arith.constant 5 : index
    %c8_379 = arith.constant 8 : index
    %c0_380 = arith.constant 0 : index
    %509 = vector.load %arg25[%c0_377, %c5_378, %c8_379, %c0_380] : memref<1x8x20x16xf32, #tpu.memory_space<vmem>>, vector<1x1x4x16xf32>
    tpu.vector_store %arg25[%c0_377, %c5_378, %c8_379, %c0_380], %508 {strides = array<i32>} : memref<1x8x20x16xf32, #tpu.memory_space<vmem>>, vector<1x1x4x16xf32>,
    %510 = vector.extract_strided_slice %486 {offsets = [0, 0, 96], sizes = [1, 4, 16], strides = [1, 1, 1]} : vector<1x4x128xf32> to vector<1x4x16xf32>
    %511 = vector.shape_cast %510 : vector<1x4x16xf32> to vector<1x1x4x16xf32>
    %c0_381 = arith.constant 0 : index
    %c6_382 = arith.constant 6 : index
    %c8_383 = arith.constant 8 : index
    %c0_384 = arith.constant 0 : index
    %512 = vector.load %arg25[%c0_381, %c6_382, %c8_383, %c0_384] : memref<1x8x20x16xf32, #tpu.memory_space<vmem>>, vector<1x1x4x16xf32>
    tpu.vector_store %arg25[%c0_381, %c6_382, %c8_383, %c0_384], %511 {strides = array<i32>} : memref<1x8x20x16xf32, #tpu.memory_space<vmem>>, vector<1x1x4x16xf32>,
    %513 = vector.extract_strided_slice %486 {offsets = [0, 0, 112], sizes = [1, 4, 16], strides = [1, 1, 1]} : vector<1x4x128xf32> to vector<1x4x16xf32>
    %514 = vector.shape_cast %513 : vector<1x4x16xf32> to vector<1x1x4x16xf32>
    %c0_385 = arith.constant 0 : index
    %c7_386 = arith.constant 7 : index
    %c8_387 = arith.constant 8 : index
    %c0_388 = arith.constant 0 : index
    %515 = vector.load %arg25[%c0_385, %c7_386, %c8_387, %c0_388] : memref<1x8x20x16xf32, #tpu.memory_space<vmem>>, vector<1x1x4x16xf32>
    tpu.vector_store %arg25[%c0_385, %c7_386, %c8_387, %c0_388], %514 {strides = array<i32>} : memref<1x8x20x16xf32, #tpu.memory_space<vmem>>, vector<1x1x4x16xf32>,
    %c0_389 = arith.constant 0 : index
    %c0_390 = arith.constant 0 : index
    %c4_391 = arith.constant 4 : index
    %c0_392 = arith.constant 0 : index
    %516 = vector.load %arg25[%c0_389, %c0_390, %c4_391, %c0_392] : memref<1x8x20x16xf32, #tpu.memory_space<vmem>>, vector<1x8x4x16xf32>
    %517 = vector.shape_cast %516 : vector<1x8x4x16xf32> to vector<32x16xf32>
    %518 = arith.truncf %517 : vector<32x16xf32> to vector<32x16xbf16>
    %519 = vector.extract_strided_slice %487 {offsets = [0, 0, 0], sizes = [1, 16, 16], strides = [1, 1, 1]} : vector<9x16x16xbf16> to vector<1x16x16xbf16>
    %520 = vector.shape_cast %519 : vector<1x16x16xbf16> to vector<16x16xbf16>
    %cst_393 = arith.constant dense<0.000000e+00> : vector<32x16xf32>
    %521 = tpu.matmul %518, %520, %cst_393 {dimension_numbers = #tpu.dot_dimension_numbers<[1], [0], [0], [1], [0, 0, 1, 1], [], []>} : vector<32x16xbf16>, vector<16x16xbf16>, vector<32x16xf32> -> vector<32x16xf32>
    %522 = arith.addf %488, %521 : vector<32x16xf32>
    %c0_394 = arith.constant 0 : index
    %c0_395 = arith.constant 0 : index
    %c5_396 = arith.constant 5 : index
    %c0_397 = arith.constant 0 : index
    %523 = vector.load %arg25[%c0_394, %c0_395, %c5_396, %c0_397] : memref<1x8x20x16xf32, #tpu.memory_space<vmem>>, vector<1x8x4x16xf32>
    %524 = vector.shape_cast %523 : vector<1x8x4x16xf32> to vector<32x16xf32>
    %525 = arith.truncf %524 : vector<32x16xf32> to vector<32x16xbf16>
    %526 = vector.extract_strided_slice %487 {offsets = [1, 0, 0], sizes = [1, 16, 16], strides = [1, 1, 1]} : vector<9x16x16xbf16> to vector<1x16x16xbf16>
    %527 = vector.shape_cast %526 : vector<1x16x16xbf16> to vector<16x16xbf16>
    %cst_398 = arith.constant dense<0.000000e+00> : vector<32x16xf32>
    %528 = tpu.matmul %525, %527, %cst_398 {dimension_numbers = #tpu.dot_dimension_numbers<[1], [0], [0], [1], [0, 0, 1, 1], [], []>} : vector<32x16xbf16>, vector<16x16xbf16>, vector<32x16xf32> -> vector<32x16xf32>
    %529 = arith.addf %522, %528 : vector<32x16xf32>
    %c0_399 = arith.constant 0 : index
    %c0_400 = arith.constant 0 : index
    %c6_401 = arith.constant 6 : index
    %c0_402 = arith.constant 0 : index
    %530 = vector.load %arg25[%c0_399, %c0_400, %c6_401, %c0_402] : memref<1x8x20x16xf32, #tpu.memory_space<vmem>>, vector<1x8x4x16xf32>
    %531 = vector.shape_cast %530 : vector<1x8x4x16xf32> to vector<32x16xf32>
    %532 = arith.truncf %531 : vector<32x16xf32> to vector<32x16xbf16>
    %533 = vector.extract_strided_slice %487 {offsets = [2, 0, 0], sizes = [1, 16, 16], strides = [1, 1, 1]} : vector<9x16x16xbf16> to vector<1x16x16xbf16>
    %534 = vector.shape_cast %533 : vector<1x16x16xbf16> to vector<16x16xbf16>
    %cst_403 = arith.constant dense<0.000000e+00> : vector<32x16xf32>
    %535 = tpu.matmul %532, %534, %cst_403 {dimension_numbers = #tpu.dot_dimension_numbers<[1], [0], [0], [1], [0, 0, 1, 1], [], []>} : vector<32x16xbf16>, vector<16x16xbf16>, vector<32x16xf32> -> vector<32x16xf32>
    %536 = arith.addf %529, %535 : vector<32x16xf32>
    %c0_404 = arith.constant 0 : index
    %c0_405 = arith.constant 0 : index
    %c7_406 = arith.constant 7 : index
    %c0_407 = arith.constant 0 : index
    %537 = vector.load %arg25[%c0_404, %c0_405, %c7_406, %c0_407] : memref<1x8x20x16xf32, #tpu.memory_space<vmem>>, vector<1x8x4x16xf32>
    %538 = vector.shape_cast %537 : vector<1x8x4x16xf32> to vector<32x16xf32>
    %539 = arith.truncf %538 : vector<32x16xf32> to vector<32x16xbf16>
    %540 = vector.extract_strided_slice %487 {offsets = [3, 0, 0], sizes = [1, 16, 16], strides = [1, 1, 1]} : vector<9x16x16xbf16> to vector<1x16x16xbf16>
    %541 = vector.shape_cast %540 : vector<1x16x16xbf16> to vector<16x16xbf16>
    %cst_408 = arith.constant dense<0.000000e+00> : vector<32x16xf32>
    %542 = tpu.matmul %539, %541, %cst_408 {dimension_numbers = #tpu.dot_dimension_numbers<[1], [0], [0], [1], [0, 0, 1, 1], [], []>} : vector<32x16xbf16>, vector<16x16xbf16>, vector<32x16xf32> -> vector<32x16xf32>
    %543 = arith.addf %536, %542 : vector<32x16xf32>
    %c0_409 = arith.constant 0 : index
    %c0_410 = arith.constant 0 : index
    %c8_411 = arith.constant 8 : index
    %c0_412 = arith.constant 0 : index
    %544 = vector.load %arg25[%c0_409, %c0_410, %c8_411, %c0_412] : memref<1x8x20x16xf32, #tpu.memory_space<vmem>>, vector<1x8x4x16xf32>
    %545 = vector.shape_cast %544 : vector<1x8x4x16xf32> to vector<32x16xf32>
    %546 = arith.truncf %545 : vector<32x16xf32> to vector<32x16xbf16>
    %547 = vector.extract_strided_slice %487 {offsets = [4, 0, 0], sizes = [1, 16, 16], strides = [1, 1, 1]} : vector<9x16x16xbf16> to vector<1x16x16xbf16>
    %548 = vector.shape_cast %547 : vector<1x16x16xbf16> to vector<16x16xbf16>
    %cst_413 = arith.constant dense<0.000000e+00> : vector<32x16xf32>
    %549 = tpu.matmul %546, %548, %cst_413 {dimension_numbers = #tpu.dot_dimension_numbers<[1], [0], [0], [1], [0, 0, 1, 1], [], []>} : vector<32x16xbf16>, vector<16x16xbf16>, vector<32x16xf32> -> vector<32x16xf32>
    %550 = arith.addf %543, %549 : vector<32x16xf32>
    %c0_414 = arith.constant 0 : index
    %c0_415 = arith.constant 0 : index
    %c9_416 = arith.constant 9 : index
    %c0_417 = arith.constant 0 : index
    %551 = vector.load %arg25[%c0_414, %c0_415, %c9_416, %c0_417] : memref<1x8x20x16xf32, #tpu.memory_space<vmem>>, vector<1x8x4x16xf32>
    %552 = vector.shape_cast %551 : vector<1x8x4x16xf32> to vector<32x16xf32>
    %553 = arith.truncf %552 : vector<32x16xf32> to vector<32x16xbf16>
    %554 = vector.extract_strided_slice %487 {offsets = [5, 0, 0], sizes = [1, 16, 16], strides = [1, 1, 1]} : vector<9x16x16xbf16> to vector<1x16x16xbf16>
    %555 = vector.shape_cast %554 : vector<1x16x16xbf16> to vector<16x16xbf16>
    %cst_418 = arith.constant dense<0.000000e+00> : vector<32x16xf32>
    %556 = tpu.matmul %553, %555, %cst_418 {dimension_numbers = #tpu.dot_dimension_numbers<[1], [0], [0], [1], [0, 0, 1, 1], [], []>} : vector<32x16xbf16>, vector<16x16xbf16>, vector<32x16xf32> -> vector<32x16xf32>
    %557 = arith.addf %550, %556 : vector<32x16xf32>
    %c0_419 = arith.constant 0 : index
    %c0_420 = arith.constant 0 : index
    %c10_421 = arith.constant 10 : index
    %c0_422 = arith.constant 0 : index
    %558 = vector.load %arg25[%c0_419, %c0_420, %c10_421, %c0_422] : memref<1x8x20x16xf32, #tpu.memory_space<vmem>>, vector<1x8x4x16xf32>
    %559 = vector.shape_cast %558 : vector<1x8x4x16xf32> to vector<32x16xf32>
    %560 = arith.truncf %559 : vector<32x16xf32> to vector<32x16xbf16>
    %561 = vector.extract_strided_slice %487 {offsets = [6, 0, 0], sizes = [1, 16, 16], strides = [1, 1, 1]} : vector<9x16x16xbf16> to vector<1x16x16xbf16>
    %562 = vector.shape_cast %561 : vector<1x16x16xbf16> to vector<16x16xbf16>
    %cst_423 = arith.constant dense<0.000000e+00> : vector<32x16xf32>
    %563 = tpu.matmul %560, %562, %cst_423 {dimension_numbers = #tpu.dot_dimension_numbers<[1], [0], [0], [1], [0, 0, 1, 1], [], []>} : vector<32x16xbf16>, vector<16x16xbf16>, vector<32x16xf32> -> vector<32x16xf32>
    %564 = arith.addf %557, %563 : vector<32x16xf32>
    %c0_424 = arith.constant 0 : index
    %c0_425 = arith.constant 0 : index
    %c11_426 = arith.constant 11 : index
    %c0_427 = arith.constant 0 : index
    %565 = vector.load %arg25[%c0_424, %c0_425, %c11_426, %c0_427] : memref<1x8x20x16xf32, #tpu.memory_space<vmem>>, vector<1x8x4x16xf32>
    %566 = vector.shape_cast %565 : vector<1x8x4x16xf32> to vector<32x16xf32>
    %567 = arith.truncf %566 : vector<32x16xf32> to vector<32x16xbf16>
    %568 = vector.extract_strided_slice %487 {offsets = [7, 0, 0], sizes = [1, 16, 16], strides = [1, 1, 1]} : vector<9x16x16xbf16> to vector<1x16x16xbf16>
    %569 = vector.shape_cast %568 : vector<1x16x16xbf16> to vector<16x16xbf16>
    %cst_428 = arith.constant dense<0.000000e+00> : vector<32x16xf32>
    %570 = tpu.matmul %567, %569, %cst_428 {dimension_numbers = #tpu.dot_dimension_numbers<[1], [0], [0], [1], [0, 0, 1, 1], [], []>} : vector<32x16xbf16>, vector<16x16xbf16>, vector<32x16xf32> -> vector<32x16xf32>
    %571 = arith.addf %564, %570 : vector<32x16xf32>
    %c0_429 = arith.constant 0 : index
    %c0_430 = arith.constant 0 : index
    %c12_431 = arith.constant 12 : index
    %c0_432 = arith.constant 0 : index
    %572 = vector.load %arg25[%c0_429, %c0_430, %c12_431, %c0_432] : memref<1x8x20x16xf32, #tpu.memory_space<vmem>>, vector<1x8x4x16xf32>
    %573 = vector.shape_cast %572 : vector<1x8x4x16xf32> to vector<32x16xf32>
    %574 = arith.truncf %573 : vector<32x16xf32> to vector<32x16xbf16>
    %575 = vector.extract_strided_slice %487 {offsets = [8, 0, 0], sizes = [1, 16, 16], strides = [1, 1, 1]} : vector<9x16x16xbf16> to vector<1x16x16xbf16>
    %576 = vector.shape_cast %575 : vector<1x16x16xbf16> to vector<16x16xbf16>
    %cst_433 = arith.constant dense<0.000000e+00> : vector<32x16xf32>
    %577 = tpu.matmul %574, %576, %cst_433 {dimension_numbers = #tpu.dot_dimension_numbers<[1], [0], [0], [1], [0, 0, 1, 1], [], []>} : vector<32x16xbf16>, vector<16x16xbf16>, vector<32x16xf32> -> vector<32x16xf32>
    %578 = arith.addf %571, %577 : vector<32x16xf32>
    %c0_434 = arith.constant 0 : index
    %c0_435 = arith.constant 0 : index
    %579 = vector.load %arg19[%c0_434, %c0_435] : memref<1x16xf32, #tpu.memory_space<vmem>>, vector<1x16xf32>
    %580 = vector.broadcast %579 : vector<1x16xf32> to vector<32x16xf32>
    %581 = arith.addf %578, %580 : vector<32x16xf32>
    %582 = vector.shape_cast %581 : vector<32x16xf32> to vector<1x8x4x16xf32>
    %583 = vector.extract_strided_slice %582 {offsets = [0, 0, 0, 0], sizes = [1, 1, 4, 16], strides = [1, 1, 1, 1]} : vector<1x8x4x16xf32> to vector<1x1x4x16xf32>
    %584 = vector.shape_cast %583 : vector<1x1x4x16xf32> to vector<1x4x16xf32>
    %585 = vector.shape_cast %584 : vector<1x4x16xf32> to vector<4x16xf32>
    %586 = vector.extract_strided_slice %582 {offsets = [0, 1, 0, 0], sizes = [1, 1, 4, 16], strides = [1, 1, 1, 1]} : vector<1x8x4x16xf32> to vector<1x1x4x16xf32>
    %587 = vector.shape_cast %586 : vector<1x1x4x16xf32> to vector<1x4x16xf32>
    %588 = vector.shape_cast %587 : vector<1x4x16xf32> to vector<4x16xf32>
    %589 = vector.extract_strided_slice %582 {offsets = [0, 2, 0, 0], sizes = [1, 1, 4, 16], strides = [1, 1, 1, 1]} : vector<1x8x4x16xf32> to vector<1x1x4x16xf32>
    %590 = vector.shape_cast %589 : vector<1x1x4x16xf32> to vector<1x4x16xf32>
    %591 = vector.shape_cast %590 : vector<1x4x16xf32> to vector<4x16xf32>
    %592 = vector.extract_strided_slice %582 {offsets = [0, 3, 0, 0], sizes = [1, 1, 4, 16], strides = [1, 1, 1, 1]} : vector<1x8x4x16xf32> to vector<1x1x4x16xf32>
    %593 = vector.shape_cast %592 : vector<1x1x4x16xf32> to vector<1x4x16xf32>
    %594 = vector.shape_cast %593 : vector<1x4x16xf32> to vector<4x16xf32>
    %595 = vector.extract_strided_slice %582 {offsets = [0, 4, 0, 0], sizes = [1, 1, 4, 16], strides = [1, 1, 1, 1]} : vector<1x8x4x16xf32> to vector<1x1x4x16xf32>
    %596 = vector.shape_cast %595 : vector<1x1x4x16xf32> to vector<1x4x16xf32>
    %597 = vector.shape_cast %596 : vector<1x4x16xf32> to vector<4x16xf32>
    %598 = vector.extract_strided_slice %582 {offsets = [0, 5, 0, 0], sizes = [1, 1, 4, 16], strides = [1, 1, 1, 1]} : vector<1x8x4x16xf32> to vector<1x1x4x16xf32>
    %599 = vector.shape_cast %598 : vector<1x1x4x16xf32> to vector<1x4x16xf32>
    %600 = vector.shape_cast %599 : vector<1x4x16xf32> to vector<4x16xf32>
    %601 = vector.extract_strided_slice %582 {offsets = [0, 6, 0, 0], sizes = [1, 1, 4, 16], strides = [1, 1, 1, 1]} : vector<1x8x4x16xf32> to vector<1x1x4x16xf32>
    %602 = vector.shape_cast %601 : vector<1x1x4x16xf32> to vector<1x4x16xf32>
    %603 = vector.shape_cast %602 : vector<1x4x16xf32> to vector<4x16xf32>
    %604 = vector.extract_strided_slice %582 {offsets = [0, 7, 0, 0], sizes = [1, 1, 4, 16], strides = [1, 1, 1, 1]} : vector<1x8x4x16xf32> to vector<1x1x4x16xf32>
    %605 = vector.shape_cast %604 : vector<1x1x4x16xf32> to vector<1x4x16xf32>
    %606 = vector.shape_cast %605 : vector<1x4x16xf32> to vector<4x16xf32>
    %607 = tpu.concatenate %585, %588, %591, %594, %597, %600, %603, %606 in 1 : vector<4x16xf32>, vector<4x16xf32>, vector<4x16xf32>, vector<4x16xf32>, vector<4x16xf32>, vector<4x16xf32>, vector<4x16xf32>, vector<4x16xf32> -> vector<4x128xf32>
    %608 = arith.addf %607, %477 : vector<4x128xf32>
    %cst_436 = arith.constant 0.000000e+00 : f32
    %609 = vector.broadcast %cst_436 : f32 to vector<4x128xf32>
    %610 = arith.maximumf %608, %609 : vector<4x128xf32>
    %611 = vector.shape_cast %610 : vector<4x128xf32> to vector<1x4x128xf32>
    %c0_437 = arith.constant 0 : index
    %c0_438 = arith.constant 0 : index
    %c0_439 = arith.constant 0 : index
    %612 = vector.load %arg20[%c0_437, %c0_438, %c0_439] : memref<1x4x128xf32, #tpu.memory_space<vmem>>, vector<1x4x128xf32>
    tpu.vector_store %arg20[%c0_437, %c0_438, %c0_439], %611 {strides = array<i32>} : memref<1x4x128xf32, #tpu.memory_space<vmem>>, vector<1x4x128xf32>,
    return
  }
  func.func @transform_0(%arg0: i32) -> (i32, i32, i32) {
    %c0_i32 = arith.constant 0 : i32
    %c0_i32_0 = arith.constant 0 : i32
    %c0_i32_1 = arith.constant 0 : i32
    return %arg0, %c0_i32, %c0_i32_0 : i32, i32, i32
  }
  func.func @transform_1(%arg0: i32) -> (i32, i32) {
    %c0_i32 = arith.constant 0 : i32
    %c0_i32_0 = arith.constant 0 : i32
    %c0_i32_1 = arith.constant 0 : i32
    return %c0_i32, %c0_i32_0 : i32, i32
  }
  func.func @transform_2(%arg0: i32) -> (i32, i32) {
    %c0_i32 = arith.constant 0 : i32
    %c0_i32_0 = arith.constant 0 : i32
    %c0_i32_1 = arith.constant 0 : i32
    return %c0_i32, %c0_i32_0 : i32, i32
  }
  func.func @transform_3(%arg0: i32) -> (i32, i32, i32) {
    %c0_i32 = arith.constant 0 : i32
    %c0_i32_0 = arith.constant 0 : i32
    %c0_i32_1 = arith.constant 0 : i32
    %c0_i32_2 = arith.constant 0 : i32
    return %c0_i32, %c0_i32_0, %c0_i32_1 : i32, i32, i32
  }
  func.func @transform_4(%arg0: i32) -> (i32, i32) {
    %c0_i32 = arith.constant 0 : i32
    %c0_i32_0 = arith.constant 0 : i32
    %c0_i32_1 = arith.constant 0 : i32
    return %c0_i32, %c0_i32_0 : i32, i32
  }
  func.func @transform_5(%arg0: i32) -> (i32, i32) {
    %c0_i32 = arith.constant 0 : i32
    %c0_i32_0 = arith.constant 0 : i32
    %c0_i32_1 = arith.constant 0 : i32
    return %c0_i32, %c0_i32_0 : i32, i32
  }
  func.func @transform_6(%arg0: i32) -> (i32, i32) {
    %c0_i32 = arith.constant 0 : i32
    %c0_i32_0 = arith.constant 0 : i32
    %c0_i32_1 = arith.constant 0 : i32
    return %c0_i32, %c0_i32_0 : i32, i32
  }
  func.func @transform_7(%arg0: i32) -> (i32, i32, i32) {
    %c0_i32 = arith.constant 0 : i32
    %c0_i32_0 = arith.constant 0 : i32
    %c0_i32_1 = arith.constant 0 : i32
    %c0_i32_2 = arith.constant 0 : i32
    return %c0_i32, %c0_i32_0, %c0_i32_1 : i32, i32, i32
  }
  func.func @transform_8(%arg0: i32) -> (i32, i32) {
    %c0_i32 = arith.constant 0 : i32
    %c0_i32_0 = arith.constant 0 : i32
    %c0_i32_1 = arith.constant 0 : i32
    return %c0_i32, %c0_i32_0 : i32, i32
  }
  func.func @transform_9(%arg0: i32) -> (i32, i32) {
    %c0_i32 = arith.constant 0 : i32
    %c0_i32_0 = arith.constant 0 : i32
    %c0_i32_1 = arith.constant 0 : i32
    return %c0_i32, %c0_i32_0 : i32, i32
  }
  func.func @transform_10(%arg0: i32) -> (i32, i32) {
    %c0_i32 = arith.constant 0 : i32
    %c0_i32_0 = arith.constant 0 : i32
    %c0_i32_1 = arith.constant 0 : i32
    return %c0_i32, %c0_i32_0 : i32, i32
  }
  func.func @transform_11(%arg0: i32) -> (i32, i32, i32) {
    %c0_i32 = arith.constant 0 : i32
    %c0_i32_0 = arith.constant 0 : i32
    %c0_i32_1 = arith.constant 0 : i32
    %c0_i32_2 = arith.constant 0 : i32
    return %c0_i32, %c0_i32_0, %c0_i32_1 : i32, i32, i32
  }
  func.func @transform_12(%arg0: i32) -> (i32, i32) {
    %c0_i32 = arith.constant 0 : i32
    %c0_i32_0 = arith.constant 0 : i32
    %c0_i32_1 = arith.constant 0 : i32
    return %c0_i32, %c0_i32_0 : i32, i32
  }
  func.func @transform_13(%arg0: i32) -> (i32, i32) {
    %c0_i32 = arith.constant 0 : i32
    %c0_i32_0 = arith.constant 0 : i32
    %c0_i32_1 = arith.constant 0 : i32
    return %c0_i32, %c0_i32_0 : i32, i32
  }
  func.func @transform_14(%arg0: i32) -> (i32, i32) {
    %c0_i32 = arith.constant 0 : i32
    %c0_i32_0 = arith.constant 0 : i32
    %c0_i32_1 = arith.constant 0 : i32
    return %c0_i32, %c0_i32_0 : i32, i32
  }
  func.func @transform_15(%arg0: i32) -> (i32, i32) {
    %c0_i32 = arith.constant 0 : i32
    %c0_i32_0 = arith.constant 0 : i32
    %c0_i32_1 = arith.constant 0 : i32
    return %c0_i32, %c0_i32_0 : i32, i32
  }
  func.func @transform_16(%arg0: i32) -> (i32, i32) {
    %c0_i32 = arith.constant 0 : i32
    %c0_i32_0 = arith.constant 0 : i32
    %c0_i32_1 = arith.constant 0 : i32
    return %c0_i32, %c0_i32_0 : i32, i32
  }
  func.func @transform_17(%arg0: i32) -> (i32, i32, i32) {
    %c0_i32 = arith.constant 0 : i32
    %c0_i32_0 = arith.constant 0 : i32
    %c0_i32_1 = arith.constant 0 : i32
    %c0_i32_2 = arith.constant 0 : i32
    return %c0_i32, %c0_i32_0, %c0_i32_1 : i32, i32, i32
  }
  func.func @transform_18(%arg0: i32) -> (i32, i32) {
    %c0_i32 = arith.constant 0 : i32
    %c0_i32_0 = arith.constant 0 : i32
    %c0_i32_1 = arith.constant 0 : i32
    return %c0_i32, %c0_i32_0 : i32, i32
  }
  func.func @transform_19(%arg0: i32) -> (i32, i32, i32) {
    %c0_i32 = arith.constant 0 : i32
    %c0_i32_0 = arith.constant 0 : i32
    %c0_i32_1 = arith.constant 0 : i32
    return %arg0, %c0_i32, %c0_i32_0 : i32, i32, i32
  }
}

</mosaic_0001>

<bundles_post_ra>
// kernel: stgkn_forward.1
= control target key start
LH: loop header
LB: loop body
LE: loop exit
PB: predicated region body
PF: predicated region fallthrough
CT: control target
= control target key end

     0   :  { %s7451_s0 = inlined_call_operand.vmem [shape: f32[4,8,24], index: 0, kind: input, shape index: {}]   ;;  %s7452_s1 = inlined_call_operand.vmem [shape: bf16[24,64], index: 1, kind: input, shape index: {}]   ;;  %s7453_s2 = inlined_call_operand.vmem [shape: f32[1,64], index: 2, kind: input, shape index: {}]   ;;  %s7454_s3 = inlined_call_operand.vmem [shape: bf16[9,8,8], index: 3, kind: input, shape index: {}]   ;;  %s7455_s4 = inlined_call_operand.vmem [shape: f32[1,8], index: 4, kind: input, shape index: {}]   ;;  %s7456_s5 = inlined_call_operand.vmem [shape: bf16[64,64], index: 5, kind: input, shape index: {}]   ;;  %s7457_s6 = inlined_call_operand.vmem [shape: f32[1,64], index: 6, kind: input, shape index: {}]   ;;  %s7458_s7 = inlined_call_operand.vmem [shape: bf16[9,8,8], index: 7, kind: input, shape index: {}]   ;;  %s7459_s8 = inlined_call_operand.vmem [shape: f32[1,8], index: 8, kind: input, shape index: {}]   ;;  %s7460_s9 = inlined_call_operand.vmem [shape: bf16[64,128], index: 9, kind: input, shape index: {}]   ;;  %s7461_s10 = inlined_call_operand.vmem [shape: f32[1,128], index: 10, kind: input, shape index: {}]   ;;  %s7462_s11 = inlined_call_operand.vmem [shape: bf16[9,16,16], index: 11, kind: input, shape index: {}]   ;;  %s7463_s12 = inlined_call_operand.vmem [shape: f32[1,16], index: 12, kind: input, shape index: {}]   ;;  %s7464_s13 = inlined_call_operand.vmem [shape: bf16[8,16], index: 13, kind: input, shape index: {}]   ;;  %s7465_s14 = inlined_call_operand.vmem [shape: f32[1,16], index: 14, kind: input, shape index: {}]   ;;  %s7466_s15 = inlined_call_operand.vmem [shape: bf16[128,128], index: 15, kind: input, shape index: {}]   ;;  %s7467_s16 = inlined_call_operand.vmem [shape: f32[1,128], index: 16, kind: input, shape index: {}]   ;;  %s7468_s17 = inlined_call_operand.vmem [shape: bf16[9,16,16], index: 17, kind: input, shape index: {}]   ;;  %s7469_s18 = inlined_call_operand.vmem [shape: f32[1,16], index: 18, kind: input, shape index: {}]   ;;  %s7470_s19 = inlined_call_operand.vmem [shape: f32[4,4,128], index: 19, kind: output, shape index: {}]  }
   0x1   :  { %7498 = sst [smem:[#allocation7_spill]] %s7451_s0  ;;  %s6644_s0 = smov 0  }
   0x2   :  { %7499 = sst [smem:[#allocation8_spill]] %s7452_s1 }
   0x3   :  { %7500 = sst [smem:[#allocation9_spill]] %s7453_s2 }
   0x4   :  { %7501 = sst [smem:[#allocation10_spill]] %s7454_s3 }
   0x5   :  { %7502 = sst [smem:[#allocation11_spill]] %s7455_s4 }
   0x6 LB: > { %s5431_s30 = sadd.s32 4294967295, %s6524_s0   ;;  %p5435_p0 = scmp.ge.s32.totalorder %s6524_s0, 1  ;;  %s6524_s0 = sphi %s6644_s0, %s29_s0  }
   0x7   : > { %p536_p1 = scmp.lt.s32.totalorder %s6524_s0, 5 }
   0x9   : > { %p537_p2 = pnand %p5435_p0, %p536_p1 }
   0xa   : > { %s7503_s1 = sld [smem:[#allocation8_spill]] (!%p537_p2)  ;;  %v6526_v1 = vmov (!%p537_p2), 0.0   ;;  %vm624_vm0 = vcmask (!%p537_p2), 1043456   ;;  %vm6527_vm1 = vmmov (!%p537_p2), 0   ;;  %p590_p3 = scmp.lt.s32.totalorder (!%p537_p2), %s5431_s30, 3  ;;  %vm620_vm2 = vcmask (!%p537_p2), 195584  }
   0xb   : > { %540 = sbr.rel (%p537_p2) target bundleno = 3274 (0xcca), region = 96  ;;  %5786 = vmatprep.subr.bf16.mxu0 (!%p537_p2), %v6526_v1  ;;  %5790 = vmatprep.mubr.msk.bf16.mxu0 (!%p537_p2), %vm6527_vm1, %v6526_v1  ;;  %s7504_s3 = sld [smem:[#allocation7_spill]] (!%p537_p2)  ;;  %vm678_vm3 = vcmask (!%p537_p2), 64512   ;;  %vm1660_vm4 = vcmask (!%p537_p2), 130048   ;;  %vm1663_vm5 = vcmask (!%p537_p2), 261120   ;;  %vm1665_vm6 = vcmask (!%p537_p2), 326656  }
   0xc   : > { %679 = vst.msk [vmem:[#allocation2] sm:$0xff] (!%p537_p2), %vm678_vm3, %v6526_v1  ;;  %680 = vst.msk [vmem:[#allocation2 + $0x18] sm:$0xff] (!%p537_p2), %vm678_vm3, %v6526_v1  ;;  %s7505_s29 = sld [smem:[#allocation9_spill]] (!%p537_p2)  ;;  %s7506_s22 = sld [smem:[#allocation10_spill]] (!%p537_p2)  ;;  %vm1667_vm7 = vcmask (!%p537_p2), 392192   ;;  %vm1669_vm8 = vcmask (!%p537_p2), 457728  }
   0xd   : > { %681 = vst.msk [vmem:[#allocation2 + $0x30] sm:$0xff] (!%p537_p2), %vm678_vm3, %v6526_v1  ;;  %682 = vst.msk [vmem:[#allocation2 + $0x48] sm:$0xff] (!%p537_p2), %vm678_vm3, %v6526_v1  ;;  %s7496_s27 = smov (!%p537_p2), 96   ;;  %s7491_s28 = smov (!%p537_p2), 112   ;;  %vm1712_vm9 = vcmask (!%p537_p2), 523264   ;;  %vm2907_vm10 = vcmask (!%p537_p2), 1041409  }
   0xe   : > { %683 = vst.msk [vmem:[#allocation2 + $0x60] sm:$0xff] (!%p537_p2), %vm678_vm3, %v6526_v1  ;;  %684 = vst.msk [vmem:[#allocation2 + $0x78] sm:$0xff] (!%p537_p2), %vm678_vm3, %v6526_v1  ;;  %s7485_s20 = smov (!%p537_p2), 88   ;;  %s7476_s21 = smov (!%p537_p2), 72   ;;  %vm2909_vm11 = vcmask (!%p537_p2), 1042434   ;;  %vm2911_vm12 = vcmask (!%p537_p2), 1043459  }
   0xf   : > { %685 = vst.msk [vmem:[#allocation2 + $0x90] sm:$0xff] (!%p537_p2), %vm678_vm3, %v6526_v1  ;;  %686 = vst.msk [vmem:[#allocation2 + $0xa8] sm:$0xff] (!%p537_p2), %vm678_vm3, %v6526_v1  ;;  %s7507_s4 = sld [smem:[#allocation11_spill]] (!%p537_p2)  ;;  %s7473_s2 = smov (!%p537_p2), 16   ;;  %vm2914_vm13 = vcmask (!%p537_p2), 125952   ;;  %vm2985_vm14 = vcmask (!%p537_p2), 1044484  }
  0x10   : > { %v6410_v0 = vld [vmem:[%s7503_s1] sm:$0xff] (!%p537_p2)   ;;  %v6411_v2 = vld [vmem:[%s7503_s1 + $0x8] ss:$0 sps:$4 sm:$0xff] (!%p537_p2)   ;;  %687 = vst.msk [vmem:[#allocation2 + $0x10] sm:$0xff] (!%p537_p2), %vm678_vm3, %v6526_v1  ;;  %688 = vst.msk [vmem:[#allocation2 + $0x28] sm:$0xff] (!%p537_p2), %vm678_vm3, %v6526_v1  ;;  %s7479_s24 = smov (!%p537_p2), 48  }
  0x11   : > { %5787 = vmatpush3.bf16.msra.mxu0 (!%p537_p2), %v6410_v0  ;;  %v626_v3 = vsel (!%p537_p2), %vm624_vm0, %v6411_v2, 0  ;;  %689 = vst.msk [vmem:[#allocation2 + $0x40] sm:$0xff] (!%p537_p2), %vm678_vm3, %v6526_v1  ;;  %690 = vst.msk [vmem:[#allocation2 + $0x58] sm:$0xff] (!%p537_p2), %vm678_vm3, %v6526_v1  ;;  %s7478_s25 = smov (!%p537_p2), 56   ;;  %vm2988_vm15 = vcmask (!%p537_p2), 126977  }
  0x12   : > { %5788 = vmatprep.subr.bf16.mxu0 %v6526_v1  ;;  %s7524_s30 = smov (!%p590_p3, %s5431_s30), 3  ;;  %691 = vst.msk [vmem:[#allocation2 + $0x70] sm:$0xff] %vm678_vm3, %v6526_v1  ;;  %692 = vst.msk [vmem:[#allocation2 + $0x88] sm:$0xff] %vm678_vm3, %v6526_v1  ;;  %v5438_v6 = vld [vmem:[%s7505_s29] ss:$0 sm:$0xff]  ;;  %s7489_s29 = smov 80  }
  0x13   : > { %s5436_s23 = sshll.u32 %s7524_s30, 3  ;;  %693 = vst.msk [vmem:[#allocation2 + $0xa0] sm:$0xff] %vm678_vm3, %v6526_v1  ;;  %694 = vst.msk [vmem:[#allocation2 + $0xb8] sm:$0xff] %vm678_vm3, %v6526_v1  ;;  %v669_v8 = vld [vmem:[%s7506_s22] sm:$0xf] }
  0x14   : > { %s593_s26 = scalar_lea.vmem %s7504_s3, %s5436_s23  ;;  %1766 = vst.msk [vmem:[#allocation3] sm:$0xff] %vm678_vm3, %v6526_v1  ;;  %1767 = vst.msk [vmem:[#allocation3 + $0x18] sm:$0xff] %vm678_vm3, %v6526_v1  ;;  %v670_v9 = vld [vmem:[%s7506_s22 + $0x4] sm:$0xf]  ;;  %6367 = vmatprep.subr.msk.bf16.mxu1 %vm624_vm0, %v669_v8  ;;  %v849_v13 = vsel %vm624_vm0, %v669_v8, 0  ;;  %s7487_s3 = smov 104  }
  0x15   : > { %5789 = vmatpush3.bf16.msra.mxu0 %v626_v3  ;;  %v599_v4 = vld [vmem:[%s593_s26] sm:$0xff]  ;;  %1768 = vst.msk [vmem:[#allocation3 + $0x30] sm:$0xff] %vm678_vm3, %v6526_v1  ;;  %1769 = vst.msk [vmem:[#allocation3 + $0x48] sm:$0xff] %vm678_vm3, %v6526_v1  ;;  %v769_v14 = vsel %vm624_vm0, %v670_v9, 0  ;;  %5805 = vmatpush3.bf16.msra.mxu1 %v849_v13  ;;  %v671_v17 = vld [vmem:[%s7506_s22 + $0x8] sm:$0xf] }
  0x16   : > { %v600_v5 = vpack.c.bf16 %v599_v4, %v599_v4  ;;  %1770 = vst.msk [vmem:[#allocation3 + $0x60] sm:$0xff] %vm678_vm3, %v6526_v1  ;;  %1771 = vst.msk [vmem:[#allocation3 + $0x78] sm:$0xff] %vm678_vm3, %v6526_v1  ;;  %6366 = vmatprep.subr.msk.bf16.mxu0 %vm624_vm0, %v670_v9  ;;  %s7488_s26 = smov 120   ;;  %6368 = vmatprep.subr.msk.bf16.mxu1 %vm624_vm0, %v671_v17  ;;  %v941_v37 = vsel %vm624_vm0, %v671_v17, 0  ;;  %v672_v38 = vld [vmem:[%s7506_s22 + $0xc] sm:$0xf] }
  0x17   : > { %1772 = vst.msk [vmem:[#allocation3 + $0x90] sm:$0xff] %vm678_vm3, %v6526_v1  ;;  %1773 = vst.msk [vmem:[#allocation3 + $0xa8] sm:$0xff] %vm678_vm3, %v6526_v1  ;;  %v1041_v58 = vsel %vm624_vm0, %v672_v38, 0  ;;  %v673_v61 = vld [vmem:[%s7506_s22 + $0x10] sm:$0xf]  ;;  %s7475_s23 = smov 24  }
  0x18   : > { %5791 = vmatmul.mubr.msk.bf16.vlgmr.msra.gmra.mrb[0].mxu0 %vm620_vm2, %v600_v5  ;;  %1774 = vst.msk [vmem:[#allocation3 + $0x10] sm:$0xff] %vm678_vm3, %v6526_v1  ;;  %1775 = vst.msk [vmem:[#allocation3 + $0x28] sm:$0xff] %vm678_vm3, %v6526_v1  ;;  %v1141_v9 = vsel %vm624_vm0, %v673_v61, 0 }
  0x19   : > { %1776 = vst.msk [vmem:[#allocation3 + $0x40] sm:$0xff] %vm678_vm3, %v6526_v1  ;;  %1777 = vst.msk [vmem:[#allocation3 + $0x58] sm:$0xff] %vm678_vm3, %v6526_v1  ;;  %5795 = vmatpush3.bf16.msra.mxu0 %v769_v14 }
  0x1a   : > { %1778 = vst.msk [vmem:[#allocation3 + $0x70] sm:$0xff] %vm678_vm3, %v6526_v1  ;;  %1779 = vst.msk [vmem:[#allocation3 + $0x88] sm:$0xff] %vm678_vm3, %v6526_v1  ;;  %5884 = vmatprep.subr.bf16.mxu0 %v6526_v1 }
  0x1b   : > { %1780 = vst.msk [vmem:[#allocation3 + $0xa0] sm:$0xff] %vm678_vm3, %v6526_v1  ;;  %1781 = vst.msk [vmem:[#allocation3 + $0xb8] sm:$0xff] %vm678_vm3, %v6526_v1 }
  0x1c   : > { %2875 = vst.msk [vmem:[#allocation4] sm:$0xff] %vm1660_vm4, %v6526_v1  ;;  %2876 = vst.msk [vmem:[#allocation4 + $0x18] sm:$0xff] %vm1660_vm4, %v6526_v1 }
  0x1d   : > { %2877 = vst.msk [vmem:[#allocation4 + $0x30] sm:$0xff] %vm1660_vm4, %v6526_v1  ;;  %2878 = vst.msk [vmem:[#allocation4 + $0x48] sm:$0xff] %vm1660_vm4, %v6526_v1 }
  0x1e   : > { %2879 = vst.msk [vmem:[#allocation4 + $0x60] sm:$0xff] %vm1660_vm4, %v6526_v1  ;;  %2880 = vst.msk [vmem:[#allocation4 + $0x78] sm:$0xff] %vm1660_vm4, %v6526_v1 }
  0x1f   : > { %2881 = vst.msk [vmem:[#allocation4 + $0x90] sm:$0xff] %vm1660_vm4, %v6526_v1  ;;  %2882 = vst.msk [vmem:[#allocation4 + $0xa8] sm:$0xff] %vm1660_vm4, %v6526_v1 }
  0x20   : > { %2883 = vst.msk [vmem:[#allocation4 + $0xc] sm:$0xff] %vm1660_vm4, %v6526_v1  ;;  %2884 = vst.msk [vmem:[#allocation4 + $0x24] sm:$0xff] %vm1660_vm4, %v6526_v1 }
  0x21   : > { %2885 = vst.msk [vmem:[#allocation4 + $0x3c] sm:$0xff] %vm1660_vm4, %v6526_v1  ;;  %2886 = vst.msk [vmem:[#allocation4 + $0x54] sm:$0xff] %vm1660_vm4, %v6526_v1 }
  0x22   : > { %2887 = vst.msk [vmem:[#allocation4 + $0x6c] sm:$0xff] %vm1660_vm4, %v6526_v1  ;;  %2888 = vst.msk [vmem:[#allocation4 + $0x84] sm:$0xff] %vm1660_vm4, %v6526_v1 }
  0x23   : > { %2889 = vst.msk [vmem:[#allocation4 + $0x9c] sm:$0xff] %vm1660_vm4, %v6526_v1  ;;  %2890 = vst.msk [vmem:[#allocation4 + $0xb4] sm:$0xff] %vm1660_vm4, %v6526_v1 }
  0x24   : > { %2951 = vst.msk [vmem:[#allocation5] sm:$0xff] %vm1660_vm4, %v6526_v1  ;;  %2952 = vst.msk [vmem:[#allocation5 + $0x18] sm:$0xff] %vm1660_vm4, %v6526_v1 }
  0x25   : > { %2953 = vst.msk [vmem:[#allocation5 + $0x30] sm:$0xff] %vm1660_vm4, %v6526_v1  ;;  %2954 = vst.msk [vmem:[#allocation5 + $0x48] sm:$0xff] %vm1660_vm4, %v6526_v1 }
  0x26   : > { %2955 = vst.msk [vmem:[#allocation5 + $0x60] sm:$0xff] %vm1660_vm4, %v6526_v1  ;;  %2956 = vst.msk [vmem:[#allocation5 + $0x78] sm:$0xff] %vm1660_vm4, %v6526_v1 }
  0x27   : > { %2957 = vst.msk [vmem:[#allocation5 + $0x90] sm:$0xff] %vm1660_vm4, %v6526_v1  ;;  %2958 = vst.msk [vmem:[#allocation5 + $0xa8] sm:$0xff] %vm1660_vm4, %v6526_v1 }
  0x28   : > { %2959 = vst.msk [vmem:[#allocation5 + $0xc] sm:$0xff] %vm1660_vm4, %v6526_v1  ;;  %2960 = vst.msk [vmem:[#allocation5 + $0x24] sm:$0xff] %vm1660_vm4, %v6526_v1 }
  0x29   : > { %2961 = vst.msk [vmem:[#allocation5 + $0x3c] sm:$0xff] %vm1660_vm4, %v6526_v1  ;;  %2962 = vst.msk [vmem:[#allocation5 + $0x54] sm:$0xff] %vm1660_vm4, %v6526_v1 }
  0x2a   : > { %2963 = vst.msk [vmem:[#allocation5 + $0x6c] sm:$0xff] %vm1660_vm4, %v6526_v1  ;;  %2964 = vst.msk [vmem:[#allocation5 + $0x84] sm:$0xff] %vm1660_vm4, %v6526_v1 }
  0x2b   : > { %2965 = vst.msk [vmem:[#allocation5 + $0x9c] sm:$0xff] %vm1660_vm4, %v6526_v1  ;;  %2966 = vst.msk [vmem:[#allocation5 + $0xb4] sm:$0xff] %vm1660_vm4, %v6526_v1 }
  0x2c   : > { %4464 = vst.msk [vmem:[#allocation6] sm:$0xff] %vm1660_vm4, %v6526_v1  ;;  %4465 = vst.msk [vmem:[#allocation6 + $0x18] sm:$0xff] %vm1660_vm4, %v6526_v1 }
  0x2d   : > { %4466 = vst.msk [vmem:[#allocation6 + $0x30] sm:$0xff] %vm1660_vm4, %v6526_v1  ;;  %4467 = vst.msk [vmem:[#allocation6 + $0x48] sm:$0xff] %vm1660_vm4, %v6526_v1 }
  0x2e   : > { %4468 = vst.msk [vmem:[#allocation6 + $0x60] sm:$0xff] %vm1660_vm4, %v6526_v1  ;;  %4469 = vst.msk [vmem:[#allocation6 + $0x78] sm:$0xff] %vm1660_vm4, %v6526_v1 }
  0x2f   : > { %4470 = vst.msk [vmem:[#allocation6 + $0x90] sm:$0xff] %vm1660_vm4, %v6526_v1  ;;  %4471 = vst.msk [vmem:[#allocation6 + $0xa8] sm:$0xff] %vm1660_vm4, %v6526_v1 }
  0x30   : > { %4472 = vst.msk [vmem:[#allocation6 + $0xc] sm:$0xff] %vm1660_vm4, %v6526_v1  ;;  %4473 = vst.msk [vmem:[#allocation6 + $0x24] sm:$0xff] %vm1660_vm4, %v6526_v1 }
  0x31   : > { %4474 = vst.msk [vmem:[#allocation6 + $0x3c] sm:$0xff] %vm1660_vm4, %v6526_v1  ;;  %4475 = vst.msk [vmem:[#allocation6 + $0x54] sm:$0xff] %vm1660_vm4, %v6526_v1 }
  0x32   : > { %4476 = vst.msk [vmem:[#allocation6 + $0x6c] sm:$0xff] %vm1660_vm4, %v6526_v1  ;;  %4477 = vst.msk [vmem:[#allocation6 + $0x84] sm:$0xff] %vm1660_vm4, %v6526_v1 }
  0x33   : > { %4478 = vst.msk [vmem:[#allocation6 + $0x9c] sm:$0xff] %vm1660_vm4, %v6526_v1  ;;  %4479 = vst.msk [vmem:[#allocation6 + $0xb4] sm:$0xff] %vm1660_vm4, %v6526_v1 }
  0xeb   : > { %v662_v7 = vpop.f32.mrb[0].mxu0 }
  0xec   : > { %v663_v10 = vadd.f32 %v5438_v6, %v662_v7  ;;  %v5792_v11 = vpop.f32.mrb[1].mxu0 }
  0xed   : > { %v665_v12 = vpop.f32.mrb[2].mxu0 }
  0xee   : > { %v668_v15 = vmax.f32 %v663_v10, 0.0  ;;  %v5793_v16 = vpop.f32.mrb[3].mxu0  ;;  %v674_v12 = vld [vmem:[%s7506_s22 + $0x14] sm:$0xf] }
  0xf0   : > { %695 = vst.msk [vmem:[#allocation2 + $0x8] sm:$0xff] %vm678_vm3, %v668_v15  ;;  %707 = vrot.lane.b32.xlu1 %v668_v15, %s7487_s3  ;;  %697 = vrot.lane.b32.xlu0 %v668_v15, %s7488_s26 }
  0xf4   : > { %712 = vrot.lane.b32.xlu1 %v668_v15, %s7496_s27  ;;  %702 = vrot.lane.b32.xlu0 %v668_v15, %s7491_s28 }
  0xf7   : > { %v744_v22 = vld [vmem:[#allocation2 + $0x5] sm:$0xff] }
  0xf8   : > { %722 = vrot.lane.b32.xlu1 %v668_v15, %s7489_s29  ;;  %717 = vrot.lane.b32.xlu0 %v668_v15, %s7485_s20  ;;  %v732_v26 = vld [vmem:[#allocation2 + $0x4] sm:$0xff]  ;;  %s7513_s20 = smov 32  }
  0xf9   : > { %v916_v52 = vld [vmem:[#allocation2 + $0x6] sm:$0xff] }
  0xfa   : > { %v1016_v3 = vld [vmem:[#allocation2 + $0x7] sm:$0xff] }
  0xfb   : > { %v1116_v17 = vld [vmem:[#allocation2 + $0x8] sm:$0xff] }
  0xfc   : > { %727 = vrot.lane.b32.xlu0 %v668_v15, %s7476_s21  ;;  %s7481_s21 = smov 40  }
 0x162   : > { %v708_v18 = vpop.permute.xlu1 %707  ;;  %v698_v19 = vpop.permute.xlu0 %697 }
 0x163   : > { %711 = vst.msk [vmem:[#allocation2 + $0x50] sm:$0xff] %vm678_vm3, %v708_v18  ;;  %701 = vst.msk [vmem:[#allocation2 + $0x20] sm:$0xff] %vm678_vm3, %v698_v19 }
 0x166   : > { %v713_v20 = vpop.permute.xlu1 %712  ;;  %v703_v21 = vpop.permute.xlu0 %702 }
 0x167   : > { %716 = vst.msk [vmem:[#allocation2 + $0x68] sm:$0xff] %vm678_vm3, %v713_v20  ;;  %706 = vst.msk [vmem:[#allocation2 + $0x38] sm:$0xff] %vm678_vm3, %v703_v21 }
 0x16a   : > { %v723_v23 = vpop.permute.xlu1 %722  ;;  %v718_v24 = vpop.permute.xlu0 %717  ;;  %v745_v25 = vld [vmem:[#allocation2 + $0x1d] sm:$0xff]  ;;  %v747_v30 = vld [vmem:[#allocation2 + $0x4d] sm:$0xff] }
 0x16b   : > { %v733_v27 = vld [vmem:[#allocation2 + $0x1c] sm:$0xff]  ;;  %726 = vst.msk [vmem:[#allocation2 + $0x98] sm:$0xff] %vm678_vm3, %v723_v23  ;;  %721 = vst.msk [vmem:[#allocation2 + $0x80] sm:$0xff] %vm678_vm3, %v718_v24  ;;  %v752_v28 = vpack.c.bf16 %v745_v25, %v744_v22  ;;  %v735_v34 = vld [vmem:[#allocation2 + $0x4c] sm:$0xff]  ;;  %v1241_v23 = vsel %vm624_vm0, %v674_v12, 0 }
 0x16c   : > { %v740_v29 = vpack.c.bf16 %v733_v27, %v732_v26  ;;  %v917_v46 = vld [vmem:[#allocation2 + $0x1e] sm:$0xff]  ;;  %v919_v56 = vld [vmem:[#allocation2 + $0x4e] sm:$0xff]  ;;  %v675_v26 = vld [vmem:[%s7506_s22 + $0x18] sm:$0xf] }
 0x16d   : > { %5796 = vmatprep.mubr.msk.bf16.mxu0 %vm678_vm3, %v752_v28  ;;  %v924_v53 = vpack.c.bf16 %v917_v46, %v916_v52  ;;  %v1017_v63 = vld [vmem:[#allocation2 + $0x1f] sm:$0xff]  ;;  %v1019_v7 = vld [vmem:[#allocation2 + $0x4f] sm:$0xff] }
 0x16e   : > { %5806 = vmatprep.mubr.msk.bf16.mxu1 %vm678_vm3, %v740_v29  ;;  %v728_v31 = vpop.permute.xlu0 %727  ;;  %v746_v32 = vld [vmem:[#allocation2 + $0x35] sm:$0xff]  ;;  %v748_v39 = vld [vmem:[#allocation2 + $0x65] sm:$0xff]  ;;  %v1024_v4 = vpack.c.bf16 %v1017_v63, %v1016_v3 }
 0x16f   : > { %v734_v33 = vld [vmem:[#allocation2 + $0x34] sm:$0xff]  ;;  %731 = vst.msk [vmem:[#allocation2 + $0xb0] sm:$0xff] %vm678_vm3, %v728_v31  ;;  %v753_v35 = vpack.c.bf16 %v747_v30, %v746_v32  ;;  %v736_v41 = vld [vmem:[#allocation2 + $0x64] sm:$0xff] }
 0x170   : > { %v741_v36 = vpack.c.bf16 %v735_v34, %v734_v33  ;;  %v918_v54 = vld [vmem:[#allocation2 + $0x36] sm:$0xff]  ;;  %v920_v59 = vld [vmem:[#allocation2 + $0x66] sm:$0xff] }
 0x171   : > { %5797 = vmatmul.mubr.msk.bf16.vlgmr.msra.gmra.mrb[4].mxu0 %vm678_vm3, %v753_v35  ;;  %v925_v57 = vpack.c.bf16 %v919_v56, %v918_v54  ;;  %v1018_v5 = vld [vmem:[#allocation2 + $0x37] sm:$0xff]  ;;  %v1020_v10 = vld [vmem:[#allocation2 + $0x67] sm:$0xff]  ;;  %v677_v54 = vld [vmem:[%s7506_s22 + $0x20] sm:$0xf] }
 0x172   : > { %5807 = vmatmul.mubr.msk.bf16.vlgmr.msra.gmra.mrb[0].mxu1 %vm678_vm3, %v741_v36  ;;  %v749_v40 = vld [vmem:[#allocation2 + $0x7d] sm:$0xff]  ;;  %v750_v45 = vld [vmem:[#allocation2 + $0x95] sm:$0xff]  ;;  %v1025_v8 = vpack.c.bf16 %v1019_v7, %v1018_v5  ;;  %v1120_v24 = vld [vmem:[#allocation2 + $0x68] sm:$0xff] }
 0x173   : > { %5815 = vmatpush3.bf16.msra.mxu1 %v941_v37  ;;  %v737_v42 = vld [vmem:[#allocation2 + $0x7c] sm:$0xff]  ;;  %v754_v43 = vpack.c.bf16 %v749_v40, %v748_v39  ;;  %v738_v48 = vld [vmem:[#allocation2 + $0x94] sm:$0xff]  ;;  %v1216_v31 = vld [vmem:[#allocation2 + $0x9] sm:$0xff]  ;;  %v1341_v37 = vsel %vm624_vm0, %v675_v26, 0 }
 0x174   : > { %v742_v44 = vpack.c.bf16 %v737_v42, %v736_v41  ;;  %6369 = vmatprep.subr.msk.bf16.mxu1 %vm624_vm0, %v672_v38  ;;  %v921_v55 = vld [vmem:[#allocation2 + $0x7e] sm:$0xff]  ;;  %v922_v0 = vld [vmem:[#allocation2 + $0x96] sm:$0xff]  ;;  %v1220_v38 = vld [vmem:[#allocation2 + $0x69] sm:$0xff] }
 0x175   : > { %5800 = vmatprep.mubr.msk.bf16.mxu0 %vm678_vm3, %v754_v43  ;;  %v926_v60 = vpack.c.bf16 %v921_v55, %v920_v59  ;;  %v1021_v6 = vld [vmem:[#allocation2 + $0x7f] sm:$0xff]  ;;  %v1022_v15 = vld [vmem:[#allocation2 + $0x97] sm:$0xff]  ;;  %v1320_v52 = vld [vmem:[#allocation2 + $0x6a] sm:$0xff] }
 0x176   : > { %5810 = vmatprep.mubr.msk.bf16.mxu1 %vm678_vm3, %v742_v44  ;;  %v751_v47 = vld [vmem:[#allocation2 + $0xad] sm:$0xff]  ;;  %v1026_v11 = vpack.c.bf16 %v1021_v6, %v1020_v10  ;;  %v1117_v14 = vld [vmem:[#allocation2 + $0x20] sm:$0xff]  ;;  %v1118_v19 = vld [vmem:[#allocation2 + $0x38] sm:$0xff] }
 0x177   : > { %v739_v49 = vld [vmem:[#allocation2 + $0xac] sm:$0xff]  ;;  %v755_v50 = vpack.c.bf16 %v751_v47, %v750_v45  ;;  %v1124_v18 = vpack.c.bf16 %v1117_v14, %v1116_v17  ;;  %v1121_v20 = vld [vmem:[#allocation2 + $0x80] sm:$0xff]  ;;  %v1122_v29 = vld [vmem:[#allocation2 + $0x98] sm:$0xff] }
 0x178   : > { %v743_v51 = vpack.c.bf16 %v739_v49, %v738_v48  ;;  %v923_v62 = vld [vmem:[#allocation2 + $0xae] sm:$0xff]  ;;  %v1126_v25 = vpack.c.bf16 %v1121_v20, %v1120_v24  ;;  %v1217_v28 = vld [vmem:[#allocation2 + $0x21] sm:$0xff]  ;;  %v1218_v33 = vld [vmem:[#allocation2 + $0x39] sm:$0xff] }
 0x179   : > { %5801 = vmatmul.mubr.msk.bf16.gmra.mrb[8].mxu0 %vm678_vm3, %v755_v50  ;;  %v927_v2 = vpack.c.bf16 %v923_v62, %v922_v0  ;;  %v1023_v13 = vld [vmem:[#allocation2 + $0xaf] sm:$0xff]  ;;  %v1224_v32 = vpack.c.bf16 %v1217_v28, %v1216_v31  ;;  %v1221_v34 = vld [vmem:[#allocation2 + $0x81] sm:$0xff]  ;;  %v676_v40 = vld [vmem:[%s7506_s22 + $0x1c] sm:$0xf] }
 0x17a   : > { %5811 = vmatmul.mubr.msk.bf16.gmra.mrb[4].mxu1 %vm678_vm3, %v743_v51  ;;  %5892 = vmatprep.mubr.msk.bf16.mxu0 %vm6527_vm1, %v6526_v1  ;;  %v1027_v16 = vpack.c.bf16 %v1023_v13, %v1022_v15  ;;  %v1119_v21 = vld [vmem:[#allocation2 + $0x50] sm:$0xff]  ;;  %v1226_v39 = vpack.c.bf16 %v1221_v34, %v1220_v38  ;;  %v1317_v42 = vld [vmem:[#allocation2 + $0x22] sm:$0xff]  ;;  %v1222_v43 = vld [vmem:[#allocation2 + $0x99] sm:$0xff]  ;;  %v1441_v51 = vsel %vm624_vm0, %v676_v40, 0 }
 0x17b   : > { %5816 = vmatprep.mubr.msk.bf16.mxu1 %vm678_vm3, %v924_v53  ;;  %v1125_v22 = vpack.c.bf16 %v1119_v21, %v1118_v19  ;;  %v1123_v27 = vld [vmem:[#allocation2 + $0xb0] sm:$0xff]  ;;  %v1318_v47 = vld [vmem:[#allocation2 + $0x3a] sm:$0xff]  ;;  %v1321_v48 = vld [vmem:[#allocation2 + $0x82] sm:$0xff] }
 0x17c   : > { %v1127_v30 = vpack.c.bf16 %v1123_v27, %v1122_v29  ;;  %v1219_v35 = vld [vmem:[#allocation2 + $0x51] sm:$0xff]  ;;  %v1326_v53 = vpack.c.bf16 %v1321_v48, %v1320_v52  ;;  %v1417_v56 = vld [vmem:[#allocation2 + $0x23] sm:$0xff]  ;;  %v1422_v7 = vld [vmem:[#allocation2 + $0x9b] sm:$0xff] }
 0x17d   : > { %v1225_v36 = vpack.c.bf16 %v1219_v35, %v1218_v33  ;;  %v1223_v41 = vld [vmem:[#allocation2 + $0xb1] sm:$0xff]  ;;  %v1421_v62 = vld [vmem:[#allocation2 + $0x83] sm:$0xff]  ;;  %v5478_v31 = vld [vmem:[%s7507_s4] ss:$0 sm:$0xff] }
 0x17e   : > { %v1227_v44 = vpack.c.bf16 %v1223_v41, %v1222_v43  ;;  %v1316_v45 = vld [vmem:[#allocation2 + $0xa] sm:$0xff]  ;;  %v1319_v49 = vld [vmem:[#allocation2 + $0x52] sm:$0xff]  ;;  %v6412_v28 = vld [vmem:[%s7456_s5] sm:$0xff]  }
 0x17f   : > { %v1324_v46 = vpack.c.bf16 %v1317_v42, %v1316_v45  ;;  %v1325_v50 = vpack.c.bf16 %v1319_v49, %v1318_v47  ;;  %v1323_v55 = vld [vmem:[#allocation2 + $0xb2] sm:$0xff]  ;;  %v1517_v6 = vld [vmem:[#allocation2 + $0x24] sm:$0xff]  ;;  %5885 = vmatpush3.bf16.msra.mxu0 %v6412_v28 }
 0x180   : > { %v1416_v59 = vld [vmem:[#allocation2 + $0xb] sm:$0xff]  ;;  %v1419_v63 = vld [vmem:[#allocation2 + $0x53] sm:$0xff]  ;;  %5886 = vmatprep.subr.bf16.mxu0 %v6526_v1 }
 0x181   : > { %v1420_v3 = vld [vmem:[#allocation2 + $0x6b] sm:$0xff]  ;;  %v1423_v5 = vld [vmem:[#allocation2 + $0xb3] sm:$0xff] }
 0x182   : > { %5817 = vmatmul.mubr.msk.bf16.vlgmr.msra.gmra.mrb[0].mxu1 %vm678_vm3, %v925_v57  ;;  %v1322_v57 = vld [vmem:[#allocation2 + $0x9a] sm:$0xff]  ;;  %v1520_v15 = vld [vmem:[#allocation2 + $0x6c] sm:$0xff] }
 0x183   : > { %5825 = vmatpush3.bf16.msra.mxu1 %v1041_v58  ;;  %5820 = vmatprep.mubr.msk.bf16.mxu1 %vm678_vm3, %v926_v60  ;;  %v1327_v58 = vpack.c.bf16 %v1323_v55, %v1322_v57  ;;  %v1424_v60 = vpack.c.bf16 %v1417_v56, %v1416_v59  ;;  %v1519_v13 = vld [vmem:[#allocation2 + $0x54] sm:$0xff]  ;;  %v6413_v29 = vld [vmem:[%s7456_s5 + $0x8] sm:$0xff]  }
 0x184   : > { %6370 = vmatprep.subr.msk.bf16.mxu1 %vm624_vm0, %v673_v61  ;;  %v1418_v61 = vld [vmem:[#allocation2 + $0x3b] sm:$0xff]  ;;  %5887 = vmatpush3.bf16.msra.mxu0 %v6413_v29 }
 0x185   : > { %v1425_v0 = vpack.c.bf16 %v1419_v63, %v1418_v61  ;;  %v1523_v17 = vld [vmem:[#allocation2 + $0xb4] sm:$0xff]  ;;  %5888 = vmatprep.subr.bf16.mxu0 %v6526_v1 }
 0x186   : > { %v6415_v49 = vld [vmem:[%s7456_s5 + $0x18] sm:$0xff]  }
 0x18a   : > { %5821 = vmatmul.mubr.msk.bf16.gmra.mrb[4].mxu1 %vm678_vm3, %v927_v2  ;;  %v1541_v2 = vsel %vm624_vm0, %v677_v54, 0 }
 0x18b   : > { %5826 = vmatprep.mubr.msk.bf16.mxu1 %vm678_vm3, %v1024_v4  ;;  %v1426_v4 = vpack.c.bf16 %v1421_v62, %v1420_v3 }
 0x192   : > { %5827 = vmatmul.mubr.msk.bf16.vlgmr.msra.gmra.mrb[0].mxu1 %vm678_vm3, %v1025_v8  ;;  %v1427_v8 = vpack.c.bf16 %v1423_v5, %v1422_v7 }
 0x193   : > { %5835 = vmatpush3.bf16.msra.mxu1 %v1141_v9  ;;  %5830 = vmatprep.mubr.msk.bf16.mxu1 %vm678_vm3, %v1026_v11  ;;  %v1516_v9 = vld [vmem:[#allocation2 + $0xc] sm:$0xff]  ;;  %v1518_v11 = vld [vmem:[#allocation2 + $0x3c] sm:$0xff] }
 0x194   : > { %6371 = vmatprep.subr.msk.bf16.mxu1 %vm624_vm0, %v674_v12  ;;  %v1524_v10 = vpack.c.bf16 %v1517_v6, %v1516_v9  ;;  %v1521_v12 = vld [vmem:[#allocation2 + $0x84] sm:$0xff]  ;;  %v1525_v14 = vpack.c.bf16 %v1519_v13, %v1518_v11 }
 0x19a   : > { %5831 = vmatmul.mubr.msk.bf16.gmra.mrb[4].mxu1 %vm678_vm3, %v1027_v16  ;;  %v1526_v16 = vpack.c.bf16 %v1521_v12, %v1520_v15  ;;  %v5479_v12 = vld [vmem:[%s7457_s6] ss:$0 sm:$0xff] }
 0x19b   : > { %5836 = vmatprep.mubr.msk.bf16.mxu1 %vm678_vm3, %v1124_v18  ;;  %v1522_v18 = vld [vmem:[#allocation2 + $0x9c] sm:$0xff] }
 0x19c   : > { %v1527_v19 = vpack.c.bf16 %v1523_v17, %v1522_v18 }
 0x1a2   : > { %5837 = vmatmul.mubr.msk.bf16.vlgmr.msra.gmra.mrb[0].mxu1 %vm678_vm3, %v1125_v22 }
 0x1a3   : > { %5845 = vmatpush3.bf16.msra.mxu1 %v1241_v23  ;;  %5840 = vmatprep.mubr.msk.bf16.mxu1 %vm678_vm3, %v1126_v25 }
 0x1a4   : > { %6372 = vmatprep.subr.msk.bf16.mxu1 %vm624_vm0, %v675_v26 }
 0x1aa   : > { %5841 = vmatmul.mubr.msk.bf16.gmra.mrb[4].mxu1 %vm678_vm3, %v1127_v30 }
 0x1ab   : > { %5846 = vmatprep.mubr.msk.bf16.mxu1 %vm678_vm3, %v1224_v32 }
 0x1b2   : > { %5847 = vmatmul.mubr.msk.bf16.vlgmr.msra.gmra.mrb[0].mxu1 %vm678_vm3, %v1225_v36 }
 0x1b3   : > { %5855 = vmatpush3.bf16.msra.mxu1 %v1341_v37  ;;  %5850 = vmatprep.mubr.msk.bf16.mxu1 %vm678_vm3, %v1226_v39  ;;  %v6414_v39 = vld [vmem:[%s7456_s5 + $0x10] sm:$0xff]  }
 0x1b4   : > { %6373 = vmatprep.subr.msk.bf16.mxu1 %vm624_vm0, %v676_v40  ;;  %5889 = vmatpush3.bf16.msra.mxu0 %v6414_v39 }
 0x1b5   : > { %5890 = vmatprep.subr.bf16.mxu0 %v6526_v1 }
 0x1b8   : > { %5891 = vmatpush3.bf16.msra.mxu0 %v6415_v49 }
 0x1ba   : > { %5851 = vmatmul.mubr.msk.bf16.gmra.mrb[4].mxu1 %vm678_vm3, %v1227_v44 }
 0x1bb   : > { %5856 = vmatprep.mubr.msk.bf16.mxu1 %vm678_vm3, %v1324_v46 }
 0x1c2   : > { %5857 = vmatmul.mubr.msk.bf16.vlgmr.msra.gmra.mrb[0].mxu1 %vm678_vm3, %v1325_v50 }
 0x1c3   : > { %5865 = vmatpush3.bf16.msra.mxu1 %v1441_v51  ;;  %5860 = vmatprep.mubr.msk.bf16.mxu1 %vm678_vm3, %v1326_v53 }
 0x1c4   : > { %6374 = vmatprep.subr.msk.bf16.mxu1 %vm624_vm0, %v677_v54 }
 0x1ca   : > { %5861 = vmatmul.mubr.msk.bf16.gmra.mrb[4].mxu1 %vm678_vm3, %v1327_v58 }
 0x1cb   : > { %5866 = vmatprep.mubr.msk.bf16.mxu1 %vm678_vm3, %v1424_v60 }
 0x1d2   : > { %5867 = vmatmul.mubr.msk.bf16.vlgmr.msra.gmra.mrb[0].mxu1 %vm678_vm3, %v1425_v0 }
 0x1d3   : > { %5875 = vmatpush3.bf16.msra.mxu1 %v1541_v2  ;;  %5870 = vmatprep.mubr.msk.bf16.mxu1 %vm678_vm3, %v1426_v4 }
 0x1da   : > { %5871 = vmatmul.mubr.msk.bf16.gmra.mrb[4].mxu1 %vm678_vm3, %v1427_v8 }
 0x1db   : > { %5876 = vmatprep.mubr.msk.bf16.mxu1 %vm678_vm3, %v1524_v10  ;;  %v1758_v10 = vld [vmem:[%s7458_s7 + $0x4] sm:$0xf] }
 0x1dc   : > { %6375 = vmatprep.subr.msk.bf16.mxu0 %vm624_vm0, %v1758_v10  ;;  %v1856_v11 = vsel %vm624_vm0, %v1758_v10, 0 }
 0x1e2   : > { %5877 = vmatmul.mubr.msk.bf16.vlgmr.msra.gmra.mrb[0].mxu1 %vm678_vm3, %v1525_v14 }
 0x1e3   : > { %5880 = vmatprep.mubr.msk.bf16.mxu1 %vm678_vm3, %v1526_v16 }
 0x1ea   : > { %5881 = vmatmul.mubr.msk.bf16.gmra.mrb[4].mxu1 %vm678_vm3, %v1527_v19  ;;  %v1757_v19 = vld [vmem:[%s7458_s7] sm:$0xf] }
 0x244   : > { %v6836_v20 = vpop.f32.mrb[4].mxu0 }
 0x245   : > { %v6838_v21 = vpop.f32.mrb[5].mxu0 }
 0x246   : > { %v6840_v22 = vpop.f32.mrb[6].mxu0 }
 0x247   : > { %v6842_v23 = vpop.f32.mrb[7].mxu0 }
 0x24c   : > { %v6844_v24 = vpop.f32.mrb[8].mxu0 }
 0x24d   : > { %v6846_v25 = vpop.f32.mrb[9].mxu0 }
 0x24e   : > { %v6848_v26 = vpop.f32.mrb[10].mxu0 }
 0x24f   : > { %v6850_v27 = vpop.f32.mrb[11].mxu0 }
 0x2b5   : > { %v5878_v30 = vpop.f32.mrb[0].mxu1 }
 0x2b6   : > { %v6174_v32 = vadd.f32 %v5878_v30, %v6836_v20  ;;  %v1577_v33 = vpop.f32.mrb[1].mxu1 }
 0x2b7   : > { %v6175_v34 = vadd.f32 %v1577_v33, %v6838_v21  ;;  %v5879_v35 = vpop.f32.mrb[2].mxu1  ;;  %v1936_v33 = vsel %vm624_vm0, %v1757_v19, 0 }
 0x2b8   : > { %v1625_v36 = vadd.f32 %v6174_v32, %v5478_v31  ;;  %v6176_v37 = vadd.f32 %v5879_v35, %v6840_v22  ;;  %v1580_v38 = vpop.f32.mrb[3].mxu1 }
 0x2b9   : > { %v1623_v40 = vadd.f32 %v6175_v34, %v5478_v31  ;;  %v6177_v41 = vadd.f32 %v1580_v38, %v6842_v23  ;;  %v1759_v34 = vld [vmem:[%s7458_s7 + $0x8] sm:$0xf] }
 0x2ba   : > { %v1626_v42 = vadd.f32 %v6176_v37, %v5478_v31  ;;  %1636 = vrot.lane.b32.xlu0 %v1625_v36, %s7473_s2  ;;  %s7484_s2 = smov 8  }
 0x2bb   : > { %v1624_v44 = vadd.f32 %v6177_v41, %v5478_v31 }
 0x2bc   : > { %1640 = vrot.lane.b32.xlu1 %v1626_v42, %s7475_s23  ;;  %s7482_s23 = smov 32  }
 0x2bd   : > { %v5882_v43 = vpop.f32.mrb[4].mxu1 }
 0x2be   : > { %v6178_v45 = vadd.f32 %v5882_v43, %v6844_v24  ;;  %v1593_v46 = vpop.f32.mrb[5].mxu1 }
 0x2bf   : > { %v6179_v47 = vadd.f32 %v1593_v46, %v6846_v25  ;;  %v5883_v48 = vpop.f32.mrb[6].mxu1 }
 0x2c0   : > { %v6180_v50 = vadd.f32 %v5883_v48, %v6848_v26  ;;  %v1596_v51 = vpop.f32.mrb[7].mxu1  ;;  %1632 = vrot.lane.b32.xlu1 %v1624_v44, %s7484_s2  ;;  %v1629_v55 = vadd.f32 %v6178_v45, %v5478_v31  ;;  %v2028_v48 = vsel %vm624_vm0, %v1759_v34, 0  ;;  %s7514_s2 = smov 40  }
 0x2c1   : > { %v1627_v52 = vadd.f32 %v6179_v47, %v5478_v31  ;;  %v6181_v53 = vadd.f32 %v1596_v51, %v6850_v27  ;;  %v1760_v51 = vld [vmem:[%s7458_s7 + $0xc] sm:$0xf] }
 0x2c2   : > { %v1630_v56 = vadd.f32 %v6180_v50, %v5478_v31 }
 0x2c3   : > { %v1628_v54 = vadd.f32 %v6181_v53, %v5478_v31  ;;  %1644 = vrot.lane.b32.xlu0 %v1627_v52, %s7482_s23  ;;  %s7509_s23 = smov 72  }
 0x2c5   : > { %1648 = vrot.lane.b32.xlu1 %v1628_v54, %s7481_s21  ;;  %s7508_s21 = smov 88  }
 0x2c7   : > { %1652 = vrot.lane.b32.xlu0 %v1629_v55, %s7479_s24  ;;  %s7515_s24 = smov 48  }
 0x2c9   : > { %1656 = vrot.lane.b32.xlu1 %v1630_v56, %s7478_s25  ;;  %s7516_s25 = smov 56  }
 0x32c   : > { %v1637_v58 = vpop.permute.xlu0 %1636 }
 0x32e   : > { %v1641_v57 = vpop.permute.xlu1 %1640 }
 0x332   : > { %v1633_v59 = vpop.permute.xlu1 %1632 }
 0x333   : > { %v1659_v60 = vsel %vm678_vm3, %v1623_v40, %v1633_v59 }
 0x334   : > { %v1661_v61 = vsel %vm1660_vm4, %v1659_v60, %v1637_v58 }
 0x335   : > { %v1662_v62 = vsel %vm620_vm2, %v1661_v61, %v1641_v57  ;;  %v1645_v63 = vpop.permute.xlu0 %1644 }
 0x336   : > { %v1664_v0 = vsel %vm1663_vm5, %v1662_v62, %v1645_v63  ;;  %v2128_v62 = vsel %vm624_vm0, %v1760_v51, 0 }
 0x337   : > { %v1649_v2 = vpop.permute.xlu1 %1648 }
 0x338   : > { %v1666_v3 = vsel %vm1665_vm6, %v1664_v0, %v1649_v2  ;;  %v1761_v2 = vld [vmem:[%s7458_s7 + $0x10] sm:$0xf] }
 0x339   : > { %v1653_v4 = vpop.permute.xlu0 %1652 }
 0x33a   : > { %v1668_v5 = vsel %vm1667_vm7, %v1666_v3, %v1653_v4 }
 0x33b   : > { %v1657_v6 = vpop.permute.xlu1 %1656 }
 0x33c   : > { %v1670_v7 = vsel %vm1669_vm8, %v1668_v5, %v1657_v6 }
 0x33d   : > { %v6988_v8 = vmax.f32 %v1670_v7, 0.0 }
 0x33f   : > { %v1672_v9 = vpack.c.bf16 %v6988_v8, %v6988_v8 }
 0x341   : > { %5893 = vmatmul.mubr.msk.bf16.vlgmr.msra.gmra.mrb[12].mxu0 %vm1712_vm9, %v1672_v9 }
 0x342   : > { %5897 = vmatpush3.bf16.msra.mxu0 %v1856_v11 }
 0x343   : > { %6376 = vmatprep.subr.msk.bf16.mxu0 %vm624_vm0, %v1757_v19 }
 0x414   : > { %v1750_v13 = vpop.f32.mrb[12].mxu0 }
 0x415   : > { %v1751_v14 = vadd.f32 %v5479_v12, %v1750_v13  ;;  %v5894_v15 = vpop.f32.mrb[13].mxu0 }
 0x416   : > { %v1753_v16 = vpop.f32.mrb[14].mxu0 }
 0x417   : > { %v1756_v17 = vmax.f32 %v1751_v14, 0.0  ;;  %v5895_v18 = vpop.f32.mrb[15].mxu0  ;;  %v2228_v14 = vsel %vm624_vm0, %v1761_v2, 0 }
 0x419   : > { %1782 = vst.msk [vmem:[#allocation3 + $0x8] sm:$0xff] %vm678_vm3, %v1756_v17  ;;  %1789 = vrot.lane.b32.xlu1 %v1756_v17, %s7491_s28  ;;  %1784 = vrot.lane.b32.xlu0 %v1756_v17, %s7488_s26  ;;  %s7512_s26 = smov 8   ;;  %s7520_s28 = smov 104  }
 0x41d   : > { %1799 = vrot.lane.b32.xlu1 %v1756_v17, %s7496_s27  ;;  %1794 = vrot.lane.b32.xlu0 %v1756_v17, %s7487_s3  ;;  %s7511_s3 = smov 24  }
 0x420   : > { %v1831_v26 = vld [vmem:[#allocation3 + $0x5] sm:$0xff] }
 0x421   : > { %1809 = vrot.lane.b32.xlu1 %v1756_v17, %s7489_s29  ;;  %1804 = vrot.lane.b32.xlu0 %v1756_v17, %s7508_s21  ;;  %v1819_v42 = vld [vmem:[#allocation3 + $0x4] sm:$0xff]  ;;  %s7510_s29 = smov 16  }
 0x422   : > { %v2003_v56 = vld [vmem:[#allocation3 + $0x6] sm:$0xff] }
 0x423   : > { %v2103_v7 = vld [vmem:[#allocation3 + $0x7] sm:$0xff] }
 0x425   : > { %1814 = vrot.lane.b32.xlu0 %v1756_v17, %s7509_s23  ;;  %v1762_v17 = vld [vmem:[%s7458_s7 + $0x14] sm:$0xf] }
 0x48b   : > { %v1790_v20 = vpop.permute.xlu1 %1789  ;;  %v1785_v21 = vpop.permute.xlu0 %1784 }
 0x48c   : > { %1793 = vst.msk [vmem:[#allocation3 + $0x38] sm:$0xff] %vm678_vm3, %v1790_v20  ;;  %1788 = vst.msk [vmem:[#allocation3 + $0x20] sm:$0xff] %vm678_vm3, %v1785_v21 }
 0x48f   : > { %v1800_v22 = vpop.permute.xlu1 %1799  ;;  %v1795_v23 = vpop.permute.xlu0 %1794 }
 0x490   : > { %1803 = vst.msk [vmem:[#allocation3 + $0x68] sm:$0xff] %vm678_vm3, %v1800_v22  ;;  %1798 = vst.msk [vmem:[#allocation3 + $0x50] sm:$0xff] %vm678_vm3, %v1795_v23  ;;  %v2203_v22 = vld [vmem:[#allocation3 + $0x8] sm:$0xff] }
 0x493   : > { %v1810_v24 = vpop.permute.xlu1 %1809  ;;  %v1805_v25 = vpop.permute.xlu0 %1804  ;;  %v1832_v27 = vld [vmem:[#allocation3 + $0x1d] sm:$0xff]  ;;  %v1833_v30 = vld [vmem:[#allocation3 + $0x35] sm:$0xff] }
 0x494   : > { %1813 = vst.msk [vmem:[#allocation3 + $0x98] sm:$0xff] %vm678_vm3, %v1810_v24  ;;  %1808 = vst.msk [vmem:[#allocation3 + $0x80] sm:$0xff] %vm678_vm3, %v1805_v25  ;;  %v1839_v28 = vpack.c.bf16 %v1832_v27, %v1831_v26  ;;  %v1820_v38 = vld [vmem:[#allocation3 + $0x1c] sm:$0xff]  ;;  %v1821_v46 = vld [vmem:[#allocation3 + $0x34] sm:$0xff] }
 0x495   : > { %v1827_v43 = vpack.c.bf16 %v1820_v38, %v1819_v42  ;;  %v2004_v53 = vld [vmem:[#allocation3 + $0x1e] sm:$0xff]  ;;  %v2005_v60 = vld [vmem:[#allocation3 + $0x36] sm:$0xff] }
 0x496   : > { %5898 = vmatprep.mubr.msk.bf16.mxu0 %vm678_vm3, %v1839_v28  ;;  %v2011_v57 = vpack.c.bf16 %v2004_v53, %v2003_v56  ;;  %v2104_v4 = vld [vmem:[#allocation3 + $0x1f] sm:$0xff]  ;;  %v2105_v12 = vld [vmem:[#allocation3 + $0x37] sm:$0xff]  ;;  %v2328_v28 = vsel %vm624_vm0, %v1762_v17, 0 }
 0x497   : > { %v1815_v29 = vpop.permute.xlu0 %1814  ;;  %v1834_v31 = vld [vmem:[#allocation3 + $0x4d] sm:$0xff]  ;;  %v1835_v35 = vld [vmem:[#allocation3 + $0x65] sm:$0xff]  ;;  %v2111_v9 = vpack.c.bf16 %v2104_v4, %v2103_v7  ;;  %v2205_v26 = vld [vmem:[#allocation3 + $0x38] sm:$0xff] }
 0x498   : > { %1818 = vst.msk [vmem:[#allocation3 + $0xb0] sm:$0xff] %vm678_vm3, %v1815_v29  ;;  %v1840_v32 = vpack.c.bf16 %v1834_v31, %v1833_v30  ;;  %v1822_v44 = vld [vmem:[#allocation3 + $0x4c] sm:$0xff]  ;;  %v1823_v49 = vld [vmem:[#allocation3 + $0x64] sm:$0xff]  ;;  %v1763_v31 = vld [vmem:[%s7458_s7 + $0x18] sm:$0xf] }
 0x499   : > { %v1828_v47 = vpack.c.bf16 %v1822_v44, %v1821_v46  ;;  %v2006_v58 = vld [vmem:[#allocation3 + $0x4e] sm:$0xff]  ;;  %v2007_v63 = vld [vmem:[#allocation3 + $0x66] sm:$0xff]  ;;  %v2428_v42 = vsel %vm624_vm0, %v1763_v31, 0 }
 0x49a   : > { %5899 = vmatmul.mubr.msk.bf16.vlgmr.msra.gmra.mrb[16].mxu0 %vm678_vm3, %v1840_v32  ;;  %v2012_v61 = vpack.c.bf16 %v2006_v58, %v2005_v60  ;;  %v2106_v10 = vld [vmem:[#allocation3 + $0x4f] sm:$0xff]  ;;  %v2107_v15 = vld [vmem:[#allocation3 + $0x67] sm:$0xff] }
 0x49b   : > { %5907 = vmatpush3.bf16.msra.mxu0 %v1936_v33  ;;  %v1836_v36 = vld [vmem:[#allocation3 + $0x7d] sm:$0xff]  ;;  %v1837_v39 = vld [vmem:[#allocation3 + $0x95] sm:$0xff]  ;;  %v2112_v13 = vpack.c.bf16 %v2106_v10, %v2105_v12  ;;  %v2207_v29 = vld [vmem:[#allocation3 + $0x68] sm:$0xff] }
 0x49c   : > { %v1841_v37 = vpack.c.bf16 %v1836_v36, %v1835_v35  ;;  %6377 = vmatprep.subr.msk.bf16.mxu0 %vm624_vm0, %v1759_v34  ;;  %v1824_v45 = vld [vmem:[#allocation3 + $0x7c] sm:$0xff]  ;;  %v1825_v54 = vld [vmem:[#allocation3 + $0x94] sm:$0xff]  ;;  %v2303_v36 = vld [vmem:[#allocation3 + $0x9] sm:$0xff] }
 0x49d   : > { %v1829_v50 = vpack.c.bf16 %v1824_v45, %v1823_v49  ;;  %v2008_v59 = vld [vmem:[#allocation3 + $0x7e] sm:$0xff]  ;;  %v2009_v5 = vld [vmem:[#allocation3 + $0x96] sm:$0xff] }
 0x49e   : > { %5902 = vmatprep.mubr.msk.bf16.mxu0 %vm678_vm3, %v1841_v37  ;;  %v2013_v0 = vpack.c.bf16 %v2008_v59, %v2007_v63  ;;  %v2108_v11 = vld [vmem:[#allocation3 + $0x7f] sm:$0xff]  ;;  %v2109_v20 = vld [vmem:[#allocation3 + $0x97] sm:$0xff] }
 0x49f   : > { %v1838_v40 = vld [vmem:[#allocation3 + $0xad] sm:$0xff]  ;;  %v2113_v16 = vpack.c.bf16 %v2108_v11, %v2107_v15  ;;  %v2204_v19 = vld [vmem:[#allocation3 + $0x20] sm:$0xff]  ;;  %v2209_v34 = vld [vmem:[#allocation3 + $0x98] sm:$0xff] }
 0x4a0   : > { %v1842_v41 = vpack.c.bf16 %v1838_v40, %v1837_v39  ;;  %v1826_v52 = vld [vmem:[#allocation3 + $0xac] sm:$0xff]  ;;  %v2211_v23 = vpack.c.bf16 %v2204_v19, %v2203_v22  ;;  %v2208_v25 = vld [vmem:[#allocation3 + $0x80] sm:$0xff]  ;;  %v1764_v45 = vld [vmem:[%s7458_s7 + $0x1c] sm:$0xf] }
 0x4a1   : > { %v1830_v55 = vpack.c.bf16 %v1826_v52, %v1825_v54  ;;  %v2010_v3 = vld [vmem:[#allocation3 + $0xae] sm:$0xff]  ;;  %v2213_v30 = vpack.c.bf16 %v2208_v25, %v2207_v29  ;;  %v2304_v33 = vld [vmem:[#allocation3 + $0x21] sm:$0xff]  ;;  %v2305_v40 = vld [vmem:[#allocation3 + $0x39] sm:$0xff]  ;;  %v2528_v56 = vsel %vm624_vm0, %v1764_v45, 0 }
 0x4a2   : > { %5903 = vmatmul.mubr.msk.bf16.gmra.mrb[20].mxu0 %vm678_vm3, %v1842_v41  ;;  %v2014_v6 = vpack.c.bf16 %v2010_v3, %v2009_v5  ;;  %v2110_v18 = vld [vmem:[#allocation3 + $0xaf] sm:$0xff]  ;;  %v2311_v37 = vpack.c.bf16 %v2304_v33, %v2303_v36  ;;  %v2308_v39 = vld [vmem:[#allocation3 + $0x81] sm:$0xff] }
 0x4a3   : > { %5908 = vmatprep.mubr.msk.bf16.mxu0 %vm678_vm3, %v1827_v43  ;;  %v2114_v21 = vpack.c.bf16 %v2110_v18, %v2109_v20  ;;  %v2206_v24 = vld [vmem:[#allocation3 + $0x50] sm:$0xff]  ;;  %v2408_v53 = vld [vmem:[#allocation3 + $0x82] sm:$0xff]  ;;  %v2405_v54 = vld [vmem:[#allocation3 + $0x3a] sm:$0xff] }
 0x4a4   : > { %v2212_v27 = vpack.c.bf16 %v2206_v24, %v2205_v26  ;;  %v2210_v32 = vld [vmem:[#allocation3 + $0xb0] sm:$0xff]  ;;  %v1765_v59 = vld [vmem:[%s7458_s7 + $0x20] sm:$0xf]  ;;  %v2604_v12 = vld [vmem:[#allocation3 + $0x24] sm:$0xff] }
 0x4a5   : > { %v2214_v35 = vpack.c.bf16 %v2210_v32, %v2209_v34  ;;  %v2306_v38 = vld [vmem:[#allocation3 + $0x51] sm:$0xff]  ;;  %v2307_v43 = vld [vmem:[#allocation3 + $0x69] sm:$0xff]  ;;  %v2505_v5 = vld [vmem:[#allocation3 + $0x3b] sm:$0xff]  ;;  %v2628_v7 = vsel %vm624_vm0, %v1765_v59, 0 }
 0x4a6   : > { %v2312_v41 = vpack.c.bf16 %v2306_v38, %v2305_v40  ;;  %v2313_v44 = vpack.c.bf16 %v2308_v39, %v2307_v43  ;;  %v2310_v46 = vld [vmem:[#allocation3 + $0xb1] sm:$0xff]  ;;  %v2508_v4 = vld [vmem:[#allocation3 + $0x83] sm:$0xff] }
 0x4a7   : > { %v2406_v52 = vld [vmem:[#allocation3 + $0x52] sm:$0xff]  ;;  %v2608_v18 = vld [vmem:[#allocation3 + $0x84] sm:$0xff]  ;;  %v2605_v19 = vld [vmem:[#allocation3 + $0x3c] sm:$0xff] }
 0x4a8   : > { %v2410_v60 = vld [vmem:[#allocation3 + $0xb2] sm:$0xff]  ;;  %v2609_v24 = vld [vmem:[#allocation3 + $0x9c] sm:$0xff] }
 0x4a9   : > { %v2506_v3 = vld [vmem:[#allocation3 + $0x53] sm:$0xff]  ;;  %v6416_v26 = vld [vmem:[%s7460_s9] sm:$0xff]  }
 0x4aa   : > { %5909 = vmatmul.mubr.msk.bf16.vlgmr.msra.gmra.mrb[16].mxu0 %vm678_vm3, %v1828_v47  ;;  %v2404_v47 = vld [vmem:[#allocation3 + $0x22] sm:$0xff]  ;;  %v2510_v11 = vld [vmem:[#allocation3 + $0xb3] sm:$0xff] }
 0x4ab   : > { %5917 = vmatpush3.bf16.msra.mxu0 %v2028_v48  ;;  %5912 = vmatprep.mubr.msk.bf16.mxu0 %vm678_vm3, %v1829_v50  ;;  %v2309_v48 = vld [vmem:[#allocation3 + $0x99] sm:$0xff]  ;;  %v2403_v50 = vld [vmem:[#allocation3 + $0xa] sm:$0xff] }
 0x4ac   : > { %6378 = vmatprep.subr.msk.bf16.mxu0 %vm624_vm0, %v1760_v51  ;;  %v2314_v49 = vpack.c.bf16 %v2310_v46, %v2309_v48  ;;  %v2411_v51 = vpack.c.bf16 %v2404_v47, %v2403_v50  ;;  %v2603_v15 = vld [vmem:[#allocation3 + $0xc] sm:$0xff]  ;;  %v6419_v46 = vld [vmem:[%s7460_s9 + $0x18] sm:$0xff]  }
 0x4ad   : > { %v6418_v36 = vld [vmem:[%s7460_s9 + $0x10] sm:$0xff]  }
 0x4b2   : > { %5913 = vmatmul.mubr.msk.bf16.gmra.mrb[20].mxu0 %vm678_vm3, %v1830_v55  ;;  %v2412_v55 = vpack.c.bf16 %v2406_v52, %v2405_v54  ;;  %v6542_v54 = vmov 1983009808  }
 0x4b3   : > { %5918 = vmatprep.mubr.msk.bf16.mxu0 %vm678_vm3, %v2011_v57  ;;  %v2407_v57 = vld [vmem:[#allocation3 + $0x6a] sm:$0xff] }
 0x4b4   : > { %v2413_v58 = vpack.c.bf16 %v2408_v53, %v2407_v57 }
 0x4ba   : > { %5919 = vmatmul.mubr.msk.bf16.vlgmr.msra.gmra.mrb[16].mxu0 %vm678_vm3, %v2012_v61  ;;  %v2504_v61 = vld [vmem:[#allocation3 + $0x23] sm:$0xff] }
 0x4bb   : > { %5927 = vmatpush3.bf16.msra.mxu0 %v2128_v62  ;;  %5922 = vmatprep.mubr.msk.bf16.mxu0 %vm678_vm3, %v2013_v0  ;;  %v2409_v62 = vld [vmem:[#allocation3 + $0x9a] sm:$0xff]  ;;  %v2503_v0 = vld [vmem:[#allocation3 + $0xb] sm:$0xff] }
 0x4bc   : > { %6379 = vmatprep.subr.msk.bf16.mxu0 %vm624_vm0, %v1761_v2  ;;  %v2414_v63 = vpack.c.bf16 %v2410_v60, %v2409_v62  ;;  %v2511_v2 = vpack.c.bf16 %v2504_v61, %v2503_v0 }
 0x4c2   : > { %5923 = vmatmul.mubr.msk.bf16.gmra.mrb[20].mxu0 %vm678_vm3, %v2014_v6  ;;  %v2512_v6 = vpack.c.bf16 %v2506_v3, %v2505_v5  ;;  %v3908_v5 = vld [vmem:[%s7464_s13] sm:$0xf] }
 0x4c3   : > { %5928 = vmatprep.mubr.msk.bf16.mxu0 %vm678_vm3, %v2111_v9  ;;  %v2507_v9 = vld [vmem:[#allocation3 + $0x6b] sm:$0xff] }
 0x4c4   : > { %v2513_v10 = vpack.c.bf16 %v2508_v4, %v2507_v9 }
 0x4ca   : > { %5929 = vmatmul.mubr.msk.bf16.vlgmr.msra.gmra.mrb[16].mxu0 %vm678_vm3, %v2112_v13  ;;  %v2509_v13 = vld [vmem:[#allocation3 + $0x9b] sm:$0xff] }
 0x4cb   : > { %5937 = vmatpush3.bf16.msra.mxu0 %v2228_v14  ;;  %5932 = vmatprep.mubr.msk.bf16.mxu0 %vm678_vm3, %v2113_v16  ;;  %v2514_v14 = vpack.c.bf16 %v2510_v11, %v2509_v13  ;;  %v2611_v16 = vpack.c.bf16 %v2604_v12, %v2603_v15  ;;  %v7133_v11 = vsel %vm624_vm0, %v3908_v5, 0 }
 0x4cc   : > { %6380 = vmatprep.subr.msk.bf16.mxu0 %vm624_vm0, %v1762_v17  ;;  %v2606_v17 = vld [vmem:[#allocation3 + $0x54] sm:$0xff] }
 0x4cd   : > { %v2612_v20 = vpack.c.bf16 %v2606_v17, %v2605_v19 }
 0x4d2   : > { %5933 = vmatmul.mubr.msk.bf16.gmra.mrb[20].mxu0 %vm678_vm3, %v2114_v21  ;;  %v2607_v21 = vld [vmem:[#allocation3 + $0x6c] sm:$0xff] }
 0x4d3   : > { %5938 = vmatprep.mubr.msk.bf16.mxu0 %vm678_vm3, %v2211_v23  ;;  %v2613_v22 = vpack.c.bf16 %v2608_v18, %v2607_v21  ;;  %v2610_v23 = vld [vmem:[#allocation3 + $0xb4] sm:$0xff] }
 0x4d4   : > { %v2614_v25 = vpack.c.bf16 %v2610_v23, %v2609_v24 }
 0x4da   : > { %5939 = vmatmul.mubr.msk.bf16.vlgmr.msra.gmra.mrb[16].mxu0 %vm678_vm3, %v2212_v27  ;;  %v5521_v27 = vld [vmem:[%s7459_s8] ss:$0 sm:$0xff] }
 0x4db   : > { %5947 = vmatpush3.bf16.msra.mxu0 %v2328_v28  ;;  %5942 = vmatprep.mubr.msk.bf16.mxu0 %vm678_vm3, %v2213_v30  ;;  %v6417_v28 = vld [vmem:[%s7460_s9 + $0x8] sm:$0xff]  }
 0x4dc   : > { %6381 = vmatprep.subr.msk.bf16.mxu0 %vm624_vm0, %v1763_v31 }
 0x4e2   : > { %5943 = vmatmul.mubr.msk.bf16.gmra.mrb[20].mxu0 %vm678_vm3, %v2214_v35 }
 0x4e3   : > { %5948 = vmatprep.mubr.msk.bf16.mxu0 %vm678_vm3, %v2311_v37 }
 0x4ea   : > { %5949 = vmatmul.mubr.msk.bf16.vlgmr.msra.gmra.mrb[16].mxu0 %vm678_vm3, %v2312_v41 }
 0x4eb   : > { %5957 = vmatpush3.bf16.msra.mxu0 %v2428_v42  ;;  %5952 = vmatprep.mubr.msk.bf16.mxu0 %vm678_vm3, %v2313_v44 }
 0x4ec   : > { %6382 = vmatprep.subr.msk.bf16.mxu0 %vm624_vm0, %v1764_v45 }
 0x4f2   : > { %5953 = vmatmul.mubr.msk.bf16.gmra.mrb[20].mxu0 %vm678_vm3, %v2314_v49 }
 0x4f3   : > { %5958 = vmatprep.mubr.msk.bf16.mxu0 %vm678_vm3, %v2411_v51 }
 0x4fa   : > { %5959 = vmatmul.mubr.msk.bf16.vlgmr.msra.gmra.mrb[16].mxu0 %vm678_vm3, %v2412_v55  ;;  %v2860_v55 = vunpack.c.l.s4 %v6542_v54 }
 0x4fb   : > { %5967 = vmatpush3.bf16.msra.mxu0 %v2528_v56  ;;  %5962 = vmatprep.mubr.msk.bf16.mxu0 %vm678_vm3, %v2413_v58  ;;  %v2862_v56 = vlaneseq }
 0x4fc   : > { %6383 = vmatprep.subr.msk.bf16.mxu0 %vm624_vm0, %v1765_v59  ;;  %v2861_v61 = vunpack.c.0.s8 %v2860_v55  ;;  %vm3880_vm0 = vcmask 654336  }
 0x4fd   : > { %v2863_v62 = vshrl.u32 %v2862_v56, 7 }
 0x4ff   : > { %v2864_v3 = vsub.s32 %v2861_v61, %v2863_v62 }
 0x502   : > { %5963 = vmatmul.mubr.msk.bf16.gmra.mrb[20].mxu0 %vm678_vm3, %v2414_v63 }
 0x503   : > { %5968 = vmatprep.mubr.msk.bf16.mxu0 %vm678_vm3, %v2511_v2 }
 0x50a   : > { %5969 = vmatmul.mubr.msk.bf16.vlgmr.msra.gmra.mrb[16].mxu0 %vm678_vm3, %v2512_v6 }
 0x50b   : > { %5977 = vmatpush3.bf16.msra.mxu0 %v2628_v7  ;;  %5972 = vmatprep.mubr.msk.bf16.mxu0 %vm678_vm3, %v2513_v10 }
 0x50c   : > { %5986 = vmatprep.subr.bf16.mxu0 %v6526_v1 }
 0x512   : > { %5973 = vmatmul.mubr.msk.bf16.gmra.mrb[20].mxu0 %vm678_vm3, %v2514_v14 }
 0x513   : > { %5978 = vmatprep.mubr.msk.bf16.mxu0 %vm678_vm3, %v2611_v16 }
 0x51a   : > { %5979 = vmatmul.mubr.msk.bf16.vlgmr.msra.gmra.mrb[16].mxu0 %vm678_vm3, %v2612_v20 }
 0x51b   : > { %5982 = vmatprep.mubr.msk.bf16.mxu0 %vm678_vm3, %v2613_v22  ;;  %5987 = vmatpush3.bf16.msra.mxu0 %v6416_v26 }
 0x51c   : > { %5988 = vmatprep.subr.bf16.mxu0 %v6526_v1 }
 0x51f   : > { %5989 = vmatpush3.bf16.msra.mxu0 %v6417_v28 }
 0x520   : > { %5990 = vmatprep.subr.bf16.mxu0 %v6526_v1 }
 0x522   : > { %5983 = vmatmul.mubr.msk.bf16.gmra.mrb[20].mxu0 %vm678_vm3, %v2614_v25 }
 0x523   : > { %5994 = vmatprep.mubr.msk.bf16.mxu0 %vm6527_vm1, %v6526_v1  ;;  %5991 = vmatpush3.bf16.msra.mxu0 %v6418_v36  ;;  %v2893_v36 = vsub.s32 0, %v2863_v62 }
 0x524   : > { %5992 = vmatprep.subr.bf16.mxu0 %v6526_v1 }
 0x527   : > { %5993 = vmatpush3.bf16.msra.mxu0 %v6419_v46 }
 0x528   : > { %6052 = vmatprep.subr.bf16.mxu0 %v6526_v1 }
 0x5ed   : > { %v5980_v29 = vpop.f32.mrb[16].mxu0 }
 0x5ee   : > { %v2712_v30 = vadd.f32 %v5980_v29, %v5521_v27  ;;  %v2664_v31 = vpop.f32.mrb[17].mxu0  ;;  %v5522_v29 = vld [vmem:[%s7461_s10] ss:$0 sm:$0xff] }
 0x5ef   : > { %v2710_v32 = vadd.f32 %v5521_v27, %v2664_v31  ;;  %v5981_v33 = vpop.f32.mrb[18].mxu0 }
 0x5f0   : > { %v2713_v34 = vadd.f32 %v5981_v33, %v5521_v27  ;;  %2723 = vrot.lane.b32.xlu0 %v2712_v30, %s7510_s29  ;;  %v2667_v35 = vpop.f32.mrb[19].mxu0 }
 0x5f1   : > { %v2711_v37 = vadd.f32 %v5521_v27, %v2667_v35 }
 0x5f2   : > { %2727 = vrot.lane.b32.xlu1 %v2713_v34, %s7511_s3  ;;  %s7519_s3 = smov 120  }
 0x5f5   : > { %v5984_v38 = vpop.f32.mrb[20].mxu0 }
 0x5f6   : > { %2719 = vrot.lane.b32.xlu1 %v2711_v37, %s7512_s26  ;;  %v2680_v39 = vpop.f32.mrb[21].mxu0  ;;  %v2716_v44 = vadd.f32 %v5984_v38, %v5521_v27  ;;  %v2969_v37 = vsub.s32 1, %v2863_v62  ;;  %s7517_s26 = smov 112   ;;  %v6423_v62 = vld [vmem:[%s7462_s11] sm:$0xff]  }
 0x5f7   : > { %v2714_v40 = vadd.f32 %v5521_v27, %v2680_v39  ;;  %v5985_v41 = vpop.f32.mrb[22].mxu0 }
 0x5f8   : > { %v2683_v42 = vpop.f32.mrb[23].mxu0  ;;  %v2717_v45 = vadd.f32 %v5985_v41, %v5521_v27 }
 0x5f9   : > { %v2715_v43 = vadd.f32 %v5521_v27, %v2683_v42  ;;  %2731 = vrot.lane.b32.xlu0 %v2714_v40, %s7513_s20  ;;  %v6420_v40 = vld [vmem:[%s7462_s11 + $0x10] sm:$0xff]  }
 0x5fa   : > { %5998 = vmatprep.subr.bf16.mxu1 %v6420_v40 }
 0x5fb   : > { %2735 = vrot.lane.b32.xlu1 %v2715_v43, %s7514_s2  ;;  %5999 = vmatpush3.bf16.msra.mxu1 %v6420_v40  ;;  %s7493_s2 = smov 64   ;;  %v6438_v40 = vld [vmem:[%s7462_s11 + $0x40] sm:$0xff]  }
 0x5fc   : > { %6004 = vmatprep.subr.bf16.mxu1 %v6423_v62 }
 0x5fd   : > { %2739 = vrot.lane.b32.xlu0 %v2716_v44, %s7515_s24 }
 0x5ff   : > { %2743 = vrot.lane.b32.xlu1 %v2717_v45, %s7516_s25  ;;  %s7518_s25 = smov 80  }
 0x662   : > { %v2724_v48 = vpop.permute.xlu0 %2723 }
 0x664   : > { %v2728_v47 = vpop.permute.xlu1 %2727 }
 0x668   : > { %v2720_v49 = vpop.permute.xlu1 %2719 }
 0x669   : > { %v2746_v50 = vsel %vm678_vm3, %v2710_v32, %v2720_v49 }
 0x66a   : > { %v2747_v51 = vsel %vm1660_vm4, %v2746_v50, %v2724_v48 }
 0x66b   : > { %v2748_v52 = vsel %vm620_vm2, %v2747_v51, %v2728_v47  ;;  %v2732_v53 = vpop.permute.xlu0 %2731  ;;  %vm3884_vm2 = vcmask 916480  }
 0x66c   : > { %v2749_v57 = vsel %vm1663_vm5, %v2748_v52, %v2732_v53 }
 0x66d   : > { %v2736_v58 = vpop.permute.xlu1 %2735 }
 0x66e   : > { %v2750_v59 = vsel %vm1665_vm6, %v2749_v57, %v2736_v58 }
 0x66f   : > { %v2740_v60 = vpop.permute.xlu0 %2739 }
 0x670   : > { %v2751_v63 = vsel %vm1667_vm7, %v2750_v59, %v2740_v60 }
 0x671   : > { %v2744_v0 = vpop.permute.xlu1 %2743 }
 0x672   : > { %v2752_v2 = vsel %vm1669_vm8, %v2751_v63, %v2744_v0 }
 0x673   : > { %v2753_v4 = vadd.f32 %v2752_v2, %v6988_v8 }
 0x675   : > { %v2754_v6 = vmax.f32 %v2753_v4, 0.0 }
 0x677   : > { %v2755_v7 = vpack.c.bf16 %v2754_v6, %v2754_v6  ;;  %v3887_v9 = vcombine.high %v2754_v6, %v2754_v6  ;;  %v3894_v10 = vrot.slane %v2754_v6, %v2864_v3 }
 0x679   : > { %v3901_v12 = vrot.slane %v3887_v9, %v2864_v3  ;;  %v3902_v13 = vcombine.high %v3894_v10, %v3894_v10  ;;  %5995 = vmatmul.mubr.msk.bf16.vlgmr.msra.gmra.mrb[24].mxu0 %vm1712_vm9, %v2755_v7  ;;  %v3910_v14 = vpack.c.bf16 %v3894_v10, %v3894_v10 }
 0x67a   : > { %6053 = vmatpush3.bf16.msra.mxu0 %v7133_v11  ;;  %6054 = vmatprep.mubr.msk.bf16.mxu0 %vm6527_vm1, %v6526_v1 }
 0x67b   : > { %v3903_v8 = vcombine.high %v3901_v12, %v3901_v12  ;;  %v3911_v15 = vpack.c.bf16 %v3902_v13, %v3902_v13  ;;  %v3912_v16 = vpack.c.bf16 %v3901_v12, %v3901_v12  ;;  %6058 = vmatprep.subr.bf16.mxu0 %v6526_v1  ;;  %v3924_v20 = vunpack.c.l.b16 %v3910_v14 }
 0x67d   : > { %v3913_v17 = vpack.c.bf16 %v3903_v8, %v3903_v8  ;;  %v3925_v18 = vunpack.c.l.b16 %v3911_v15  ;;  %v3926_v19 = vunpack.c.l.b16 %v3912_v16 }
 0x67f   : > { %v3927_v21 = vunpack.c.l.b16 %v3913_v17  ;;  %v3928_v22 = vrot.slane %v3925_v18, 7  ;;  %v3930_v23 = vrot.slane %v3926_v19, 6 }
 0x681   : > { %v3929_v24 = vsel %vm2907_vm10, %v3928_v22, %v3924_v20  ;;  %v3932_v25 = vrot.slane %v3927_v21, 5  ;;  %v6428_v21 = vld [vmem:[%s7462_s11 + $0x20] sm:$0xff]  }
 0x682   : > { %v3931_v26 = vsel %vm2909_vm11, %v3930_v23, %v3929_v24 }
 0x683   : > { %v3933_v27 = vsel %vm2911_vm12, %v3932_v25, %v3931_v26 }
 0x684   : > { %v7143_v28 = vpack.c.b16 %v3933_v27, %v3933_v27 }
 0x686   : > { %6055 = vmatmul.mubr.msk.bf16.vlgmr.msra.gmra.mrb[28].mxu0 %vm678_vm3, %v7143_v28 }
 0x687   : > { %6059 = vmatpush3.bf16.msra.mxu0 %v7133_v11  ;;  %6060 = vmatprep.mubr.msk.bf16.mxu0 %vm6527_vm1, %v6526_v1 }
 0x688   : > { %6064 = vmatprep.subr.bf16.mxu0 %v6526_v1 }
 0x74c   : > { %v2832_v30 = vpop.f32.mrb[24].mxu0 }
 0x74d   : > { %v2833_v31 = vadd.f32 %v5522_v29, %v2832_v30  ;;  %v5996_v32 = vpop.f32.mrb[25].mxu0 }
 0x74e   : > { %v2835_v33 = vpop.f32.mrb[26].mxu0 }
 0x74f   : > { %v2838_v34 = vmax.f32 %v2833_v31, 0.0  ;;  %v5997_v35 = vpop.f32.mrb[27].mxu0  ;;  %v6433_v31 = vld [vmem:[%s7462_s11 + $0x30] sm:$0xff]  }
 0x751   : > { %v2858_v38 = vcombine.high %v2838_v34, %v2838_v34  ;;  %v2865_v39 = vrot.slane %v2838_v34, %v2864_v3 }
 0x753   : > { %v2872_v41 = vrot.slane %v2858_v38, %v2864_v3  ;;  %v2873_v42 = vcombine.high %v2865_v39, %v2865_v39  ;;  %v2894_v43 = vrot.slane %v2865_v39, %v2893_v36  ;;  %v2970_v44 = vrot.slane %v2865_v39, %v2969_v37 }
 0x755   : > { %v2874_v45 = vcombine.high %v2872_v41, %v2872_v41  ;;  %v2898_v46 = vrot.slane %v2873_v42, %v2893_v36  ;;  %v2902_v47 = vrot.slane %v2872_v41, %v2893_v36  ;;  %v2974_v48 = vrot.slane %v2873_v42, %v2969_v37 }
 0x756   : > { %v2978_v49 = vrot.slane %v2872_v41, %v2969_v37 }
 0x757   : > { %v2906_v50 = vrot.slane %v2874_v45, %v2893_v36  ;;  %v2908_v51 = vsel %vm2907_vm10, %v2898_v46, %v2894_v43  ;;  %v2982_v52 = vrot.slane %v2874_v45, %v2969_v37  ;;  %v2983_v53 = vsel %vm2909_vm11, %v2974_v48, %v2970_v44  ;;  %v6443_v48 = vld [vmem:[%s7462_s11 + $0x8] sm:$0xff]  }
 0x758   : > { %v2910_v54 = vsel %vm2909_vm11, %v2902_v47, %v2908_v51  ;;  %v2984_v55 = vsel %vm2911_vm12, %v2978_v49, %v2983_v53 }
 0x759   : > { %v7161_v56 = vpop.f32.mrb[28].mxu0  ;;  %v2912_v57 = vsel %vm2911_vm12, %v2906_v50, %v2910_v54  ;;  %v2986_v58 = vsel %vm2985_vm14, %v2982_v52, %v2984_v55 }
 0x75a   : > { %2921 = vrot.lane.b32.xlu1 %v2912_v57, %s7496_s27  ;;  %2915 = vst.msk [vmem:[#allocation4 + $0x8] sm:$0xf] %vm2914_vm13, %v2912_v57  ;;  %2916 = vrot.lane.b32.xlu0 %v2912_v57, %s7517_s26  ;;  %v6056_v59 = vpop.f32.mrb[29].mxu0 }
 0x75b   : > { %2989 = vst.msk [vmem:[#allocation5 + $0x7] sm:$0x1e] %vm2988_vm15, %v2986_v58  ;;  %v3978_v60 = vpop.f32.mrb[30].mxu0 }
 0x75c   : > { %v6057_v61 = vpop.f32.mrb[31].mxu0 }
 0x75e   : > { %2931 = vrot.lane.b32.xlu1 %v2912_v57, %s7493_s2  ;;  %2926 = vrot.lane.b32.xlu0 %v2912_v57, %s7518_s25 }
 0x762   : > { %2941 = vrot.lane.b32.xlu1 %v2912_v57, %s7513_s20  ;;  %2936 = vrot.lane.b32.xlu0 %v2912_v57, %s7515_s24 }
 0x766   : > { %2990 = vrot.lane.b32.xlu1 %v2986_v58, %s7517_s26  ;;  %2946 = vrot.lane.b32.xlu0 %v2912_v57, %s7510_s29 }
 0x76a   : > { %3000 = vrot.lane.b32.xlu1 %v2986_v58, %s7518_s25  ;;  %2995 = vrot.lane.b32.xlu0 %v2986_v58, %s7496_s27 }
 0x76e   : > { %3010 = vrot.lane.b32.xlu1 %v2986_v58, %s7515_s24  ;;  %3005 = vrot.lane.b32.xlu0 %v2986_v58, %s7493_s2 }
 0x772   : > { %3020 = vrot.lane.b32.xlu1 %v2986_v58, %s7510_s29  ;;  %3015 = vrot.lane.b32.xlu0 %v2986_v58, %s7513_s20  ;;  %v6448_v58 = vld [vmem:[%s7462_s11 + $0x18] sm:$0xff]  }
 0x776   : > { %4026 = vrot.lane.b32.xlu1 %v7143_v28, %s7517_s26  ;;  %3981 = vrot.lane.b32.xlu0 %v7143_v28, %s7519_s3  ;;  %s7521_s3 = smov 64  }
 0x77a   : > { %4116 = vrot.lane.b32.xlu1 %v7143_v28, %s7496_s27  ;;  %4071 = vrot.lane.b32.xlu0 %v7143_v28, %s7520_s28 }
 0x77e   : > { %4206 = vrot.lane.b32.xlu1 %v7143_v28, %s7518_s25  ;;  %4161 = vrot.lane.b32.xlu0 %v7143_v28, %s7508_s21 }
 0x782   : > { %4251 = vrot.lane.b32.xlu0 %v7143_v28, %s7509_s23 }
 0x7cc   : > { %v2922_v63 = vpop.permute.xlu1 %2921  ;;  %v2917_v0 = vpop.permute.xlu0 %2916 }
 0x7cd   : > { %2925 = vst.msk [vmem:[#allocation4 + $0x38] sm:$0xf] %vm2914_vm13, %v2922_v63  ;;  %2920 = vst.msk [vmem:[#allocation4 + $0x20] sm:$0xf] %vm2914_vm13, %v2917_v0 }
 0x7d0   : > { %v2932_v2 = vpop.permute.xlu1 %2931  ;;  %v2927_v3 = vpop.permute.xlu0 %2926 }
 0x7d1   : > { %2935 = vst.msk [vmem:[#allocation4 + $0x68] sm:$0xf] %vm2914_vm13, %v2932_v2  ;;  %2930 = vst.msk [vmem:[#allocation4 + $0x50] sm:$0xf] %vm2914_vm13, %v2927_v3  ;;  %v6453_v2 = vld [vmem:[%s7462_s11 + $0x28] sm:$0xff]  }
 0x7d4   : > { %v2942_v4 = vpop.permute.xlu1 %2941  ;;  %v2937_v5 = vpop.permute.xlu0 %2936  ;;  %v6421_v6 = vld [vmem:[#allocation4 + $0x7] ss:$24 sps:$4 sm:$0xff]  }
 0x7d5   : > { %2945 = vst.msk [vmem:[#allocation4 + $0x98] sm:$0xf] %vm2914_vm13, %v2942_v4  ;;  %2940 = vst.msk [vmem:[#allocation4 + $0x80] sm:$0xf] %vm2914_vm13, %v2937_v5  ;;  %v6426_v19 = vld [vmem:[#allocation4 + $0x6] ss:$24 sps:$4 sm:$0xff]  }
 0x7d6   : > { %v6431_v30 = vld [vmem:[#allocation4 + $0x8] ss:$24 sps:$4 sm:$0xff]  }
 0x7d7   : > { %v6436_v38 = vld [vmem:[#allocation4 + $0x9] ss:$24 sps:$4 sm:$0xff]  }
 0x7d8   : > { %v2991_v7 = vpop.permute.xlu1 %2990  ;;  %v2947_v9 = vpop.permute.xlu0 %2946  ;;  %v6422_v10 = vld [vmem:[#allocation4 + $0x37] ss:$24 sps:$4 sm:$0xff]   ;;  %v6441_v47 = vld [vmem:[#allocation4 + $0xa] ss:$24 sps:$4 sm:$0xff]  }
 0x7d9   : > { %2994 = vst.msk [vmem:[#allocation5 + $0x1f] sm:$0x1e] %vm2988_vm15, %v2991_v7  ;;  %v3075_v12 = vpack.c.bf16 %v6422_v10, %v6421_v6  ;;  %v6427_v14 = vld [vmem:[#allocation4 + $0x36] ss:$24 sps:$4 sm:$0xff]   ;;  %v6442_v45 = vld [vmem:[#allocation4 + $0x3a] ss:$24 sps:$4 sm:$0xff]  }
 0x7da   : > { %2950 = vst.msk [vmem:[#allocation4 + $0xb0] sm:$0xf] %vm2914_vm13, %v2947_v9  ;;  %v3049_v22 = vpack.c.bf16 %v6427_v14, %v6426_v19  ;;  %v6432_v27 = vld [vmem:[#allocation4 + $0x38] ss:$24 sps:$4 sm:$0xff]   ;;  %v3405_v50 = vpack.c.bf16 %v6442_v45, %v6441_v47 }
 0x7db   : > { %6000 = vmatprep.mubr.msk.bf16.mxu1 %vm1660_vm4, %v3075_v12  ;;  %v3223_v33 = vpack.c.bf16 %v6432_v27, %v6431_v30  ;;  %v6437_v35 = vld [vmem:[#allocation4 + $0x39] ss:$24 sps:$4 sm:$0xff]  }
 0x7dc   : > { %v3001_v13 = vpop.permute.xlu1 %3000  ;;  %v2996_v8 = vpop.permute.xlu0 %2995  ;;  %v6424_v15 = vld [vmem:[#allocation4 + $0x67] ss:$24 sps:$4 sm:$0xff]   ;;  %v3314_v41 = vpack.c.bf16 %v6437_v35, %v6436_v38 }
 0x7dd   : > { %3004 = vst.msk [vmem:[#allocation5 + $0x4f] sm:$0x1e] %vm2988_vm15, %v3001_v13  ;;  %2999 = vst.msk [vmem:[#allocation5 + $0x37] sm:$0x1e] %vm2988_vm15, %v2996_v8  ;;  %v6429_v28 = vld [vmem:[#allocation4 + $0x66] ss:$24 sps:$4 sm:$0xff]  }
 0x7de   : > { %v6434_v37 = vld [vmem:[#allocation4 + $0x68] ss:$24 sps:$4 sm:$0xff]   ;;  %v6458_v10 = vld [vmem:[%s7462_s11 + $0x38] sm:$0xff]  }
 0x7df   : > { %v6439_v44 = vld [vmem:[#allocation4 + $0x69] ss:$24 sps:$4 sm:$0xff]  }
 0x7e0   : > { %v3011_v16 = vpop.permute.xlu1 %3010  ;;  %v3006_v17 = vpop.permute.xlu0 %3005  ;;  %v6444_v54 = vld [vmem:[#allocation4 + $0x6a] ss:$24 sps:$4 sm:$0xff]   ;;  %v6446_v55 = vld [vmem:[#allocation5 + $0x6] ss:$24 sps:$4 sm:$0xff]  }
 0x7e1   : > { %v6425_v18 = vld [vmem:[#allocation4 + $0x97] ss:$24 sps:$4 sm:$0xff]   ;;  %3014 = vst.msk [vmem:[#allocation5 + $0x7f] sm:$0x1e] %vm2988_vm15, %v3011_v16  ;;  %3009 = vst.msk [vmem:[#allocation5 + $0x67] sm:$0x1e] %vm2988_vm15, %v3006_v17 }
 0x7e2   : > { %v3076_v20 = vpack.c.bf16 %v6425_v18, %v6424_v15  ;;  %v6430_v26 = vld [vmem:[#allocation4 + $0x96] ss:$24 sps:$4 sm:$0xff]   ;;  %v6445_v51 = vld [vmem:[#allocation4 + $0x9a] ss:$24 sps:$4 sm:$0xff]   ;;  %v6451_v63 = vld [vmem:[#allocation5 + $0x7] ss:$24 sps:$4 sm:$0xff]  }
 0x7e3   : > { %v3050_v29 = vpack.c.bf16 %v6430_v26, %v6429_v28  ;;  %v6435_v34 = vld [vmem:[#allocation4 + $0x98] ss:$24 sps:$4 sm:$0xff]   ;;  %v3406_v57 = vpack.c.bf16 %v6445_v51, %v6444_v54  ;;  %v6456_v7 = vld [vmem:[#allocation5 + $0x8] ss:$24 sps:$4 sm:$0xff]  }
 0x7e4   : > { %v3021_v23 = vpop.permute.xlu1 %3020  ;;  %v3016_v24 = vpop.permute.xlu0 %3015  ;;  %6001 = vmatmul.mubr.msk.bf16.vlgmr.msra.gmra.mrb[8].mxu1 %vm1660_vm4, %v3076_v20  ;;  %v3224_v39 = vpack.c.bf16 %v6435_v34, %v6434_v37  ;;  %v6440_v43 = vld [vmem:[#allocation4 + $0x99] ss:$24 sps:$4 sm:$0xff]   ;;  %v6461_v15 = vld [vmem:[#allocation5 + $0x9] ss:$24 sps:$4 sm:$0xff]   ;;  %v5555_v54 = vld [vmem:[%s7463_s12] ss:$0 sm:$0xff] }
 0x7e5   : > { %3024 = vst.msk [vmem:[#allocation5 + $0xaf] sm:$0x1e] %vm2988_vm15, %v3021_v23  ;;  %3019 = vst.msk [vmem:[#allocation5 + $0x97] sm:$0x1e] %vm2988_vm15, %v3016_v24  ;;  %6005 = vmatpush3.bf16.msra.mxu1 %v6423_v62  ;;  %6006 = vmatprep.mubr.msk.bf16.mxu1 %vm1660_vm4, %v3049_v22  ;;  %v3315_v46 = vpack.c.bf16 %v6440_v43, %v6439_v44  ;;  %v6447_v52 = vld [vmem:[#allocation5 + $0x36] ss:$24 sps:$4 sm:$0xff]  }
 0x7e6   : > { %6010 = vmatprep.subr.bf16.mxu1 %v6428_v21  ;;  %v3496_v59 = vpack.c.bf16 %v6447_v52, %v6446_v55  ;;  %v6452_v61 = vld [vmem:[#allocation5 + $0x37] ss:$24 sps:$4 sm:$0xff]   ;;  %v7286_v22 = vld [vmem:[%s7465_s14] ss:$0 sm:$0xff] }
 0x7e7   : > { %v3587_v3 = vpack.c.bf16 %v6452_v61, %v6451_v63  ;;  %v6457_v5 = vld [vmem:[#allocation5 + $0x38] ss:$24 sps:$4 sm:$0xff]   ;;  %v6465_v52 = vld [vmem:[%s7466_s15] sm:$0xff]  }
 0x7e8   : > { %v3982_v25 = vpop.permute.xlu0 %3981  ;;  %v4027_v32 = vpop.permute.xlu1 %4026  ;;  %v6449_v62 = vld [vmem:[#allocation5 + $0x66] ss:$24 sps:$4 sm:$0xff]   ;;  %v3678_v12 = vpack.c.bf16 %v6457_v5, %v6456_v7  ;;  %v6462_v8 = vld [vmem:[#allocation5 + $0x39] ss:$24 sps:$4 sm:$0xff]  }
 0x7e9   : > { %6061 = vmatmul.mubr.msk.bf16.vlgmr.msra.gmra.mrb[32].mxu0 %vm678_vm3, %v3982_v25  ;;  %v6454_v6 = vld [vmem:[#allocation5 + $0x67] ss:$24 sps:$4 sm:$0xff]   ;;  %v3769_v17 = vpack.c.bf16 %v6462_v8, %v6461_v15  ;;  %v6467_v55 = vld [vmem:[%s7466_s15 + $0x10] sm:$0xff]  }
 0x7ea   : > { %6065 = vmatpush3.bf16.msra.mxu0 %v7133_v11  ;;  %6066 = vmatprep.mubr.msk.bf16.mxu0 %vm6527_vm1, %v6526_v1  ;;  %v6459_v14 = vld [vmem:[#allocation5 + $0x68] ss:$24 sps:$4 sm:$0xff]   ;;  %v6468_v61 = vld [vmem:[%s7466_s15 + $0x18] sm:$0xff]   ;;  %v6471_v8 = vld [vmem:[%s7466_s15 + $0x30] sm:$0xff]  }
 0x7eb   : > { %6070 = vmatprep.subr.bf16.mxu0 %v6526_v1  ;;  %v6463_v19 = vld [vmem:[#allocation5 + $0x69] ss:$24 sps:$4 sm:$0xff]   ;;  %v6472_v15 = vld [vmem:[%s7466_s15 + $0x38] sm:$0xff]  }
 0x7ec   : > { %v4072_v36 = vpop.permute.xlu0 %4071  ;;  %v4117_v42 = vpop.permute.xlu1 %4116  ;;  %v6450_v60 = vld [vmem:[#allocation5 + $0x96] ss:$24 sps:$4 sm:$0xff]  }
 0x7ed   : > { %v3497_v0 = vpack.c.bf16 %v6450_v60, %v6449_v62  ;;  %v6455_v4 = vld [vmem:[#allocation5 + $0x97] ss:$24 sps:$4 sm:$0xff]  }
 0x7ee   : > { %v3588_v9 = vpack.c.bf16 %v6455_v4, %v6454_v6  ;;  %v6460_v13 = vld [vmem:[#allocation5 + $0x98] ss:$24 sps:$4 sm:$0xff]  }
 0x7ef   : > { %v3679_v16 = vpack.c.bf16 %v6460_v13, %v6459_v14  ;;  %v6464_v18 = vld [vmem:[#allocation5 + $0x99] ss:$24 sps:$4 sm:$0xff]  }
 0x7f0   : > { %6007 = vmatmul.mubr.msk.bf16.vlgmr.msra.gmra.mrb[8].mxu1 %vm1660_vm4, %v3050_v29  ;;  %v4162_v49 = vpop.permute.xlu0 %4161  ;;  %v4207_v53 = vpop.permute.xlu1 %4206  ;;  %v3770_v20 = vpack.c.bf16 %v6464_v18, %v6463_v19 }
 0x7f1   : > { %6011 = vmatpush3.bf16.msra.mxu1 %v6428_v21  ;;  %6067 = vmatmul.mubr.msk.bf16.vlgmr.msra.gmra.mrb[36].mxu0 %vm678_vm3, %v4027_v32 }
 0x7f2   : > { %6012 = vmatprep.mubr.msk.bf16.mxu1 %vm1660_vm4, %v3223_v33  ;;  %6071 = vmatpush3.bf16.msra.mxu0 %v7133_v11 }
 0x7f3   : > { %6072 = vmatprep.mubr.msk.bf16.mxu0 %vm6527_vm1, %v6526_v1  ;;  %6016 = vmatprep.subr.bf16.mxu1 %v6433_v31 }
 0x7f4   : > { %6076 = vmatprep.subr.bf16.mxu0 %v6526_v1  ;;  %v4252_v21 = vpop.permute.xlu0 %4251 }
 0x7f9   : > { %6073 = vmatmul.mubr.msk.bf16.vlgmr.msra.gmra.mrb[40].mxu0 %vm678_vm3, %v4072_v36 }
 0x7fa   : > { %6077 = vmatpush3.bf16.msra.mxu0 %v7133_v11  ;;  %6078 = vmatprep.mubr.msk.bf16.mxu0 %vm6527_vm1, %v6526_v1 }
 0x7fb   : > { %6082 = vmatprep.subr.bf16.mxu0 %v6526_v1 }
 0x7fc   : > { %6013 = vmatmul.mubr.msk.bf16.vlgmr.msra.gmra.mrb[8].mxu1 %vm1660_vm4, %v3224_v39 }
 0x7fd   : > { %6017 = vmatpush3.bf16.msra.mxu1 %v6433_v31  ;;  %6018 = vmatprep.mubr.msk.bf16.mxu1 %vm1660_vm4, %v3314_v41 }
 0x7fe   : > { %6022 = vmatprep.subr.bf16.mxu1 %v6438_v40 }
 0x801   : > { %6079 = vmatmul.mubr.msk.bf16.vlgmr.msra.gmra.mrb[44].mxu0 %vm678_vm3, %v4117_v42 }
 0x802   : > { %6083 = vmatpush3.bf16.msra.mxu0 %v7133_v11  ;;  %6084 = vmatprep.mubr.msk.bf16.mxu0 %vm6527_vm1, %v6526_v1 }
 0x803   : > { %6088 = vmatprep.subr.bf16.mxu0 %v6526_v1 }
 0x808   : > { %6019 = vmatmul.mubr.msk.bf16.vlgmr.msra.gmra.mrb[8].mxu1 %vm1660_vm4, %v3315_v46 }
 0x809   : > { %6023 = vmatpush3.bf16.msra.mxu1 %v6438_v40  ;;  %6085 = vmatmul.mubr.msk.bf16.vlgmr.msra.gmra.mrb[48].mxu0 %vm678_vm3, %v4162_v49 }
 0x80a   : > { %6024 = vmatprep.mubr.msk.bf16.mxu1 %vm1660_vm4, %v3405_v50  ;;  %6089 = vmatpush3.bf16.msra.mxu0 %v7133_v11 }
 0x80b   : > { %6090 = vmatprep.mubr.msk.bf16.mxu0 %vm6527_vm1, %v6526_v1  ;;  %6028 = vmatprep.subr.bf16.mxu1 %v6443_v48 }
 0x80c   : > { %6100 = vmatprep.subr.bf16.mxu0 %v6526_v1 }
 0x811   : > { %6091 = vmatmul.mubr.msk.bf16.vlgmr.msra.gmra.mrb[52].mxu0 %vm678_vm3, %v4207_v53  ;;  %v6466_v53 = vld [vmem:[%s7466_s15 + $0x8] sm:$0xff]  }
 0x812   : > { %6116 = vmatprep.mubr.msk.bf16.mxu0 %vm6527_vm1, %v6526_v1  ;;  %6101 = vmatpush3.bf16.msra.mxu0 %v6465_v52 }
 0x813   : > { %6102 = vmatprep.subr.bf16.mxu0 %v6526_v1 }
 0x814   : > { %6025 = vmatmul.mubr.msk.bf16.vlgmr.msra.gmra.mrb[8].mxu1 %vm1660_vm4, %v3406_v57 }
 0x815   : > { %6029 = vmatpush3.bf16.msra.mxu1 %v6443_v48  ;;  %6030 = vmatprep.mubr.msk.bf16.mxu1 %vm1660_vm4, %v3496_v59 }
 0x816   : > { %6034 = vmatprep.subr.bf16.mxu1 %v6448_v58  ;;  %6103 = vmatpush3.bf16.msra.mxu0 %v6466_v53  ;;  %v6473_v53 = vld [vmem:[%s7468_s17 + $0x8] sm:$0xff]  }
 0x817   : > { %6104 = vmatprep.subr.bf16.mxu0 %v6526_v1 }
 0x81a   : > { %6105 = vmatpush3.bf16.msra.mxu0 %v6467_v55 }
 0x81b   : > { %6106 = vmatprep.subr.bf16.mxu0 %v6526_v1 }
 0x81e   : > { %6107 = vmatpush3.bf16.msra.mxu0 %v6468_v61 }
 0x81f   : > { %6108 = vmatprep.subr.bf16.mxu0 %v6526_v1 }
 0x820   : > { %6031 = vmatmul.mubr.msk.bf16.vlgmr.msra.gmra.mrb[8].mxu1 %vm1660_vm4, %v3497_v0  ;;  %v6469_v0 = vld [vmem:[%s7466_s15 + $0x20] sm:$0xff]  }
 0x821   : > { %6035 = vmatpush3.bf16.msra.mxu1 %v6448_v58  ;;  %6036 = vmatprep.mubr.msk.bf16.mxu1 %vm1660_vm4, %v3587_v3 }
 0x822   : > { %6040 = vmatprep.subr.bf16.mxu1 %v6453_v2  ;;  %6109 = vmatpush3.bf16.msra.mxu0 %v6469_v0 }
 0x823   : > { %6110 = vmatprep.subr.bf16.mxu0 %v6526_v1 }
 0x82c   : > { %6037 = vmatmul.mubr.msk.bf16.vlgmr.msra.gmra.mrb[8].mxu1 %vm1660_vm4, %v3588_v9 }
 0x82d   : > { %6041 = vmatpush3.bf16.msra.mxu1 %v6453_v2  ;;  %6042 = vmatprep.mubr.msk.bf16.mxu1 %vm1660_vm4, %v3678_v12 }
 0x82e   : > { %6046 = vmatprep.subr.bf16.mxu1 %v6458_v10 }
 0x838   : > { %6043 = vmatmul.mubr.msk.bf16.vlgmr.msra.gmra.mrb[8].mxu1 %vm1660_vm4, %v3679_v16 }
 0x839   : > { %6047 = vmatpush3.bf16.msra.mxu1 %v6458_v10  ;;  %6048 = vmatprep.mubr.msk.bf16.mxu1 %vm1660_vm4, %v3769_v17  ;;  %v6470_v10 = vld [vmem:[%s7466_s15 + $0x28] sm:$0xff]  }
 0x83a   : > { %6094 = vmatprep.subr.bf16.mxu1 %v6526_v1  ;;  %6111 = vmatpush3.bf16.msra.mxu0 %v6470_v10  ;;  %v6481_v10 = vld [vmem:[%s7468_s17 + $0x10] sm:$0xff]  }
 0x83b   : > { %6112 = vmatprep.subr.bf16.mxu0 %v6526_v1 }
 0x83e   : > { %6113 = vmatpush3.bf16.msra.mxu0 %v6471_v8 }
 0x83f   : > { %6114 = vmatprep.subr.bf16.mxu0 %v6526_v1 }
 0x842   : > { %6115 = vmatpush3.bf16.msra.mxu0 %v6472_v15 }
 0x844   : > { %6049 = vmatmul.mubr.msk.bf16.vlgmr.msra.gmra.mrb[8].mxu1 %vm1660_vm4, %v3770_v20 }
 0x845   : > { %6095 = vmatpush3.bf16.msra.mxu1 %v7133_v11  ;;  %6096 = vmatprep.mubr.msk.bf16.mxu1 %vm6527_vm1, %v6526_v1  ;;  %vm3882_vm1 = vcmask 785408  }
 0x846   : > { %6120 = vmatprep.subr.bf16.mxu1 %v6473_v53 }
 0x84c   : > { %6097 = vmatmul.mubr.msk.bf16.vlgmr.msra.gmra.mrb[12].mxu1 %vm678_vm3, %v4252_v21 }
 0x84d   : > { %6121 = vmatpush3.bf16.msra.mxu1 %v6473_v53 }
 0x8bc   : > { %v4020_v23 = vpop.f32.mrb[32].mxu0 }
 0x8bd   : > { %v4021_v24 = vadd.f32 %v7286_v22, %v4020_v23  ;;  %v6062_v25 = vpop.f32.mrb[33].mxu0 }
 0x8be   : > { %v4023_v26 = vpop.f32.mrb[34].mxu0 }
 0x8bf   : > { %4297 = vrot.lane.b32.xlu0 %v4021_v24, %s7510_s29  ;;  %v6063_v27 = vpop.f32.mrb[35].mxu0 }
 0x8c4   : > { %v4065_v11 = vpop.f32.mrb[36].mxu0 }
 0x8c5   : > { %v4066_v28 = vadd.f32 %v7286_v22, %v4065_v11  ;;  %v6068_v29 = vpop.f32.mrb[37].mxu0  ;;  %v3976_v11 = vadd.f32 %v7286_v22, %v7161_v56 }
 0x8c6   : > { %v4068_v30 = vpop.f32.mrb[38].mxu0 }
 0x8c7   : > { %4301 = vrot.lane.b32.xlu0 %v4066_v28, %s7513_s20  ;;  %v6069_v31 = vpop.f32.mrb[39].mxu0 }
 0x8cc   : > { %v4110_v32 = vpop.f32.mrb[40].mxu0 }
 0x8cd   : > { %v4111_v33 = vadd.f32 %v7286_v22, %v4110_v32  ;;  %v6074_v34 = vpop.f32.mrb[41].mxu0 }
 0x8ce   : > { %v4113_v35 = vpop.f32.mrb[42].mxu0 }
 0x8cf   : > { %4305 = vrot.lane.b32.xlu0 %v4111_v33, %s7515_s24  ;;  %v6075_v36 = vpop.f32.mrb[43].mxu0 }
 0x8d4   : > { %v4155_v37 = vpop.f32.mrb[44].mxu0 }
 0x8d5   : > { %v4156_v38 = vadd.f32 %v7286_v22, %v4155_v37  ;;  %v6080_v39 = vpop.f32.mrb[45].mxu0 }
 0x8d6   : > { %v4158_v40 = vpop.f32.mrb[46].mxu0 }
 0x8d7   : > { %4309 = vrot.lane.b32.xlu0 %v4156_v38, %s7493_s2  ;;  %v6081_v41 = vpop.f32.mrb[47].mxu0 }
 0x8dc   : > { %v4200_v42 = vpop.f32.mrb[48].mxu0 }
 0x8dd   : > { %v4201_v43 = vadd.f32 %v7286_v22, %v4200_v42  ;;  %v6086_v44 = vpop.f32.mrb[49].mxu0 }
 0x8de   : > { %v4203_v45 = vpop.f32.mrb[50].mxu0 }
 0x8df   : > { %4313 = vrot.lane.b32.xlu0 %v4201_v43, %s7518_s25  ;;  %v6087_v46 = vpop.f32.mrb[51].mxu0 }
 0x8e0   : > { %v5565_v46 = vld [vmem:[%s7467_s16] ss:$0 sm:$0xff] }
 0x8e4   : > { %v4245_v47 = vpop.f32.mrb[52].mxu0 }
 0x8e5   : > { %v4246_v48 = vadd.f32 %v7286_v22, %v4245_v47  ;;  %v6092_v49 = vpop.f32.mrb[53].mxu0 }
 0x8e6   : > { %v4248_v50 = vpop.f32.mrb[54].mxu0 }
 0x8e7   : > { %4317 = vrot.lane.b32.xlu0 %v4246_v48, %s7496_s27  ;;  %v6093_v51 = vpop.f32.mrb[55].mxu0  ;;  %s7522_s27 = smov 96  }
 0x917   : > { %v6050_v57 = vpop.f32.mrb[8].mxu1 }
 0x918   : > { %v3845_v58 = vadd.f32 %v6050_v57, %v5555_v54  ;;  %v3817_v59 = vpop.f32.mrb[9].mxu1 }
 0x919   : > { %v6051_v60 = vpop.f32.mrb[10].mxu1  ;;  %v3843_v3 = vadd.f32 %v5555_v54, %v3817_v59 }
 0x91a   : > { %3864 = vrot.lane.b32.xlu1 %v3845_v58, %s7521_s3  ;;  %v3820_v62 = vpop.f32.mrb[11].mxu1  ;;  %v3853_v63 = vcombine.high %v3845_v58, %v3845_v58  ;;  %v3846_v4 = vadd.f32 %v6051_v60, %v5555_v54 }
 0x91b   : > { %v3851_v12 = vcombine.high %v3843_v3, %v3843_v3  ;;  %v3844_v13 = vadd.f32 %v5555_v54, %v3820_v62  ;;  %v6476_v54 = vld [vmem:[%s7468_s17] sm:$0xff]  }
 0x91c   : > { %v3854_v16 = vcombine.high %v3846_v4, %v3846_v4  ;;  %6126 = vmatprep.subr.bf16.mxu1 %v6476_v54 }
 0x91d   : > { %v3852_v14 = vcombine.high %v3844_v13, %v3844_v13 }
 0x91e   : > { %3867 = vrot.lane.b32.xlu1 %v3853_v63, %s7518_s25 }
 0x91f   : > { %v4290_v2 = vpop.f32.mrb[12].mxu1 }
 0x920   : > { %v4291_v5 = vadd.f32 %v7286_v22, %v4290_v2  ;;  %v6098_v6 = vpop.f32.mrb[13].mxu1 }
 0x921   : > { %v4293_v7 = vpop.f32.mrb[14].mxu1 }
 0x922   : > { %3870 = vrot.lane.b32.xlu1 %v3846_v4, %s7522_s27  ;;  %v6099_v9 = vpop.f32.mrb[15].mxu1  ;;  %4321 = vrot.lane.b32.xlu0 %v4291_v5, %s7517_s26  ;;  %v6480_v4 = vld [vmem:[#allocation6 + $0x34] ss:$24 sps:$4 sm:$0xff]  }
 0x926   : > { %3855 = vrot.lane.b32.xlu1 %v3851_v12, %s7510_s29  ;;  %v6482_v12 = vld [vmem:[#allocation6 + $0x64] ss:$24 sps:$4 sm:$0xff]  }
 0x92a   : > { %3858 = vrot.lane.b32.xlu1 %v3844_v13, %s7513_s20  ;;  %v6483_v13 = vld [vmem:[#allocation6 + $0x94] ss:$24 sps:$4 sm:$0xff]  }
 0x92e   : > { %3861 = vrot.lane.b32.xlu1 %v3852_v14, %s7515_s24  ;;  %v4542_v14 = vpack.c.bf16 %v6483_v13, %v6482_v12 }
 0x931   : > { %v4298_v17 = vpop.permute.xlu0 %4297 }
 0x932   : > { %3873 = vrot.lane.b32.xlu1 %v3854_v16, %s7517_s26  ;;  %v4324_v28 = vsel %vm1660_vm4, %v3976_v11, %v4298_v17  ;;  %v6486_v16 = vld [vmem:[%s7468_s17 + $0x18] sm:$0xff]  }
 0x939   : > { %v4302_v19 = vpop.permute.xlu0 %4301 }
 0x93a   : > { %v4325_v30 = vsel %vm1663_vm5, %v4324_v28, %v4302_v19 }
 0x941   : > { %v4306_v21 = vpop.permute.xlu0 %4305 }
 0x942   : > { %v4326_v33 = vsel %vm1667_vm7, %v4325_v30, %v4306_v21 }
 0x949   : > { %v4310_v24 = vpop.permute.xlu0 %4309 }
 0x94a   : > { %v4327_v35 = vsel %vm1712_vm9, %v4326_v33, %v4310_v24  ;;  %v6491_v24 = vld [vmem:[%s7468_s17 + $0x20] sm:$0xff]  }
 0x951   : > { %v4314_v26 = vpop.permute.xlu0 %4313 }
 0x952   : > { %v4328_v36 = vsel %vm3880_vm0, %v4327_v35, %v4314_v26 }
 0x959   : > { %v4318_v1 = vpop.permute.xlu0 %4317 }
 0x95a   : > { %v4329_v38 = vsel %vm3882_vm1, %v4328_v36, %v4318_v1 }
 0x98c   : > { %v3865_v18 = vpop.permute.xlu1 %3864 }
 0x990   : > { %v3868_v20 = vpop.permute.xlu1 %3867 }
 0x994   : > { %v3871_v23 = vpop.permute.xlu1 %3870  ;;  %v4322_v56 = vpop.permute.xlu0 %4321 }
 0x995   : > { %v4330_v41 = vsel %vm3884_vm2, %v4329_v38, %v4322_v56  ;;  %v6501_v56 = vld [vmem:[%s7468_s17 + $0x30] sm:$0xff]  }
 0x998   : > { %v3856_v25 = vpop.permute.xlu1 %3855 }
 0x999   : > { %v3876_v29 = vsel %vm1660_vm4, %v3843_v3, %v3856_v25  ;;  %v6479_v3 = vld [vmem:[#allocation6 + $0x4] ss:$24 sps:$4 sm:$0xff]  }
 0x99a   : > { %v4541_v7 = vpack.c.bf16 %v6480_v4, %v6479_v3 }
 0x99c   : > { %v3859_v27 = vpop.permute.xlu1 %3858 }
 0x99d   : > { %v3877_v31 = vsel %vm1663_vm5, %v3876_v29, %v3859_v27  ;;  %v6496_v29 = vld [vmem:[%s7468_s17 + $0x28] sm:$0xff]  }
 0x9a0   : > { %v3862_v32 = vpop.permute.xlu1 %3861 }
 0x9a1   : > { %v3878_v34 = vsel %vm1667_vm7, %v3877_v31, %v3862_v32 }
 0x9a2   : > { %v3879_v22 = vsel %vm1712_vm9, %v3878_v34, %v3865_v18 }
 0x9a3   : > { %v3881_v37 = vsel %vm3880_vm0, %v3879_v22, %v3868_v20 }
 0x9a4   : > { %v3883_v39 = vsel %vm3882_vm1, %v3881_v37, %v3871_v23  ;;  %v3874_v40 = vpop.permute.xlu1 %3873 }
 0x9a5   : > { %v3885_v42 = vsel %vm3884_vm2, %v3883_v39, %v3874_v40 }
 0x9a6   : > { %v4331_v43 = vadd.f32 %v4330_v41, %v3885_v42  ;;  %v6506_v41 = vld [vmem:[%s7468_s17 + $0x38] sm:$0xff]  }
 0x9a8   : > { %v7359_v44 = vmax.f32 %v4331_v43, 0.0 }
 0x9aa   : > { %v4333_v45 = vpack.c.bf16 %v7359_v44, %v7359_v44 }
 0x9ac   : > { %6117 = vmatmul.mubr.bf16.vlgmr.msra.gmra.mrb[56].mxu0 %v4333_v45 }
 0xa7f   : > { %v4439_v47 = vpop.f32.mrb[56].mxu0 }
 0xa80   : > { %v4440_v48 = vadd.f32 %v5565_v46, %v4439_v47  ;;  %v6118_v49 = vpop.f32.mrb[57].mxu0 }
 0xa81   : > { %v4442_v50 = vpop.f32.mrb[58].mxu0  ;;  %v6511_v49 = vld [vmem:[%s7468_s17 + $0x40] sm:$0xff]  }
 0xa82   : > { %v4445_v51 = vmax.f32 %v4440_v48, 0.0  ;;  %v6119_v52 = vpop.f32.mrb[59].mxu0 }
 0xa83   : > { %v6515_v52 = vld [vmem:[#allocation6 + $0x3c] ss:$24 sps:$4 sm:$0xff]  }
 0xa84   : > { %4480 = vst.msk [vmem:[#allocation6 + $0x8] sm:$0xf] %vm2914_vm13, %v4445_v51  ;;  %4487 = vrot.lane.b32.xlu0 %v4445_v51, %s7522_s27  ;;  %4482 = vrot.lane.b32.xlu1 %v4445_v51, %s7517_s26 }
 0xa88   : > { %4497 = vrot.lane.b32.xlu0 %v4445_v51, %s7521_s3  ;;  %4492 = vrot.lane.b32.xlu1 %v4445_v51, %s7518_s25 }
 0xa8c   : > { %4507 = vrot.lane.b32.xlu0 %v4445_v51, %s7513_s20  ;;  %4502 = vrot.lane.b32.xlu1 %v4445_v51, %s7515_s24 }
 0xa90   : > { %4512 = vrot.lane.b32.xlu1 %v4445_v51, %s7510_s29  ;;  %v6514_v51 = vld [vmem:[#allocation6 + $0xc] ss:$24 sps:$4 sm:$0xff]  }
 0xaf6   : > { %v4488_v55 = vpop.permute.xlu0 %4487  ;;  %v4483_v57 = vpop.permute.xlu1 %4482 }
 0xaf7   : > { %4491 = vst.msk [vmem:[#allocation6 + $0x38] sm:$0xf] %vm2914_vm13, %v4488_v55  ;;  %4486 = vst.msk [vmem:[#allocation6 + $0x20] sm:$0xf] %vm2914_vm13, %v4483_v57  ;;  %v5261_v55 = vpack.c.bf16 %v6515_v52, %v6514_v51 }
 0xafa   : > { %v4498_v58 = vpop.permute.xlu0 %4497  ;;  %v4493_v59 = vpop.permute.xlu1 %4492 }
 0xafb   : > { %4501 = vst.msk [vmem:[#allocation6 + $0x68] sm:$0xf] %vm2914_vm13, %v4498_v58  ;;  %4496 = vst.msk [vmem:[#allocation6 + $0x50] sm:$0xf] %vm2914_vm13, %v4493_v59  ;;  %v6516_v58 = vld [vmem:[#allocation6 + $0x6c] ss:$24 sps:$4 sm:$0xff]  }
 0xafc   : > { %v6517_v59 = vld [vmem:[#allocation6 + $0x9c] ss:$24 sps:$4 sm:$0xff]  }
 0xafe   : > { %v4508_v60 = vpop.permute.xlu0 %4507  ;;  %v4503_v61 = vpop.permute.xlu1 %4502  ;;  %v6474_v62 = vld [vmem:[#allocation6 + $0x5] ss:$24 sps:$4 sm:$0xff]   ;;  %v6499_v34 = vld [vmem:[#allocation6 + $0x9] ss:$24 sps:$4 sm:$0xff]  }
 0xaff   : > { %4511 = vst.msk [vmem:[#allocation6 + $0x98] sm:$0xf] %vm2914_vm13, %v4508_v60  ;;  %4506 = vst.msk [vmem:[#allocation6 + $0x80] sm:$0xf] %vm2914_vm13, %v4503_v61  ;;  %v6484_v15 = vld [vmem:[#allocation6 + $0x6] ss:$24 sps:$4 sm:$0xff]   ;;  %v5262_v60 = vpack.c.bf16 %v6517_v59, %v6516_v58 }
 0xb00   : > { %v6489_v21 = vld [vmem:[#allocation6 + $0x7] ss:$24 sps:$4 sm:$0xff]   ;;  %v6509_v47 = vld [vmem:[#allocation6 + $0xb] ss:$24 sps:$4 sm:$0xff]  }
 0xb01   : > { %v6494_v1 = vld [vmem:[#allocation6 + $0x8] ss:$24 sps:$4 sm:$0xff]  }
 0xb02   : > { %v4513_v63 = vpop.permute.xlu1 %4512  ;;  %v6475_v0 = vld [vmem:[#allocation6 + $0x35] ss:$24 sps:$4 sm:$0xff]   ;;  %v6500_v32 = vld [vmem:[#allocation6 + $0x39] ss:$24 sps:$4 sm:$0xff]   ;;  %v5601_v61 = vld [vmem:[%s7469_s18] ss:$0 sm:$0xff] }
 0xb03   : > { %4516 = vst.msk [vmem:[#allocation6 + $0xb0] sm:$0xf] %vm2914_vm13, %v4513_v63  ;;  %v4567_v2 = vpack.c.bf16 %v6475_v0, %v6474_v62  ;;  %v6485_v8 = vld [vmem:[#allocation6 + $0x36] ss:$24 sps:$4 sm:$0xff]   ;;  %v4988_v22 = vpack.c.bf16 %v6500_v32, %v6499_v34  ;;  %v6505_v37 = vld [vmem:[#allocation6 + $0x3a] ss:$24 sps:$4 sm:$0xff]  }
 0xb04   : > { %v4715_v17 = vpack.c.bf16 %v6485_v8, %v6484_v15  ;;  %v6490_v19 = vld [vmem:[#allocation6 + $0x37] ss:$24 sps:$4 sm:$0xff]   ;;  %v6504_v39 = vld [vmem:[#allocation6 + $0xa] ss:$24 sps:$4 sm:$0xff]   ;;  %v6510_v45 = vld [vmem:[#allocation6 + $0x3b] ss:$24 sps:$4 sm:$0xff]  }
 0xb05   : > { %6122 = vmatprep.mubr.msk.bf16.mxu1 %vm1660_vm4, %v4567_v2  ;;  %v4806_v25 = vpack.c.bf16 %v6490_v19, %v6489_v21  ;;  %v6495_v27 = vld [vmem:[#allocation6 + $0x38] ss:$24 sps:$4 sm:$0xff]   ;;  %v5079_v42 = vpack.c.bf16 %v6505_v37, %v6504_v39  ;;  %v5170_v50 = vpack.c.bf16 %v6510_v45, %v6509_v47 }
 0xb06   : > { %v6477_v5 = vld [vmem:[#allocation6 + $0x65] ss:$24 sps:$4 sm:$0xff]   ;;  %v4897_v30 = vpack.c.bf16 %v6495_v27, %v6494_v1  ;;  %v6502_v38 = vld [vmem:[#allocation6 + $0x69] ss:$24 sps:$4 sm:$0xff]  }
 0xb07   : > { %v6487_v20 = vld [vmem:[#allocation6 + $0x66] ss:$24 sps:$4 sm:$0xff]   ;;  %v6507_v46 = vld [vmem:[#allocation6 + $0x6a] ss:$24 sps:$4 sm:$0xff]  }
 0xb08   : > { %v6492_v11 = vld [vmem:[#allocation6 + $0x67] ss:$24 sps:$4 sm:$0xff]  }
 0xb09   : > { %v6497_v33 = vld [vmem:[#allocation6 + $0x68] ss:$24 sps:$4 sm:$0xff]  }
 0xb0a   : > { %v6478_v6 = vld [vmem:[#allocation6 + $0x95] ss:$24 sps:$4 sm:$0xff]   ;;  %v6503_v36 = vld [vmem:[#allocation6 + $0x99] ss:$24 sps:$4 sm:$0xff]  }
 0xb0b   : > { %v4568_v9 = vpack.c.bf16 %v6478_v6, %v6477_v5  ;;  %v6488_v18 = vld [vmem:[#allocation6 + $0x96] ss:$24 sps:$4 sm:$0xff]   ;;  %v4989_v40 = vpack.c.bf16 %v6503_v36, %v6502_v38  ;;  %v6508_v43 = vld [vmem:[#allocation6 + $0x9a] ss:$24 sps:$4 sm:$0xff]  }
 0xb0c   : > { %v4716_v23 = vpack.c.bf16 %v6488_v18, %v6487_v20  ;;  %v6493_v26 = vld [vmem:[#allocation6 + $0x97] ss:$24 sps:$4 sm:$0xff]   ;;  %v5080_v48 = vpack.c.bf16 %v6508_v43, %v6507_v46  ;;  %v6513_v53 = vld [vmem:[#allocation6 + $0x9b] ss:$24 sps:$4 sm:$0xff]  }
 0xb0d   : > { %6123 = vmatmul.mubr.msk.bf16.vlgmr.msra.gmra.mrb[16].mxu1 %vm1660_vm4, %v4568_v9  ;;  %v4807_v28 = vpack.c.bf16 %v6493_v26, %v6492_v11  ;;  %v6498_v31 = vld [vmem:[#allocation6 + $0x98] ss:$24 sps:$4 sm:$0xff]  }
 0xb0e   : > { %6127 = vmatpush3.bf16.msra.mxu1 %v6476_v54  ;;  %6128 = vmatprep.mubr.msk.bf16.mxu1 %vm1660_vm4, %v4541_v7  ;;  %v4898_v35 = vpack.c.bf16 %v6498_v31, %v6497_v33  ;;  %v6512_v54 = vld [vmem:[#allocation6 + $0x6b] ss:$24 sps:$4 sm:$0xff]  }
 0xb0f   : > { %6132 = vmatprep.subr.bf16.mxu1 %v6481_v10  ;;  %v5171_v57 = vpack.c.bf16 %v6513_v53, %v6512_v54 }
 0xb19   : > { %6129 = vmatmul.mubr.msk.bf16.vlgmr.msra.gmra.mrb[16].mxu1 %vm1660_vm4, %v4542_v14 }
 0xb1a   : > { %6133 = vmatpush3.bf16.msra.mxu1 %v6481_v10  ;;  %6134 = vmatprep.mubr.msk.bf16.mxu1 %vm1660_vm4, %v4715_v17 }
 0xb1b   : > { %6138 = vmatprep.subr.bf16.mxu1 %v6486_v16 }
 0xb25   : > { %6135 = vmatmul.mubr.msk.bf16.vlgmr.msra.gmra.mrb[16].mxu1 %vm1660_vm4, %v4716_v23 }
 0xb26   : > { %6139 = vmatpush3.bf16.msra.mxu1 %v6486_v16  ;;  %6140 = vmatprep.mubr.msk.bf16.mxu1 %vm1660_vm4, %v4806_v25 }
 0xb27   : > { %6144 = vmatprep.subr.bf16.mxu1 %v6491_v24 }
 0xb31   : > { %6141 = vmatmul.mubr.msk.bf16.vlgmr.msra.gmra.mrb[16].mxu1 %vm1660_vm4, %v4807_v28 }
 0xb32   : > { %6145 = vmatpush3.bf16.msra.mxu1 %v6491_v24  ;;  %6146 = vmatprep.mubr.msk.bf16.mxu1 %vm1660_vm4, %v4897_v30 }
 0xb33   : > { %6150 = vmatprep.subr.bf16.mxu1 %v6496_v29 }
 0xb3d   : > { %6147 = vmatmul.mubr.msk.bf16.vlgmr.msra.gmra.mrb[16].mxu1 %vm1660_vm4, %v4898_v35 }
 0xb3e   : > { %6151 = vmatpush3.bf16.msra.mxu1 %v6496_v29  ;;  %6152 = vmatprep.mubr.msk.bf16.mxu1 %vm1660_vm4, %v4988_v22 }
 0xb3f   : > { %6156 = vmatprep.subr.bf16.mxu1 %v6501_v56 }
 0xb49   : > { %6153 = vmatmul.mubr.msk.bf16.vlgmr.msra.gmra.mrb[16].mxu1 %vm1660_vm4, %v4989_v40 }
 0xb4a   : > { %6157 = vmatpush3.bf16.msra.mxu1 %v6501_v56  ;;  %6158 = vmatprep.mubr.msk.bf16.mxu1 %vm1660_vm4, %v5079_v42 }
 0xb4b   : > { %6162 = vmatprep.subr.bf16.mxu1 %v6506_v41 }
 0xb55   : > { %6159 = vmatmul.mubr.msk.bf16.vlgmr.msra.gmra.mrb[16].mxu1 %vm1660_vm4, %v5080_v48 }
 0xb56   : > { %6163 = vmatpush3.bf16.msra.mxu1 %v6506_v41  ;;  %6164 = vmatprep.mubr.msk.bf16.mxu1 %vm1660_vm4, %v5170_v50 }
 0xb57   : > { %6168 = vmatprep.subr.bf16.mxu1 %v6511_v49 }
 0xb61   : > { %6165 = vmatmul.mubr.msk.bf16.vlgmr.msra.gmra.mrb[16].mxu1 %vm1660_vm4, %v5171_v57 }
 0xb62   : > { %6169 = vmatpush3.bf16.msra.mxu1 %v6511_v49  ;;  %6170 = vmatprep.mubr.msk.bf16.mxu1 %vm1660_vm4, %v5261_v55 }
 0xb6d   : > { %6171 = vmatmul.mubr.msk.bf16.vlgmr.msra.gmra.mrb[16].mxu1 %vm1660_vm4, %v5262_v60 }
 0xc40   : > { %v6172_v62 = vpop.f32.mrb[16].mxu1 }
 0xc41   : > { %v5337_v63 = vadd.f32 %v6172_v62, %v5601_v61  ;;  %v5309_v0 = vpop.f32.mrb[17].mxu1 }
 0xc42   : > { %v6173_v2 = vpop.f32.mrb[18].mxu1  ;;  %v5335_v4 = vadd.f32 %v5601_v61, %v5309_v0 }
 0xc43   : > { %v5345_v3 = vcombine.high %v5337_v63, %v5337_v63  ;;  %5356 = vrot.lane.b32.xlu1 %v5337_v63, %s7521_s3  ;;  %v5312_v5 = vpop.f32.mrb[19].mxu1  ;;  %v5338_v9 = vadd.f32 %v6173_v2, %v5601_v61 }
 0xc44   : > { %v5336_v6 = vadd.f32 %v5601_v61, %v5312_v5  ;;  %v5343_v7 = vcombine.high %v5335_v4, %v5335_v4 }
 0xc45   : > { %5359 = vrot.lane.b32.xlu0 %v5345_v3, %s7518_s25  ;;  %v5346_v12 = vcombine.high %v5338_v9, %v5338_v9 }
 0xc46   : > { %v5344_v10 = vcombine.high %v5336_v6, %v5336_v6 }
 0xc47   : > { %5350 = vrot.lane.b32.xlu1 %v5336_v6, %s7513_s20 }
 0xc49   : > { %5347 = vrot.lane.b32.xlu0 %v5343_v7, %s7510_s29  ;;  %s5437_s29 = sshll.u32 %s7524_s30, 2 }
 0xc4b   : > { %5362 = vrot.lane.b32.xlu1 %v5338_v9, %s7522_s27 }
 0xc4d   : > { %5353 = vrot.lane.b32.xlu0 %v5344_v10, %s7515_s24 }
 0xc51   : > { %5365 = vrot.lane.b32.xlu0 %v5346_v12, %s7517_s26  ;;  %s597_s26 = scalar_lea.vmem %s7470_s19, %s5437_s29 }
 0xcb5   : > { %v5357_v13 = vpop.permute.xlu1 %5356 }
 0xcb7   : > { %v5360_v8 = vpop.permute.xlu0 %5359 }
 0xcb9   : > { %v5351_v15 = vpop.permute.xlu1 %5350 }
 0xcbb   : > { %v5348_v14 = vpop.permute.xlu0 %5347 }
 0xcbc   : > { %v5368_v16 = vsel %vm1660_vm4, %v5335_v4, %v5348_v14 }
 0xcbd   : > { %v5369_v17 = vsel %vm1663_vm5, %v5368_v16, %v5351_v15  ;;  %v5363_v21 = vpop.permute.xlu1 %5362 }
 0xcbf   : > { %v5354_v18 = vpop.permute.xlu0 %5353 }
 0xcc0   : > { %v5370_v19 = vsel %vm1667_vm7, %v5369_v17, %v5354_v18 }
 0xcc1   : > { %v5371_v20 = vsel %vm1712_vm9, %v5370_v19, %v5357_v13 }
 0xcc2   : > { %v5372_v23 = vsel %vm3880_vm0, %v5371_v20, %v5360_v8 }
 0xcc3   : > { %v5373_v24 = vsel %vm3882_vm1, %v5372_v23, %v5363_v21  ;;  %v5366_v25 = vpop.permute.xlu0 %5365 }
 0xcc4   : > { %v5374_v26 = vsel %vm3884_vm2, %v5373_v24, %v5366_v25 }
 0xcc5   : > { %v5375_v27 = vadd.f32 %v5374_v26, %v7359_v44 }
 0xcc7   : > { %v5376_v11 = vmax.f32 %v5375_v27, 0.0 }
 0xcc9   : > { %5377 = vst [vmem:[%s597_s26] sm:$0xf] %v5376_v11 }
 0xcca PF: > { %s29_s0 = sadd.s32 1, %s6524_s0  }
 0xccb   : > { %p26_p4 = scmp.ge.s32.totalorder %s29_s0, 6  }
 0xccd   :  { %28 = sbr.rel (!%p26_p4) target bundleno = 6 (0x6), region = 161 }

</bundles_post_ra>
